<compile_context>
chip_gen: v7x
topology: tpu7x:2x2x1
jax: 0.10.0
libtpu: 0.0.40
codegen_flags: <defaults>
</compile_context>

<pallas_src>
import jax
import jax.numpy as jnp
from jax.experimental import pallas as pl
from jax.experimental.pallas import tpu as pltpu

# ---------------- small synthetic configuration ----------------
B = 8                      # batch
C, H, W = 4, 16, 16        # image-like input (NCHW)
NUM_CLASSES = 8            # len(classes)
N0, N1, N2 = 128, 128, 128 # args.N0 / args.N1 / args.N2 of model_3layer
DICT_SIZE = 128            # dict_size
D_IN = C * H * W


# ---------------- fused kernel ----------------
# TODO(synk): the full ResNet-50 'layer4' backbone cannot be reproduced here; the feature stage is
# a stand-in linear projection + ReLU over the flattened NCHW image producing the (B, N0) feature.
def _fused_kernel(lbl_smem, lbl_col_ref, x_ref, wf_ref, bf_ref,
                  w1c_ref, b1c_ref, w2_ref, b2_ref, w3_ref, b3_ref,
                  y_ref):
    # ---- feature stage: relu(x @ Wf + bf) ----
    x_bf = x_ref[...].astype(jnp.bfloat16)                              # (B, D_IN)
    feat = jnp.maximum(
        jnp.dot(x_bf, wf_ref[...], preferred_element_type=jnp.float32) + bf_ref[...],
        0.0)                                                            # (B, N0) f32

    # ---- layer 1 of ALL pose heads as one lane-dense matmul over concatenated W1 ----
    h1_all = jnp.maximum(
        jnp.dot(feat.astype(jnp.bfloat16), w1c_ref[...],
                preferred_element_type=jnp.float32) + b1c_ref[...],
        0.0)                                                            # (B, C*N1) f32

    lbl_col = lbl_col_ref[...]                                          # (B, 1) int32
    y_ref[...] = jnp.zeros_like(y_ref)

    # ---- per-class layers 2/3 + one-hot selection, skipping classes absent from the batch ----
    for c in range(NUM_CLASSES):                                        # unrolled Python loop
        present = lbl_smem[0] == c
        for b in range(1, B):
            present = jnp.logical_or(present, lbl_smem[b] == c)

        @pl.when(present)
        def _(c=c):
            h1 = h1_all[:, c * N1:(c + 1) * N1].astype(jnp.bfloat16)    # (B, N1)
            h2 = jnp.maximum(
                jnp.dot(h1, w2_ref[c], preferred_element_type=jnp.float32) + b2_ref[c],
                0.0)                                                    # (B, N2) f32
            out_c = (jnp.dot(h2.astype(jnp.bfloat16), w3_ref[c],
                             preferred_element_type=jnp.float32) + b3_ref[c])  # (B, DICT)
            mask = (lbl_col == c).astype(jnp.float32)                   # (B, 1) one-hot column
            y_ref[...] += mask * out_c


_VMEM_SPEC = pl.BlockSpec(memory_space=pltpu.MemorySpace.VMEM)
_SMEM_SPEC = pl.BlockSpec(memory_space=pltpu.MemorySpace.SMEM)


def classification_model_forward(x, label, kparams):
    """x: (B, C, H, W) NCHW float32; label: (B, 1) int32; kparams: prepared (bf16) params."""
    x_flat = x.reshape(B, D_IN).astype(jnp.float32)        # torch .view order
    lbl = label[:, 0].astype(jnp.int32)                    # (B,)  -> SMEM
    lbl_col = lbl[:, None]                                 # (B,1) -> VMEM (vector mask source)
    return pl.pallas_call(
        _fused_kernel,
        out_shape=jax.ShapeDtypeStruct((B, DICT_SIZE), jnp.float32),
        in_specs=[_SMEM_SPEC, _VMEM_SPEC, _VMEM_SPEC, _VMEM_SPEC, _VMEM_SPEC,
                  _VMEM_SPEC, _VMEM_SPEC, _VMEM_SPEC, _VMEM_SPEC, _VMEM_SPEC, _VMEM_SPEC],
        out_specs=_VMEM_SPEC,
    )(lbl, lbl_col, x_flat,
      kparams["wf"], kparams["bf"],
      kparams["w1c"], kparams["b1c"],
      kparams["w2"], kparams["b2"],
      kparams["w3"], kparams["b3"])


# ---------------- parameter preparation (one-time, outside the hot path) ----------------
def prepare_params(params):
    return {
        "wf": params["wf"].astype(jnp.bfloat16),                                   # (D_IN, N0)
        "bf": params["bf"],                                                        # (1, N0)  f32
        "w1c": jnp.transpose(params["w1"], (1, 0, 2))
                  .reshape(N0, NUM_CLASSES * N1).astype(jnp.bfloat16),             # (N0, C*N1)
        "b1c": params["b1"].reshape(1, NUM_CLASSES * N1),                          # (1, C*N1) f32
        "w2": params["w2"].astype(jnp.bfloat16),                                   # (C, N1, N2)
        "b2": params["b2"][:, None, :],                                            # (C, 1, N2) f32
        "w3": params["w3"].astype(jnp.bfloat16),                                   # (C, N2, DICT)
        "b3": params["b3"][:, None, :],                                            # (C, 1, DICT) f32
    }


# ---------------- pure-JAX reference (full f32, all classes + one-hot bmm) ----------------
def _reference_forward(x, label, params):
    x_flat = x.reshape(B, D_IN).astype(jnp.float32)
    feat = jnp.maximum(x_flat @ params["wf"] + params["bf"], 0.0)
    h1 = jnp.maximum(jnp.einsum("bn,cnm->cbm", feat, params["w1"]) + params["b1"][:, None, :], 0.0)
    h2 = jnp.maximum(jnp.einsum("cbn,cnm->cbm", h1, params["w2"]) + params["b2"][:, None, :], 0.0)
    stacked = jnp.einsum("cbn,cnm->cbm", h2, params["w3"]) + params["b3"][:, None, :]
    onehot = jax.nn.one_hot(label[:, 0], NUM_CLASSES, dtype=jnp.float32)
    return jnp.einsum("cbd,bc->bd", stacked, onehot)


def init_params(key):
    ks = jax.random.split(key, 8)
    s = 0.02
    return {
        "wf": s * jax.random.normal(ks[0], (D_IN, N0), jnp.float32),
        "bf": jnp.zeros((1, N0), jnp.float32),
        "w1": s * jax.random.normal(ks[1], (NUM_CLASSES, N0, N1), jnp.float32),
        "b1": s * jax.random.normal(ks[2], (NUM_CLASSES, N1), jnp.float32),
        "w2": s * jax.random.normal(ks[3], (NUM_CLASSES, N1, N2), jnp.float32),
        "b2": s * jax.random.normal(ks[4], (NUM_CLASSES, N2), jnp.float32),
        "w3": s * jax.random.normal(ks[5], (NUM_CLASSES, N2, DICT_SIZE), jnp.float32),
        "b3": s * jax.random.normal(ks[6], (NUM_CLASSES, DICT_SIZE), jnp.float32),
    }


if __name__ == "__main__":
    key = jax.random.PRNGKey(0)
    k_x, k_lbl, k_p = jax.random.split(key, 3)

    x = jax.random.normal(k_x, (B, C, H, W), jnp.float32)            # NCHW, like PyTorch
    label = jax.random.randint(k_lbl, (B, 1), 0, NUM_CLASSES, jnp.int32)
    params = init_params(k_p)
    kparams = prepare_params(params)                                  # one-time layout/bf16 prep

    fwd = jax.jit(classification_model_forward)
    y = fwd(x, label, kparams)
    y = jax.block_until_ready(y)
    assert y.shape == (B, DICT_SIZE) and y.dtype == jnp.float32

    y_ref = _reference_forward(x, label, params)
    assert jnp.allclose(y, y_ref, rtol=1e-2, atol=1e-2), "mismatch vs JAX reference"

    print("KERNEL_OK")
</pallas_src>

<mosaic_0001>
module attributes {stable_mosaic.version = 11 : i64} {
  func.func @_fused_kernel(%arg0: memref<8xi32, #tpu.memory_space<smem>>, %arg1: memref<8x1xi32, #tpu.memory_space<vmem>>, %arg2: memref<8x1024xf32, #tpu.memory_space<vmem>>, %arg3: memref<1024x128xbf16, #tpu.memory_space<vmem>>, %arg4: memref<1x128xf32, #tpu.memory_space<vmem>>, %arg5: memref<128x1024xbf16, #tpu.memory_space<vmem>>, %arg6: memref<1x1024xf32, #tpu.memory_space<vmem>>, %arg7: memref<8x128x128xbf16, #tpu.memory_space<vmem>>, %arg8: memref<8x1x128xf32, #tpu.memory_space<vmem>>, %arg9: memref<8x128x128xbf16, #tpu.memory_space<vmem>>, %arg10: memref<8x1x128xf32, #tpu.memory_space<vmem>>, %arg11: memref<8x128xf32, #tpu.memory_space<vmem>>) attributes {dimension_semantics = [], scalar_prefetch = 0 : i64, scratch_operands = 0 : i64, tpu.core_type = #tpu.core_type<tc>} {
    %c0 = arith.constant 0 : index
    %c0_0 = arith.constant 0 : index
    %0 = vector.load %arg2[%c0, %c0_0] : memref<8x1024xf32, #tpu.memory_space<vmem>>, vector<8x1024xf32>
    %1 = arith.truncf %0 : vector<8x1024xf32> to vector<8x1024xbf16>
    %c0_1 = arith.constant 0 : index
    %c0_2 = arith.constant 0 : index
    %2 = vector.load %arg3[%c0_1, %c0_2] : memref<1024x128xbf16, #tpu.memory_space<vmem>>, vector<1024x128xbf16>
    %cst = arith.constant dense<0.000000e+00> : vector<8x128xf32>
    %3 = tpu.matmul %1, %2, %cst {dimension_numbers = #tpu.dot_dimension_numbers<[1], [0], [0], [1], [0, 0, 1, 1], [], []>} : vector<8x1024xbf16>, vector<1024x128xbf16>, vector<8x128xf32> -> vector<8x128xf32>
    %c0_3 = arith.constant 0 : index
    %c0_4 = arith.constant 0 : index
    %4 = vector.load %arg4[%c0_3, %c0_4] : memref<1x128xf32, #tpu.memory_space<vmem>>, vector<1x128xf32>
    %5 = vector.broadcast %4 : vector<1x128xf32> to vector<8x128xf32>
    %6 = arith.addf %3, %5 : vector<8x128xf32>
    %cst_5 = arith.constant 0.000000e+00 : f32
    %7 = vector.broadcast %cst_5 : f32 to vector<8x128xf32>
    %8 = arith.maximumf %6, %7 : vector<8x128xf32>
    %9 = arith.truncf %8 : vector<8x128xf32> to vector<8x128xbf16>
    %c0_6 = arith.constant 0 : index
    %c0_7 = arith.constant 0 : index
    %10 = vector.load %arg5[%c0_6, %c0_7] : memref<128x1024xbf16, #tpu.memory_space<vmem>>, vector<128x1024xbf16>
    %cst_8 = arith.constant dense<0.000000e+00> : vector<8x1024xf32>
    %11 = tpu.matmul %9, %10, %cst_8 {dimension_numbers = #tpu.dot_dimension_numbers<[1], [0], [0], [1], [0, 0, 1, 1], [], []>} : vector<8x128xbf16>, vector<128x1024xbf16>, vector<8x1024xf32> -> vector<8x1024xf32>
    %c0_9 = arith.constant 0 : index
    %c0_10 = arith.constant 0 : index
    %12 = vector.load %arg6[%c0_9, %c0_10] : memref<1x1024xf32, #tpu.memory_space<vmem>>, vector<1x1024xf32>
    %13 = vector.broadcast %12 : vector<1x1024xf32> to vector<8x1024xf32>
    %14 = arith.addf %11, %13 : vector<8x1024xf32>
    %cst_11 = arith.constant 0.000000e+00 : f32
    %15 = vector.broadcast %cst_11 : f32 to vector<8x1024xf32>
    %16 = arith.maximumf %14, %15 : vector<8x1024xf32>
    %c0_12 = arith.constant 0 : index
    %c0_13 = arith.constant 0 : index
    %17 = vector.load %arg1[%c0_12, %c0_13] : memref<8x1xi32, #tpu.memory_space<vmem>>, vector<8x1xi32>
    %cst_14 = arith.constant 0.000000e+00 : f32
    %18 = vector.broadcast %cst_14 : f32 to vector<8x128xf32>
    %c0_15 = arith.constant 0 : index
    %c0_16 = arith.constant 0 : index
    %19 = vector.load %arg11[%c0_15, %c0_16] : memref<8x128xf32, #tpu.memory_space<vmem>>, vector<8x128xf32>
    tpu.vector_store %arg11[%c0_15, %c0_16], %18 {strides = array<i32>} : memref<8x128xf32, #tpu.memory_space<vmem>>, vector<8x128xf32>,
    %c0_17 = arith.constant 0 : index
    %20 = memref.load %arg0[%c0_17] : memref<8xi32, #tpu.memory_space<smem>>
    %c0_i32 = arith.constant 0 : i32
    %21 = arith.cmpi eq, %20, %c0_i32 : i32
    %c1 = arith.constant 1 : index
    %22 = memref.load %arg0[%c1] : memref<8xi32, #tpu.memory_space<smem>>
    %c0_i32_18 = arith.constant 0 : i32
    %23 = arith.cmpi eq, %22, %c0_i32_18 : i32
    %24 = arith.ori %21, %23 : i1
    %c2 = arith.constant 2 : index
    %25 = memref.load %arg0[%c2] : memref<8xi32, #tpu.memory_space<smem>>
    %c0_i32_19 = arith.constant 0 : i32
    %26 = arith.cmpi eq, %25, %c0_i32_19 : i32
    %27 = arith.ori %24, %26 : i1
    %c3 = arith.constant 3 : index
    %28 = memref.load %arg0[%c3] : memref<8xi32, #tpu.memory_space<smem>>
    %c0_i32_20 = arith.constant 0 : i32
    %29 = arith.cmpi eq, %28, %c0_i32_20 : i32
    %30 = arith.ori %27, %29 : i1
    %c4 = arith.constant 4 : index
    %31 = memref.load %arg0[%c4] : memref<8xi32, #tpu.memory_space<smem>>
    %c0_i32_21 = arith.constant 0 : i32
    %32 = arith.cmpi eq, %31, %c0_i32_21 : i32
    %33 = arith.ori %30, %32 : i1
    %c5 = arith.constant 5 : index
    %34 = memref.load %arg0[%c5] : memref<8xi32, #tpu.memory_space<smem>>
    %c0_i32_22 = arith.constant 0 : i32
    %35 = arith.cmpi eq, %34, %c0_i32_22 : i32
    %36 = arith.ori %33, %35 : i1
    %c6 = arith.constant 6 : index
    %37 = memref.load %arg0[%c6] : memref<8xi32, #tpu.memory_space<smem>>
    %c0_i32_23 = arith.constant 0 : i32
    %38 = arith.cmpi eq, %37, %c0_i32_23 : i32
    %39 = arith.ori %36, %38 : i1
    %c7 = arith.constant 7 : index
    %40 = memref.load %arg0[%c7] : memref<8xi32, #tpu.memory_space<smem>>
    %c0_i32_24 = arith.constant 0 : i32
    %41 = arith.cmpi eq, %40, %c0_i32_24 : i32
    %42 = arith.ori %39, %41 : i1
    %43 = arith.extui %42 : i1 to i32
    %c0_i32_25 = arith.constant 0 : i32
    %44 = arith.cmpi ne, %43, %c0_i32_25 : i32
    scf.if %44 {
      %220 = vector.extract_strided_slice %16 {offsets = [0, 0], sizes = [8, 128], strides = [1, 1]} : vector<8x1024xf32> to vector<8x128xf32>
      %221 = arith.truncf %220 : vector<8x128xf32> to vector<8x128xbf16>
      %c0_138 = arith.constant 0 : index
      %c0_139 = arith.constant 0 : index
      %c0_140 = arith.constant 0 : index
      %222 = vector.load %arg7[%c0_138, %c0_139, %c0_140] : memref<8x128x128xbf16, #tpu.memory_space<vmem>>, vector<1x128x128xbf16>
      %223 = vector.shape_cast %222 : vector<1x128x128xbf16> to vector<128x128xbf16>
      %cst_141 = arith.constant dense<0.000000e+00> : vector<8x128xf32>
      %224 = tpu.matmul %221, %223, %cst_141 {dimension_numbers = #tpu.dot_dimension_numbers<[1], [0], [0], [1], [0, 0, 1, 1], [], []>} : vector<8x128xbf16>, vector<128x128xbf16>, vector<8x128xf32> -> vector<8x128xf32>
      %c0_142 = arith.constant 0 : index
      %c0_143 = arith.constant 0 : index
      %c0_144 = arith.constant 0 : index
      %225 = vector.load %arg8[%c0_142, %c0_143, %c0_144] : memref<8x1x128xf32, #tpu.memory_space<vmem>>, vector<1x1x128xf32>
      %226 = vector.shape_cast %225 : vector<1x1x128xf32> to vector<1x128xf32>
      %227 = vector.broadcast %226 : vector<1x128xf32> to vector<8x128xf32>
      %228 = arith.addf %224, %227 : vector<8x128xf32>
      %cst_145 = arith.constant 0.000000e+00 : f32
      %229 = vector.broadcast %cst_145 : f32 to vector<8x128xf32>
      %230 = arith.maximumf %228, %229 : vector<8x128xf32>
      %231 = arith.truncf %230 : vector<8x128xf32> to vector<8x128xbf16>
      %c0_146 = arith.constant 0 : index
      %c0_147 = arith.constant 0 : index
      %c0_148 = arith.constant 0 : index
      %232 = vector.load %arg9[%c0_146, %c0_147, %c0_148] : memref<8x128x128xbf16, #tpu.memory_space<vmem>>, vector<1x128x128xbf16>
      %233 = vector.shape_cast %232 : vector<1x128x128xbf16> to vector<128x128xbf16>
      %cst_149 = arith.constant dense<0.000000e+00> : vector<8x128xf32>
      %234 = tpu.matmul %231, %233, %cst_149 {dimension_numbers = #tpu.dot_dimension_numbers<[1], [0], [0], [1], [0, 0, 1, 1], [], []>} : vector<8x128xbf16>, vector<128x128xbf16>, vector<8x128xf32> -> vector<8x128xf32>
      %c0_150 = arith.constant 0 : index
      %c0_151 = arith.constant 0 : index
      %c0_152 = arith.constant 0 : index
      %235 = vector.load %arg10[%c0_150, %c0_151, %c0_152] : memref<8x1x128xf32, #tpu.memory_space<vmem>>, vector<1x1x128xf32>
      %236 = vector.shape_cast %235 : vector<1x1x128xf32> to vector<1x128xf32>
      %237 = vector.broadcast %236 : vector<1x128xf32> to vector<8x128xf32>
      %238 = arith.addf %234, %237 : vector<8x128xf32>
      %c0_i32_153 = arith.constant 0 : i32
      %239 = vector.broadcast %c0_i32_153 : i32 to vector<8x1xi32>
      %240 = arith.cmpi eq, %17, %239 : vector<8x1xi32>
      %241 = arith.extui %240 : vector<8x1xi1> to vector<8x1xi32>
      %242 = arith.sitofp %241 : vector<8x1xi32> to vector<8x1xf32>
      %c0_154 = arith.constant 0 : index
      %c0_155 = arith.constant 0 : index
      %243 = vector.load %arg11[%c0_154, %c0_155] : memref<8x128xf32, #tpu.memory_space<vmem>>, vector<8x128xf32>
      %244 = vector.broadcast %242 : vector<8x1xf32> to vector<8x128xf32>
      %245 = arith.mulf %244, %238 : vector<8x128xf32>
      %246 = arith.addf %243, %245 : vector<8x128xf32>
      %c0_156 = arith.constant 0 : index
      %c0_157 = arith.constant 0 : index
      %247 = vector.load %arg11[%c0_156, %c0_157] : memref<8x128xf32, #tpu.memory_space<vmem>>, vector<8x128xf32>
      tpu.vector_store %arg11[%c0_156, %c0_157], %246 {strides = array<i32>} : memref<8x128xf32, #tpu.memory_space<vmem>>, vector<8x128xf32>,
    } else {
    }
    %c0_26 = arith.constant 0 : index
    %45 = memref.load %arg0[%c0_26] : memref<8xi32, #tpu.memory_space<smem>>
    %c1_i32 = arith.constant 1 : i32
    %46 = arith.cmpi eq, %45, %c1_i32 : i32
    %c1_27 = arith.constant 1 : index
    %47 = memref.load %arg0[%c1_27] : memref<8xi32, #tpu.memory_space<smem>>
    %c1_i32_28 = arith.constant 1 : i32
    %48 = arith.cmpi eq, %47, %c1_i32_28 : i32
    %49 = arith.ori %46, %48 : i1
    %c2_29 = arith.constant 2 : index
    %50 = memref.load %arg0[%c2_29] : memref<8xi32, #tpu.memory_space<smem>>
    %c1_i32_30 = arith.constant 1 : i32
    %51 = arith.cmpi eq, %50, %c1_i32_30 : i32
    %52 = arith.ori %49, %51 : i1
    %c3_31 = arith.constant 3 : index
    %53 = memref.load %arg0[%c3_31] : memref<8xi32, #tpu.memory_space<smem>>
    %c1_i32_32 = arith.constant 1 : i32
    %54 = arith.cmpi eq, %53, %c1_i32_32 : i32
    %55 = arith.ori %52, %54 : i1
    %c4_33 = arith.constant 4 : index
    %56 = memref.load %arg0[%c4_33] : memref<8xi32, #tpu.memory_space<smem>>
    %c1_i32_34 = arith.constant 1 : i32
    %57 = arith.cmpi eq, %56, %c1_i32_34 : i32
    %58 = arith.ori %55, %57 : i1
    %c5_35 = arith.constant 5 : index
    %59 = memref.load %arg0[%c5_35] : memref<8xi32, #tpu.memory_space<smem>>
    %c1_i32_36 = arith.constant 1 : i32
    %60 = arith.cmpi eq, %59, %c1_i32_36 : i32
    %61 = arith.ori %58, %60 : i1
    %c6_37 = arith.constant 6 : index
    %62 = memref.load %arg0[%c6_37] : memref<8xi32, #tpu.memory_space<smem>>
    %c1_i32_38 = arith.constant 1 : i32
    %63 = arith.cmpi eq, %62, %c1_i32_38 : i32
    %64 = arith.ori %61, %63 : i1
    %c7_39 = arith.constant 7 : index
    %65 = memref.load %arg0[%c7_39] : memref<8xi32, #tpu.memory_space<smem>>
    %c1_i32_40 = arith.constant 1 : i32
    %66 = arith.cmpi eq, %65, %c1_i32_40 : i32
    %67 = arith.ori %64, %66 : i1
    %68 = arith.extui %67 : i1 to i32
    %c0_i32_41 = arith.constant 0 : i32
    %69 = arith.cmpi ne, %68, %c0_i32_41 : i32
    scf.if %69 {
      %220 = vector.extract_strided_slice %16 {offsets = [0, 128], sizes = [8, 128], strides = [1, 1]} : vector<8x1024xf32> to vector<8x128xf32>
      %221 = arith.truncf %220 : vector<8x128xf32> to vector<8x128xbf16>
      %c1_138 = arith.constant 1 : index
      %c0_139 = arith.constant 0 : index
      %c0_140 = arith.constant 0 : index
      %222 = vector.load %arg7[%c1_138, %c0_139, %c0_140] : memref<8x128x128xbf16, #tpu.memory_space<vmem>>, vector<1x128x128xbf16>
      %223 = vector.shape_cast %222 : vector<1x128x128xbf16> to vector<128x128xbf16>
      %cst_141 = arith.constant dense<0.000000e+00> : vector<8x128xf32>
      %224 = tpu.matmul %221, %223, %cst_141 {dimension_numbers = #tpu.dot_dimension_numbers<[1], [0], [0], [1], [0, 0, 1, 1], [], []>} : vector<8x128xbf16>, vector<128x128xbf16>, vector<8x128xf32> -> vector<8x128xf32>
      %c1_142 = arith.constant 1 : index
      %c0_143 = arith.constant 0 : index
      %c0_144 = arith.constant 0 : index
      %225 = vector.load %arg8[%c1_142, %c0_143, %c0_144] : memref<8x1x128xf32, #tpu.memory_space<vmem>>, vector<1x1x128xf32>
      %226 = vector.shape_cast %225 : vector<1x1x128xf32> to vector<1x128xf32>
      %227 = vector.broadcast %226 : vector<1x128xf32> to vector<8x128xf32>
      %228 = arith.addf %224, %227 : vector<8x128xf32>
      %cst_145 = arith.constant 0.000000e+00 : f32
      %229 = vector.broadcast %cst_145 : f32 to vector<8x128xf32>
      %230 = arith.maximumf %228, %229 : vector<8x128xf32>
      %231 = arith.truncf %230 : vector<8x128xf32> to vector<8x128xbf16>
      %c1_146 = arith.constant 1 : index
      %c0_147 = arith.constant 0 : index
      %c0_148 = arith.constant 0 : index
      %232 = vector.load %arg9[%c1_146, %c0_147, %c0_148] : memref<8x128x128xbf16, #tpu.memory_space<vmem>>, vector<1x128x128xbf16>
      %233 = vector.shape_cast %232 : vector<1x128x128xbf16> to vector<128x128xbf16>
      %cst_149 = arith.constant dense<0.000000e+00> : vector<8x128xf32>
      %234 = tpu.matmul %231, %233, %cst_149 {dimension_numbers = #tpu.dot_dimension_numbers<[1], [0], [0], [1], [0, 0, 1, 1], [], []>} : vector<8x128xbf16>, vector<128x128xbf16>, vector<8x128xf32> -> vector<8x128xf32>
      %c1_150 = arith.constant 1 : index
      %c0_151 = arith.constant 0 : index
      %c0_152 = arith.constant 0 : index
      %235 = vector.load %arg10[%c1_150, %c0_151, %c0_152] : memref<8x1x128xf32, #tpu.memory_space<vmem>>, vector<1x1x128xf32>
      %236 = vector.shape_cast %235 : vector<1x1x128xf32> to vector<1x128xf32>
      %237 = vector.broadcast %236 : vector<1x128xf32> to vector<8x128xf32>
      %238 = arith.addf %234, %237 : vector<8x128xf32>
      %c1_i32_153 = arith.constant 1 : i32
      %239 = vector.broadcast %c1_i32_153 : i32 to vector<8x1xi32>
      %240 = arith.cmpi eq, %17, %239 : vector<8x1xi32>
      %241 = arith.extui %240 : vector<8x1xi1> to vector<8x1xi32>
      %242 = arith.sitofp %241 : vector<8x1xi32> to vector<8x1xf32>
      %c0_154 = arith.constant 0 : index
      %c0_155 = arith.constant 0 : index
      %243 = vector.load %arg11[%c0_154, %c0_155] : memref<8x128xf32, #tpu.memory_space<vmem>>, vector<8x128xf32>
      %244 = vector.broadcast %242 : vector<8x1xf32> to vector<8x128xf32>
      %245 = arith.mulf %244, %238 : vector<8x128xf32>
      %246 = arith.addf %243, %245 : vector<8x128xf32>
      %c0_156 = arith.constant 0 : index
      %c0_157 = arith.constant 0 : index
      %247 = vector.load %arg11[%c0_156, %c0_157] : memref<8x128xf32, #tpu.memory_space<vmem>>, vector<8x128xf32>
      tpu.vector_store %arg11[%c0_156, %c0_157], %246 {strides = array<i32>} : memref<8x128xf32, #tpu.memory_space<vmem>>, vector<8x128xf32>,
    } else {
    }
    %c0_42 = arith.constant 0 : index
    %70 = memref.load %arg0[%c0_42] : memref<8xi32, #tpu.memory_space<smem>>
    %c2_i32 = arith.constant 2 : i32
    %71 = arith.cmpi eq, %70, %c2_i32 : i32
    %c1_43 = arith.constant 1 : index
    %72 = memref.load %arg0[%c1_43] : memref<8xi32, #tpu.memory_space<smem>>
    %c2_i32_44 = arith.constant 2 : i32
    %73 = arith.cmpi eq, %72, %c2_i32_44 : i32
    %74 = arith.ori %71, %73 : i1
    %c2_45 = arith.constant 2 : index
    %75 = memref.load %arg0[%c2_45] : memref<8xi32, #tpu.memory_space<smem>>
    %c2_i32_46 = arith.constant 2 : i32
    %76 = arith.cmpi eq, %75, %c2_i32_46 : i32
    %77 = arith.ori %74, %76 : i1
    %c3_47 = arith.constant 3 : index
    %78 = memref.load %arg0[%c3_47] : memref<8xi32, #tpu.memory_space<smem>>
    %c2_i32_48 = arith.constant 2 : i32
    %79 = arith.cmpi eq, %78, %c2_i32_48 : i32
    %80 = arith.ori %77, %79 : i1
    %c4_49 = arith.constant 4 : index
    %81 = memref.load %arg0[%c4_49] : memref<8xi32, #tpu.memory_space<smem>>
    %c2_i32_50 = arith.constant 2 : i32
    %82 = arith.cmpi eq, %81, %c2_i32_50 : i32
    %83 = arith.ori %80, %82 : i1
    %c5_51 = arith.constant 5 : index
    %84 = memref.load %arg0[%c5_51] : memref<8xi32, #tpu.memory_space<smem>>
    %c2_i32_52 = arith.constant 2 : i32
    %85 = arith.cmpi eq, %84, %c2_i32_52 : i32
    %86 = arith.ori %83, %85 : i1
    %c6_53 = arith.constant 6 : index
    %87 = memref.load %arg0[%c6_53] : memref<8xi32, #tpu.memory_space<smem>>
    %c2_i32_54 = arith.constant 2 : i32
    %88 = arith.cmpi eq, %87, %c2_i32_54 : i32
    %89 = arith.ori %86, %88 : i1
    %c7_55 = arith.constant 7 : index
    %90 = memref.load %arg0[%c7_55] : memref<8xi32, #tpu.memory_space<smem>>
    %c2_i32_56 = arith.constant 2 : i32
    %91 = arith.cmpi eq, %90, %c2_i32_56 : i32
    %92 = arith.ori %89, %91 : i1
    %93 = arith.extui %92 : i1 to i32
    %c0_i32_57 = arith.constant 0 : i32
    %94 = arith.cmpi ne, %93, %c0_i32_57 : i32
    scf.if %94 {
      %220 = vector.extract_strided_slice %16 {offsets = [0, 256], sizes = [8, 128], strides = [1, 1]} : vector<8x1024xf32> to vector<8x128xf32>
      %221 = arith.truncf %220 : vector<8x128xf32> to vector<8x128xbf16>
      %c2_138 = arith.constant 2 : index
      %c0_139 = arith.constant 0 : index
      %c0_140 = arith.constant 0 : index
      %222 = vector.load %arg7[%c2_138, %c0_139, %c0_140] : memref<8x128x128xbf16, #tpu.memory_space<vmem>>, vector<1x128x128xbf16>
      %223 = vector.shape_cast %222 : vector<1x128x128xbf16> to vector<128x128xbf16>
      %cst_141 = arith.constant dense<0.000000e+00> : vector<8x128xf32>
      %224 = tpu.matmul %221, %223, %cst_141 {dimension_numbers = #tpu.dot_dimension_numbers<[1], [0], [0], [1], [0, 0, 1, 1], [], []>} : vector<8x128xbf16>, vector<128x128xbf16>, vector<8x128xf32> -> vector<8x128xf32>
      %c2_142 = arith.constant 2 : index
      %c0_143 = arith.constant 0 : index
      %c0_144 = arith.constant 0 : index
      %225 = vector.load %arg8[%c2_142, %c0_143, %c0_144] : memref<8x1x128xf32, #tpu.memory_space<vmem>>, vector<1x1x128xf32>
      %226 = vector.shape_cast %225 : vector<1x1x128xf32> to vector<1x128xf32>
      %227 = vector.broadcast %226 : vector<1x128xf32> to vector<8x128xf32>
      %228 = arith.addf %224, %227 : vector<8x128xf32>
      %cst_145 = arith.constant 0.000000e+00 : f32
      %229 = vector.broadcast %cst_145 : f32 to vector<8x128xf32>
      %230 = arith.maximumf %228, %229 : vector<8x128xf32>
      %231 = arith.truncf %230 : vector<8x128xf32> to vector<8x128xbf16>
      %c2_146 = arith.constant 2 : index
      %c0_147 = arith.constant 0 : index
      %c0_148 = arith.constant 0 : index
      %232 = vector.load %arg9[%c2_146, %c0_147, %c0_148] : memref<8x128x128xbf16, #tpu.memory_space<vmem>>, vector<1x128x128xbf16>
      %233 = vector.shape_cast %232 : vector<1x128x128xbf16> to vector<128x128xbf16>
      %cst_149 = arith.constant dense<0.000000e+00> : vector<8x128xf32>
      %234 = tpu.matmul %231, %233, %cst_149 {dimension_numbers = #tpu.dot_dimension_numbers<[1], [0], [0], [1], [0, 0, 1, 1], [], []>} : vector<8x128xbf16>, vector<128x128xbf16>, vector<8x128xf32> -> vector<8x128xf32>
      %c2_150 = arith.constant 2 : index
      %c0_151 = arith.constant 0 : index
      %c0_152 = arith.constant 0 : index
      %235 = vector.load %arg10[%c2_150, %c0_151, %c0_152] : memref<8x1x128xf32, #tpu.memory_space<vmem>>, vector<1x1x128xf32>
      %236 = vector.shape_cast %235 : vector<1x1x128xf32> to vector<1x128xf32>
      %237 = vector.broadcast %236 : vector<1x128xf32> to vector<8x128xf32>
      %238 = arith.addf %234, %237 : vector<8x128xf32>
      %c2_i32_153 = arith.constant 2 : i32
      %239 = vector.broadcast %c2_i32_153 : i32 to vector<8x1xi32>
      %240 = arith.cmpi eq, %17, %239 : vector<8x1xi32>
      %241 = arith.extui %240 : vector<8x1xi1> to vector<8x1xi32>
      %242 = arith.sitofp %241 : vector<8x1xi32> to vector<8x1xf32>
      %c0_154 = arith.constant 0 : index
      %c0_155 = arith.constant 0 : index
      %243 = vector.load %arg11[%c0_154, %c0_155] : memref<8x128xf32, #tpu.memory_space<vmem>>, vector<8x128xf32>
      %244 = vector.broadcast %242 : vector<8x1xf32> to vector<8x128xf32>
      %245 = arith.mulf %244, %238 : vector<8x128xf32>
      %246 = arith.addf %243, %245 : vector<8x128xf32>
      %c0_156 = arith.constant 0 : index
      %c0_157 = arith.constant 0 : index
      %247 = vector.load %arg11[%c0_156, %c0_157] : memref<8x128xf32, #tpu.memory_space<vmem>>, vector<8x128xf32>
      tpu.vector_store %arg11[%c0_156, %c0_157], %246 {strides = array<i32>} : memref<8x128xf32, #tpu.memory_space<vmem>>, vector<8x128xf32>,
    } else {
    }
    %c0_58 = arith.constant 0 : index
    %95 = memref.load %arg0[%c0_58] : memref<8xi32, #tpu.memory_space<smem>>
    %c3_i32 = arith.constant 3 : i32
    %96 = arith.cmpi eq, %95, %c3_i32 : i32
    %c1_59 = arith.constant 1 : index
    %97 = memref.load %arg0[%c1_59] : memref<8xi32, #tpu.memory_space<smem>>
    %c3_i32_60 = arith.constant 3 : i32
    %98 = arith.cmpi eq, %97, %c3_i32_60 : i32
    %99 = arith.ori %96, %98 : i1
    %c2_61 = arith.constant 2 : index
    %100 = memref.load %arg0[%c2_61] : memref<8xi32, #tpu.memory_space<smem>>
    %c3_i32_62 = arith.constant 3 : i32
    %101 = arith.cmpi eq, %100, %c3_i32_62 : i32
    %102 = arith.ori %99, %101 : i1
    %c3_63 = arith.constant 3 : index
    %103 = memref.load %arg0[%c3_63] : memref<8xi32, #tpu.memory_space<smem>>
    %c3_i32_64 = arith.constant 3 : i32
    %104 = arith.cmpi eq, %103, %c3_i32_64 : i32
    %105 = arith.ori %102, %104 : i1
    %c4_65 = arith.constant 4 : index
    %106 = memref.load %arg0[%c4_65] : memref<8xi32, #tpu.memory_space<smem>>
    %c3_i32_66 = arith.constant 3 : i32
    %107 = arith.cmpi eq, %106, %c3_i32_66 : i32
    %108 = arith.ori %105, %107 : i1
    %c5_67 = arith.constant 5 : index
    %109 = memref.load %arg0[%c5_67] : memref<8xi32, #tpu.memory_space<smem>>
    %c3_i32_68 = arith.constant 3 : i32
    %110 = arith.cmpi eq, %109, %c3_i32_68 : i32
    %111 = arith.ori %108, %110 : i1
    %c6_69 = arith.constant 6 : index
    %112 = memref.load %arg0[%c6_69] : memref<8xi32, #tpu.memory_space<smem>>
    %c3_i32_70 = arith.constant 3 : i32
    %113 = arith.cmpi eq, %112, %c3_i32_70 : i32
    %114 = arith.ori %111, %113 : i1
    %c7_71 = arith.constant 7 : index
    %115 = memref.load %arg0[%c7_71] : memref<8xi32, #tpu.memory_space<smem>>
    %c3_i32_72 = arith.constant 3 : i32
    %116 = arith.cmpi eq, %115, %c3_i32_72 : i32
    %117 = arith.ori %114, %116 : i1
    %118 = arith.extui %117 : i1 to i32
    %c0_i32_73 = arith.constant 0 : i32
    %119 = arith.cmpi ne, %118, %c0_i32_73 : i32
    scf.if %119 {
      %220 = vector.extract_strided_slice %16 {offsets = [0, 384], sizes = [8, 128], strides = [1, 1]} : vector<8x1024xf32> to vector<8x128xf32>
      %221 = arith.truncf %220 : vector<8x128xf32> to vector<8x128xbf16>
      %c3_138 = arith.constant 3 : index
      %c0_139 = arith.constant 0 : index
      %c0_140 = arith.constant 0 : index
      %222 = vector.load %arg7[%c3_138, %c0_139, %c0_140] : memref<8x128x128xbf16, #tpu.memory_space<vmem>>, vector<1x128x128xbf16>
      %223 = vector.shape_cast %222 : vector<1x128x128xbf16> to vector<128x128xbf16>
      %cst_141 = arith.constant dense<0.000000e+00> : vector<8x128xf32>
      %224 = tpu.matmul %221, %223, %cst_141 {dimension_numbers = #tpu.dot_dimension_numbers<[1], [0], [0], [1], [0, 0, 1, 1], [], []>} : vector<8x128xbf16>, vector<128x128xbf16>, vector<8x128xf32> -> vector<8x128xf32>
      %c3_142 = arith.constant 3 : index
      %c0_143 = arith.constant 0 : index
      %c0_144 = arith.constant 0 : index
      %225 = vector.load %arg8[%c3_142, %c0_143, %c0_144] : memref<8x1x128xf32, #tpu.memory_space<vmem>>, vector<1x1x128xf32>
      %226 = vector.shape_cast %225 : vector<1x1x128xf32> to vector<1x128xf32>
      %227 = vector.broadcast %226 : vector<1x128xf32> to vector<8x128xf32>
      %228 = arith.addf %224, %227 : vector<8x128xf32>
      %cst_145 = arith.constant 0.000000e+00 : f32
      %229 = vector.broadcast %cst_145 : f32 to vector<8x128xf32>
      %230 = arith.maximumf %228, %229 : vector<8x128xf32>
      %231 = arith.truncf %230 : vector<8x128xf32> to vector<8x128xbf16>
      %c3_146 = arith.constant 3 : index
      %c0_147 = arith.constant 0 : index
      %c0_148 = arith.constant 0 : index
      %232 = vector.load %arg9[%c3_146, %c0_147, %c0_148] : memref<8x128x128xbf16, #tpu.memory_space<vmem>>, vector<1x128x128xbf16>
      %233 = vector.shape_cast %232 : vector<1x128x128xbf16> to vector<128x128xbf16>
      %cst_149 = arith.constant dense<0.000000e+00> : vector<8x128xf32>
      %234 = tpu.matmul %231, %233, %cst_149 {dimension_numbers = #tpu.dot_dimension_numbers<[1], [0], [0], [1], [0, 0, 1, 1], [], []>} : vector<8x128xbf16>, vector<128x128xbf16>, vector<8x128xf32> -> vector<8x128xf32>
      %c3_150 = arith.constant 3 : index
      %c0_151 = arith.constant 0 : index
      %c0_152 = arith.constant 0 : index
      %235 = vector.load %arg10[%c3_150, %c0_151, %c0_152] : memref<8x1x128xf32, #tpu.memory_space<vmem>>, vector<1x1x128xf32>
      %236 = vector.shape_cast %235 : vector<1x1x128xf32> to vector<1x128xf32>
      %237 = vector.broadcast %236 : vector<1x128xf32> to vector<8x128xf32>
      %238 = arith.addf %234, %237 : vector<8x128xf32>
      %c3_i32_153 = arith.constant 3 : i32
      %239 = vector.broadcast %c3_i32_153 : i32 to vector<8x1xi32>
      %240 = arith.cmpi eq, %17, %239 : vector<8x1xi32>
      %241 = arith.extui %240 : vector<8x1xi1> to vector<8x1xi32>
      %242 = arith.sitofp %241 : vector<8x1xi32> to vector<8x1xf32>
      %c0_154 = arith.constant 0 : index
      %c0_155 = arith.constant 0 : index
      %243 = vector.load %arg11[%c0_154, %c0_155] : memref<8x128xf32, #tpu.memory_space<vmem>>, vector<8x128xf32>
      %244 = vector.broadcast %242 : vector<8x1xf32> to vector<8x128xf32>
      %245 = arith.mulf %244, %238 : vector<8x128xf32>
      %246 = arith.addf %243, %245 : vector<8x128xf32>
      %c0_156 = arith.constant 0 : index
      %c0_157 = arith.constant 0 : index
      %247 = vector.load %arg11[%c0_156, %c0_157] : memref<8x128xf32, #tpu.memory_space<vmem>>, vector<8x128xf32>
      tpu.vector_store %arg11[%c0_156, %c0_157], %246 {strides = array<i32>} : memref<8x128xf32, #tpu.memory_space<vmem>>, vector<8x128xf32>,
    } else {
    }
    %c0_74 = arith.constant 0 : index
    %120 = memref.load %arg0[%c0_74] : memref<8xi32, #tpu.memory_space<smem>>
    %c4_i32 = arith.constant 4 : i32
    %121 = arith.cmpi eq, %120, %c4_i32 : i32
    %c1_75 = arith.constant 1 : index
    %122 = memref.load %arg0[%c1_75] : memref<8xi32, #tpu.memory_space<smem>>
    %c4_i32_76 = arith.constant 4 : i32
    %123 = arith.cmpi eq, %122, %c4_i32_76 : i32
    %124 = arith.ori %121, %123 : i1
    %c2_77 = arith.constant 2 : index
    %125 = memref.load %arg0[%c2_77] : memref<8xi32, #tpu.memory_space<smem>>
    %c4_i32_78 = arith.constant 4 : i32
    %126 = arith.cmpi eq, %125, %c4_i32_78 : i32
    %127 = arith.ori %124, %126 : i1
    %c3_79 = arith.constant 3 : index
    %128 = memref.load %arg0[%c3_79] : memref<8xi32, #tpu.memory_space<smem>>
    %c4_i32_80 = arith.constant 4 : i32
    %129 = arith.cmpi eq, %128, %c4_i32_80 : i32
    %130 = arith.ori %127, %129 : i1
    %c4_81 = arith.constant 4 : index
    %131 = memref.load %arg0[%c4_81] : memref<8xi32, #tpu.memory_space<smem>>
    %c4_i32_82 = arith.constant 4 : i32
    %132 = arith.cmpi eq, %131, %c4_i32_82 : i32
    %133 = arith.ori %130, %132 : i1
    %c5_83 = arith.constant 5 : index
    %134 = memref.load %arg0[%c5_83] : memref<8xi32, #tpu.memory_space<smem>>
    %c4_i32_84 = arith.constant 4 : i32
    %135 = arith.cmpi eq, %134, %c4_i32_84 : i32
    %136 = arith.ori %133, %135 : i1
    %c6_85 = arith.constant 6 : index
    %137 = memref.load %arg0[%c6_85] : memref<8xi32, #tpu.memory_space<smem>>
    %c4_i32_86 = arith.constant 4 : i32
    %138 = arith.cmpi eq, %137, %c4_i32_86 : i32
    %139 = arith.ori %136, %138 : i1
    %c7_87 = arith.constant 7 : index
    %140 = memref.load %arg0[%c7_87] : memref<8xi32, #tpu.memory_space<smem>>
    %c4_i32_88 = arith.constant 4 : i32
    %141 = arith.cmpi eq, %140, %c4_i32_88 : i32
    %142 = arith.ori %139, %141 : i1
    %143 = arith.extui %142 : i1 to i32
    %c0_i32_89 = arith.constant 0 : i32
    %144 = arith.cmpi ne, %143, %c0_i32_89 : i32
    scf.if %144 {
      %220 = vector.extract_strided_slice %16 {offsets = [0, 512], sizes = [8, 128], strides = [1, 1]} : vector<8x1024xf32> to vector<8x128xf32>
      %221 = arith.truncf %220 : vector<8x128xf32> to vector<8x128xbf16>
      %c4_138 = arith.constant 4 : index
      %c0_139 = arith.constant 0 : index
      %c0_140 = arith.constant 0 : index
      %222 = vector.load %arg7[%c4_138, %c0_139, %c0_140] : memref<8x128x128xbf16, #tpu.memory_space<vmem>>, vector<1x128x128xbf16>
      %223 = vector.shape_cast %222 : vector<1x128x128xbf16> to vector<128x128xbf16>
      %cst_141 = arith.constant dense<0.000000e+00> : vector<8x128xf32>
      %224 = tpu.matmul %221, %223, %cst_141 {dimension_numbers = #tpu.dot_dimension_numbers<[1], [0], [0], [1], [0, 0, 1, 1], [], []>} : vector<8x128xbf16>, vector<128x128xbf16>, vector<8x128xf32> -> vector<8x128xf32>
      %c4_142 = arith.constant 4 : index
      %c0_143 = arith.constant 0 : index
      %c0_144 = arith.constant 0 : index
      %225 = vector.load %arg8[%c4_142, %c0_143, %c0_144] : memref<8x1x128xf32, #tpu.memory_space<vmem>>, vector<1x1x128xf32>
      %226 = vector.shape_cast %225 : vector<1x1x128xf32> to vector<1x128xf32>
      %227 = vector.broadcast %226 : vector<1x128xf32> to vector<8x128xf32>
      %228 = arith.addf %224, %227 : vector<8x128xf32>
      %cst_145 = arith.constant 0.000000e+00 : f32
      %229 = vector.broadcast %cst_145 : f32 to vector<8x128xf32>
      %230 = arith.maximumf %228, %229 : vector<8x128xf32>
      %231 = arith.truncf %230 : vector<8x128xf32> to vector<8x128xbf16>
      %c4_146 = arith.constant 4 : index
      %c0_147 = arith.constant 0 : index
      %c0_148 = arith.constant 0 : index
      %232 = vector.load %arg9[%c4_146, %c0_147, %c0_148] : memref<8x128x128xbf16, #tpu.memory_space<vmem>>, vector<1x128x128xbf16>
      %233 = vector.shape_cast %232 : vector<1x128x128xbf16> to vector<128x128xbf16>
      %cst_149 = arith.constant dense<0.000000e+00> : vector<8x128xf32>
      %234 = tpu.matmul %231, %233, %cst_149 {dimension_numbers = #tpu.dot_dimension_numbers<[1], [0], [0], [1], [0, 0, 1, 1], [], []>} : vector<8x128xbf16>, vector<128x128xbf16>, vector<8x128xf32> -> vector<8x128xf32>
      %c4_150 = arith.constant 4 : index
      %c0_151 = arith.constant 0 : index
      %c0_152 = arith.constant 0 : index
      %235 = vector.load %arg10[%c4_150, %c0_151, %c0_152] : memref<8x1x128xf32, #tpu.memory_space<vmem>>, vector<1x1x128xf32>
      %236 = vector.shape_cast %235 : vector<1x1x128xf32> to vector<1x128xf32>
      %237 = vector.broadcast %236 : vector<1x128xf32> to vector<8x128xf32>
      %238 = arith.addf %234, %237 : vector<8x128xf32>
      %c4_i32_153 = arith.constant 4 : i32
      %239 = vector.broadcast %c4_i32_153 : i32 to vector<8x1xi32>
      %240 = arith.cmpi eq, %17, %239 : vector<8x1xi32>
      %241 = arith.extui %240 : vector<8x1xi1> to vector<8x1xi32>
      %242 = arith.sitofp %241 : vector<8x1xi32> to vector<8x1xf32>
      %c0_154 = arith.constant 0 : index
      %c0_155 = arith.constant 0 : index
      %243 = vector.load %arg11[%c0_154, %c0_155] : memref<8x128xf32, #tpu.memory_space<vmem>>, vector<8x128xf32>
      %244 = vector.broadcast %242 : vector<8x1xf32> to vector<8x128xf32>
      %245 = arith.mulf %244, %238 : vector<8x128xf32>
      %246 = arith.addf %243, %245 : vector<8x128xf32>
      %c0_156 = arith.constant 0 : index
      %c0_157 = arith.constant 0 : index
      %247 = vector.load %arg11[%c0_156, %c0_157] : memref<8x128xf32, #tpu.memory_space<vmem>>, vector<8x128xf32>
      tpu.vector_store %arg11[%c0_156, %c0_157], %246 {strides = array<i32>} : memref<8x128xf32, #tpu.memory_space<vmem>>, vector<8x128xf32>,
    } else {
    }
    %c0_90 = arith.constant 0 : index
    %145 = memref.load %arg0[%c0_90] : memref<8xi32, #tpu.memory_space<smem>>
    %c5_i32 = arith.constant 5 : i32
    %146 = arith.cmpi eq, %145, %c5_i32 : i32
    %c1_91 = arith.constant 1 : index
    %147 = memref.load %arg0[%c1_91] : memref<8xi32, #tpu.memory_space<smem>>
    %c5_i32_92 = arith.constant 5 : i32
    %148 = arith.cmpi eq, %147, %c5_i32_92 : i32
    %149 = arith.ori %146, %148 : i1
    %c2_93 = arith.constant 2 : index
    %150 = memref.load %arg0[%c2_93] : memref<8xi32, #tpu.memory_space<smem>>
    %c5_i32_94 = arith.constant 5 : i32
    %151 = arith.cmpi eq, %150, %c5_i32_94 : i32
    %152 = arith.ori %149, %151 : i1
    %c3_95 = arith.constant 3 : index
    %153 = memref.load %arg0[%c3_95] : memref<8xi32, #tpu.memory_space<smem>>
    %c5_i32_96 = arith.constant 5 : i32
    %154 = arith.cmpi eq, %153, %c5_i32_96 : i32
    %155 = arith.ori %152, %154 : i1
    %c4_97 = arith.constant 4 : index
    %156 = memref.load %arg0[%c4_97] : memref<8xi32, #tpu.memory_space<smem>>
    %c5_i32_98 = arith.constant 5 : i32
    %157 = arith.cmpi eq, %156, %c5_i32_98 : i32
    %158 = arith.ori %155, %157 : i1
    %c5_99 = arith.constant 5 : index
    %159 = memref.load %arg0[%c5_99] : memref<8xi32, #tpu.memory_space<smem>>
    %c5_i32_100 = arith.constant 5 : i32
    %160 = arith.cmpi eq, %159, %c5_i32_100 : i32
    %161 = arith.ori %158, %160 : i1
    %c6_101 = arith.constant 6 : index
    %162 = memref.load %arg0[%c6_101] : memref<8xi32, #tpu.memory_space<smem>>
    %c5_i32_102 = arith.constant 5 : i32
    %163 = arith.cmpi eq, %162, %c5_i32_102 : i32
    %164 = arith.ori %161, %163 : i1
    %c7_103 = arith.constant 7 : index
    %165 = memref.load %arg0[%c7_103] : memref<8xi32, #tpu.memory_space<smem>>
    %c5_i32_104 = arith.constant 5 : i32
    %166 = arith.cmpi eq, %165, %c5_i32_104 : i32
    %167 = arith.ori %164, %166 : i1
    %168 = arith.extui %167 : i1 to i32
    %c0_i32_105 = arith.constant 0 : i32
    %169 = arith.cmpi ne, %168, %c0_i32_105 : i32
    scf.if %169 {
      %220 = vector.extract_strided_slice %16 {offsets = [0, 640], sizes = [8, 128], strides = [1, 1]} : vector<8x1024xf32> to vector<8x128xf32>
      %221 = arith.truncf %220 : vector<8x128xf32> to vector<8x128xbf16>
      %c5_138 = arith.constant 5 : index
      %c0_139 = arith.constant 0 : index
      %c0_140 = arith.constant 0 : index
      %222 = vector.load %arg7[%c5_138, %c0_139, %c0_140] : memref<8x128x128xbf16, #tpu.memory_space<vmem>>, vector<1x128x128xbf16>
      %223 = vector.shape_cast %222 : vector<1x128x128xbf16> to vector<128x128xbf16>
      %cst_141 = arith.constant dense<0.000000e+00> : vector<8x128xf32>
      %224 = tpu.matmul %221, %223, %cst_141 {dimension_numbers = #tpu.dot_dimension_numbers<[1], [0], [0], [1], [0, 0, 1, 1], [], []>} : vector<8x128xbf16>, vector<128x128xbf16>, vector<8x128xf32> -> vector<8x128xf32>
      %c5_142 = arith.constant 5 : index
      %c0_143 = arith.constant 0 : index
      %c0_144 = arith.constant 0 : index
      %225 = vector.load %arg8[%c5_142, %c0_143, %c0_144] : memref<8x1x128xf32, #tpu.memory_space<vmem>>, vector<1x1x128xf32>
      %226 = vector.shape_cast %225 : vector<1x1x128xf32> to vector<1x128xf32>
      %227 = vector.broadcast %226 : vector<1x128xf32> to vector<8x128xf32>
      %228 = arith.addf %224, %227 : vector<8x128xf32>
      %cst_145 = arith.constant 0.000000e+00 : f32
      %229 = vector.broadcast %cst_145 : f32 to vector<8x128xf32>
      %230 = arith.maximumf %228, %229 : vector<8x128xf32>
      %231 = arith.truncf %230 : vector<8x128xf32> to vector<8x128xbf16>
      %c5_146 = arith.constant 5 : index
      %c0_147 = arith.constant 0 : index
      %c0_148 = arith.constant 0 : index
      %232 = vector.load %arg9[%c5_146, %c0_147, %c0_148] : memref<8x128x128xbf16, #tpu.memory_space<vmem>>, vector<1x128x128xbf16>
      %233 = vector.shape_cast %232 : vector<1x128x128xbf16> to vector<128x128xbf16>
      %cst_149 = arith.constant dense<0.000000e+00> : vector<8x128xf32>
      %234 = tpu.matmul %231, %233, %cst_149 {dimension_numbers = #tpu.dot_dimension_numbers<[1], [0], [0], [1], [0, 0, 1, 1], [], []>} : vector<8x128xbf16>, vector<128x128xbf16>, vector<8x128xf32> -> vector<8x128xf32>
      %c5_150 = arith.constant 5 : index
      %c0_151 = arith.constant 0 : index
      %c0_152 = arith.constant 0 : index
      %235 = vector.load %arg10[%c5_150, %c0_151, %c0_152] : memref<8x1x128xf32, #tpu.memory_space<vmem>>, vector<1x1x128xf32>
      %236 = vector.shape_cast %235 : vector<1x1x128xf32> to vector<1x128xf32>
      %237 = vector.broadcast %236 : vector<1x128xf32> to vector<8x128xf32>
      %238 = arith.addf %234, %237 : vector<8x128xf32>
      %c5_i32_153 = arith.constant 5 : i32
      %239 = vector.broadcast %c5_i32_153 : i32 to vector<8x1xi32>
      %240 = arith.cmpi eq, %17, %239 : vector<8x1xi32>
      %241 = arith.extui %240 : vector<8x1xi1> to vector<8x1xi32>
      %242 = arith.sitofp %241 : vector<8x1xi32> to vector<8x1xf32>
      %c0_154 = arith.constant 0 : index
      %c0_155 = arith.constant 0 : index
      %243 = vector.load %arg11[%c0_154, %c0_155] : memref<8x128xf32, #tpu.memory_space<vmem>>, vector<8x128xf32>
      %244 = vector.broadcast %242 : vector<8x1xf32> to vector<8x128xf32>
      %245 = arith.mulf %244, %238 : vector<8x128xf32>
      %246 = arith.addf %243, %245 : vector<8x128xf32>
      %c0_156 = arith.constant 0 : index
      %c0_157 = arith.constant 0 : index
      %247 = vector.load %arg11[%c0_156, %c0_157] : memref<8x128xf32, #tpu.memory_space<vmem>>, vector<8x128xf32>
      tpu.vector_store %arg11[%c0_156, %c0_157], %246 {strides = array<i32>} : memref<8x128xf32, #tpu.memory_space<vmem>>, vector<8x128xf32>,
    } else {
    }
    %c0_106 = arith.constant 0 : index
    %170 = memref.load %arg0[%c0_106] : memref<8xi32, #tpu.memory_space<smem>>
    %c6_i32 = arith.constant 6 : i32
    %171 = arith.cmpi eq, %170, %c6_i32 : i32
    %c1_107 = arith.constant 1 : index
    %172 = memref.load %arg0[%c1_107] : memref<8xi32, #tpu.memory_space<smem>>
    %c6_i32_108 = arith.constant 6 : i32
    %173 = arith.cmpi eq, %172, %c6_i32_108 : i32
    %174 = arith.ori %171, %173 : i1
    %c2_109 = arith.constant 2 : index
    %175 = memref.load %arg0[%c2_109] : memref<8xi32, #tpu.memory_space<smem>>
    %c6_i32_110 = arith.constant 6 : i32
    %176 = arith.cmpi eq, %175, %c6_i32_110 : i32
    %177 = arith.ori %174, %176 : i1
    %c3_111 = arith.constant 3 : index
    %178 = memref.load %arg0[%c3_111] : memref<8xi32, #tpu.memory_space<smem>>
    %c6_i32_112 = arith.constant 6 : i32
    %179 = arith.cmpi eq, %178, %c6_i32_112 : i32
    %180 = arith.ori %177, %179 : i1
    %c4_113 = arith.constant 4 : index
    %181 = memref.load %arg0[%c4_113] : memref<8xi32, #tpu.memory_space<smem>>
    %c6_i32_114 = arith.constant 6 : i32
    %182 = arith.cmpi eq, %181, %c6_i32_114 : i32
    %183 = arith.ori %180, %182 : i1
    %c5_115 = arith.constant 5 : index
    %184 = memref.load %arg0[%c5_115] : memref<8xi32, #tpu.memory_space<smem>>
    %c6_i32_116 = arith.constant 6 : i32
    %185 = arith.cmpi eq, %184, %c6_i32_116 : i32
    %186 = arith.ori %183, %185 : i1
    %c6_117 = arith.constant 6 : index
    %187 = memref.load %arg0[%c6_117] : memref<8xi32, #tpu.memory_space<smem>>
    %c6_i32_118 = arith.constant 6 : i32
    %188 = arith.cmpi eq, %187, %c6_i32_118 : i32
    %189 = arith.ori %186, %188 : i1
    %c7_119 = arith.constant 7 : index
    %190 = memref.load %arg0[%c7_119] : memref<8xi32, #tpu.memory_space<smem>>
    %c6_i32_120 = arith.constant 6 : i32
    %191 = arith.cmpi eq, %190, %c6_i32_120 : i32
    %192 = arith.ori %189, %191 : i1
    %193 = arith.extui %192 : i1 to i32
    %c0_i32_121 = arith.constant 0 : i32
    %194 = arith.cmpi ne, %193, %c0_i32_121 : i32
    scf.if %194 {
      %220 = vector.extract_strided_slice %16 {offsets = [0, 768], sizes = [8, 128], strides = [1, 1]} : vector<8x1024xf32> to vector<8x128xf32>
      %221 = arith.truncf %220 : vector<8x128xf32> to vector<8x128xbf16>
      %c6_138 = arith.constant 6 : index
      %c0_139 = arith.constant 0 : index
      %c0_140 = arith.constant 0 : index
      %222 = vector.load %arg7[%c6_138, %c0_139, %c0_140] : memref<8x128x128xbf16, #tpu.memory_space<vmem>>, vector<1x128x128xbf16>
      %223 = vector.shape_cast %222 : vector<1x128x128xbf16> to vector<128x128xbf16>
      %cst_141 = arith.constant dense<0.000000e+00> : vector<8x128xf32>
      %224 = tpu.matmul %221, %223, %cst_141 {dimension_numbers = #tpu.dot_dimension_numbers<[1], [0], [0], [1], [0, 0, 1, 1], [], []>} : vector<8x128xbf16>, vector<128x128xbf16>, vector<8x128xf32> -> vector<8x128xf32>
      %c6_142 = arith.constant 6 : index
      %c0_143 = arith.constant 0 : index
      %c0_144 = arith.constant 0 : index
      %225 = vector.load %arg8[%c6_142, %c0_143, %c0_144] : memref<8x1x128xf32, #tpu.memory_space<vmem>>, vector<1x1x128xf32>
      %226 = vector.shape_cast %225 : vector<1x1x128xf32> to vector<1x128xf32>
      %227 = vector.broadcast %226 : vector<1x128xf32> to vector<8x128xf32>
      %228 = arith.addf %224, %227 : vector<8x128xf32>
      %cst_145 = arith.constant 0.000000e+00 : f32
      %229 = vector.broadcast %cst_145 : f32 to vector<8x128xf32>
      %230 = arith.maximumf %228, %229 : vector<8x128xf32>
      %231 = arith.truncf %230 : vector<8x128xf32> to vector<8x128xbf16>
      %c6_146 = arith.constant 6 : index
      %c0_147 = arith.constant 0 : index
      %c0_148 = arith.constant 0 : index
      %232 = vector.load %arg9[%c6_146, %c0_147, %c0_148] : memref<8x128x128xbf16, #tpu.memory_space<vmem>>, vector<1x128x128xbf16>
      %233 = vector.shape_cast %232 : vector<1x128x128xbf16> to vector<128x128xbf16>
      %cst_149 = arith.constant dense<0.000000e+00> : vector<8x128xf32>
      %234 = tpu.matmul %231, %233, %cst_149 {dimension_numbers = #tpu.dot_dimension_numbers<[1], [0], [0], [1], [0, 0, 1, 1], [], []>} : vector<8x128xbf16>, vector<128x128xbf16>, vector<8x128xf32> -> vector<8x128xf32>
      %c6_150 = arith.constant 6 : index
      %c0_151 = arith.constant 0 : index
      %c0_152 = arith.constant 0 : index
      %235 = vector.load %arg10[%c6_150, %c0_151, %c0_152] : memref<8x1x128xf32, #tpu.memory_space<vmem>>, vector<1x1x128xf32>
      %236 = vector.shape_cast %235 : vector<1x1x128xf32> to vector<1x128xf32>
      %237 = vector.broadcast %236 : vector<1x128xf32> to vector<8x128xf32>
      %238 = arith.addf %234, %237 : vector<8x128xf32>
      %c6_i32_153 = arith.constant 6 : i32
      %239 = vector.broadcast %c6_i32_153 : i32 to vector<8x1xi32>
      %240 = arith.cmpi eq, %17, %239 : vector<8x1xi32>
      %241 = arith.extui %240 : vector<8x1xi1> to vector<8x1xi32>
      %242 = arith.sitofp %241 : vector<8x1xi32> to vector<8x1xf32>
      %c0_154 = arith.constant 0 : index
      %c0_155 = arith.constant 0 : index
      %243 = vector.load %arg11[%c0_154, %c0_155] : memref<8x128xf32, #tpu.memory_space<vmem>>, vector<8x128xf32>
      %244 = vector.broadcast %242 : vector<8x1xf32> to vector<8x128xf32>
      %245 = arith.mulf %244, %238 : vector<8x128xf32>
      %246 = arith.addf %243, %245 : vector<8x128xf32>
      %c0_156 = arith.constant 0 : index
      %c0_157 = arith.constant 0 : index
      %247 = vector.load %arg11[%c0_156, %c0_157] : memref<8x128xf32, #tpu.memory_space<vmem>>, vector<8x128xf32>
      tpu.vector_store %arg11[%c0_156, %c0_157], %246 {strides = array<i32>} : memref<8x128xf32, #tpu.memory_space<vmem>>, vector<8x128xf32>,
    } else {
    }
    %c0_122 = arith.constant 0 : index
    %195 = memref.load %arg0[%c0_122] : memref<8xi32, #tpu.memory_space<smem>>
    %c7_i32 = arith.constant 7 : i32
    %196 = arith.cmpi eq, %195, %c7_i32 : i32
    %c1_123 = arith.constant 1 : index
    %197 = memref.load %arg0[%c1_123] : memref<8xi32, #tpu.memory_space<smem>>
    %c7_i32_124 = arith.constant 7 : i32
    %198 = arith.cmpi eq, %197, %c7_i32_124 : i32
    %199 = arith.ori %196, %198 : i1
    %c2_125 = arith.constant 2 : index
    %200 = memref.load %arg0[%c2_125] : memref<8xi32, #tpu.memory_space<smem>>
    %c7_i32_126 = arith.constant 7 : i32
    %201 = arith.cmpi eq, %200, %c7_i32_126 : i32
    %202 = arith.ori %199, %201 : i1
    %c3_127 = arith.constant 3 : index
    %203 = memref.load %arg0[%c3_127] : memref<8xi32, #tpu.memory_space<smem>>
    %c7_i32_128 = arith.constant 7 : i32
    %204 = arith.cmpi eq, %203, %c7_i32_128 : i32
    %205 = arith.ori %202, %204 : i1
    %c4_129 = arith.constant 4 : index
    %206 = memref.load %arg0[%c4_129] : memref<8xi32, #tpu.memory_space<smem>>
    %c7_i32_130 = arith.constant 7 : i32
    %207 = arith.cmpi eq, %206, %c7_i32_130 : i32
    %208 = arith.ori %205, %207 : i1
    %c5_131 = arith.constant 5 : index
    %209 = memref.load %arg0[%c5_131] : memref<8xi32, #tpu.memory_space<smem>>
    %c7_i32_132 = arith.constant 7 : i32
    %210 = arith.cmpi eq, %209, %c7_i32_132 : i32
    %211 = arith.ori %208, %210 : i1
    %c6_133 = arith.constant 6 : index
    %212 = memref.load %arg0[%c6_133] : memref<8xi32, #tpu.memory_space<smem>>
    %c7_i32_134 = arith.constant 7 : i32
    %213 = arith.cmpi eq, %212, %c7_i32_134 : i32
    %214 = arith.ori %211, %213 : i1
    %c7_135 = arith.constant 7 : index
    %215 = memref.load %arg0[%c7_135] : memref<8xi32, #tpu.memory_space<smem>>
    %c7_i32_136 = arith.constant 7 : i32
    %216 = arith.cmpi eq, %215, %c7_i32_136 : i32
    %217 = arith.ori %214, %216 : i1
    %218 = arith.extui %217 : i1 to i32
    %c0_i32_137 = arith.constant 0 : i32
    %219 = arith.cmpi ne, %218, %c0_i32_137 : i32
    scf.if %219 {
      %220 = vector.extract_strided_slice %16 {offsets = [0, 896], sizes = [8, 128], strides = [1, 1]} : vector<8x1024xf32> to vector<8x128xf32>
      %221 = arith.truncf %220 : vector<8x128xf32> to vector<8x128xbf16>
      %c7_138 = arith.constant 7 : index
      %c0_139 = arith.constant 0 : index
      %c0_140 = arith.constant 0 : index
      %222 = vector.load %arg7[%c7_138, %c0_139, %c0_140] : memref<8x128x128xbf16, #tpu.memory_space<vmem>>, vector<1x128x128xbf16>
      %223 = vector.shape_cast %222 : vector<1x128x128xbf16> to vector<128x128xbf16>
      %cst_141 = arith.constant dense<0.000000e+00> : vector<8x128xf32>
      %224 = tpu.matmul %221, %223, %cst_141 {dimension_numbers = #tpu.dot_dimension_numbers<[1], [0], [0], [1], [0, 0, 1, 1], [], []>} : vector<8x128xbf16>, vector<128x128xbf16>, vector<8x128xf32> -> vector<8x128xf32>
      %c7_142 = arith.constant 7 : index
      %c0_143 = arith.constant 0 : index
      %c0_144 = arith.constant 0 : index
      %225 = vector.load %arg8[%c7_142, %c0_143, %c0_144] : memref<8x1x128xf32, #tpu.memory_space<vmem>>, vector<1x1x128xf32>
      %226 = vector.shape_cast %225 : vector<1x1x128xf32> to vector<1x128xf32>
      %227 = vector.broadcast %226 : vector<1x128xf32> to vector<8x128xf32>
      %228 = arith.addf %224, %227 : vector<8x128xf32>
      %cst_145 = arith.constant 0.000000e+00 : f32
      %229 = vector.broadcast %cst_145 : f32 to vector<8x128xf32>
      %230 = arith.maximumf %228, %229 : vector<8x128xf32>
      %231 = arith.truncf %230 : vector<8x128xf32> to vector<8x128xbf16>
      %c7_146 = arith.constant 7 : index
      %c0_147 = arith.constant 0 : index
      %c0_148 = arith.constant 0 : index
      %232 = vector.load %arg9[%c7_146, %c0_147, %c0_148] : memref<8x128x128xbf16, #tpu.memory_space<vmem>>, vector<1x128x128xbf16>
      %233 = vector.shape_cast %232 : vector<1x128x128xbf16> to vector<128x128xbf16>
      %cst_149 = arith.constant dense<0.000000e+00> : vector<8x128xf32>
      %234 = tpu.matmul %231, %233, %cst_149 {dimension_numbers = #tpu.dot_dimension_numbers<[1], [0], [0], [1], [0, 0, 1, 1], [], []>} : vector<8x128xbf16>, vector<128x128xbf16>, vector<8x128xf32> -> vector<8x128xf32>
      %c7_150 = arith.constant 7 : index
      %c0_151 = arith.constant 0 : index
      %c0_152 = arith.constant 0 : index
      %235 = vector.load %arg10[%c7_150, %c0_151, %c0_152] : memref<8x1x128xf32, #tpu.memory_space<vmem>>, vector<1x1x128xf32>
      %236 = vector.shape_cast %235 : vector<1x1x128xf32> to vector<1x128xf32>
      %237 = vector.broadcast %236 : vector<1x128xf32> to vector<8x128xf32>
      %238 = arith.addf %234, %237 : vector<8x128xf32>
      %c7_i32_153 = arith.constant 7 : i32
      %239 = vector.broadcast %c7_i32_153 : i32 to vector<8x1xi32>
      %240 = arith.cmpi eq, %17, %239 : vector<8x1xi32>
      %241 = arith.extui %240 : vector<8x1xi1> to vector<8x1xi32>
      %242 = arith.sitofp %241 : vector<8x1xi32> to vector<8x1xf32>
      %c0_154 = arith.constant 0 : index
      %c0_155 = arith.constant 0 : index
      %243 = vector.load %arg11[%c0_154, %c0_155] : memref<8x128xf32, #tpu.memory_space<vmem>>, vector<8x128xf32>
      %244 = vector.broadcast %242 : vector<8x1xf32> to vector<8x128xf32>
      %245 = arith.mulf %244, %238 : vector<8x128xf32>
      %246 = arith.addf %243, %245 : vector<8x128xf32>
      %c0_156 = arith.constant 0 : index
      %c0_157 = arith.constant 0 : index
      %247 = vector.load %arg11[%c0_156, %c0_157] : memref<8x128xf32, #tpu.memory_space<vmem>>, vector<8x128xf32>
      tpu.vector_store %arg11[%c0_156, %c0_157], %246 {strides = array<i32>} : memref<8x128xf32, #tpu.memory_space<vmem>>, vector<8x128xf32>,
    } else {
    }
    return
  }
}

</mosaic_0001>

<bundles_post_ra>
// kernel: classification_model_forward.1
= control target key start
LH: loop header
LB: loop body
LE: loop exit
PB: predicated region body
PF: predicated region fallthrough
CT: control target
= control target key end

     0   :  { %16 = vsyncpa [#allocation5], 0  ;;  %s5281_s0 = inlined_call_operand.vmem [shape: s32[8], index: 0, kind: input, shape index: {}]   ;;  %s5282_s1 = inlined_call_operand.vmem [shape: s32[8,1], index: 1, kind: input, shape index: {}]   ;;  %s5283_s2 = inlined_call_operand.vmem [shape: f32[8,1024], index: 2, kind: input, shape index: {}]   ;;  %s5284_s3 = inlined_call_operand.vmem [shape: bf16[1024,128], index: 3, kind: input, shape index: {}]   ;;  %s5285_s4 = inlined_call_operand.vmem [shape: f32[1,128], index: 4, kind: input, shape index: {}]   ;;  %s5286_s5 = inlined_call_operand.hbm [shape: bf16[128,1024], index: 5, kind: input, shape index: {}]   ;;  %s5287_s6 = inlined_call_operand.vmem [shape: f32[1,1024], index: 6, kind: input, shape index: {}]   ;;  %s5288_s7 = inlined_call_operand.hbm [shape: bf16[8,128,128], index: 7, kind: input, shape index: {}]   ;;  %s5289_s8 = inlined_call_operand.vmem [shape: f32[8,1,128], index: 8, kind: input, shape index: {}]   ;;  %s5290_s9 = inlined_call_operand.hbm [shape: bf16[8,128,128], index: 9, kind: input, shape index: {}]   ;;  %s5291_s10 = inlined_call_operand.vmem [shape: f32[8,1,128], index: 10, kind: input, shape index: {}]   ;;  %s5292_s11 = inlined_call_operand.hbm [shape: f32[8,128], index: 11, kind: output, shape index: {}]  }
   0x1   :  { %17 = vsyncpa [#allocation3], 0 }
   0x2   :  { %18 = vsyncpa [#allocation8], 0 }
   0x3   :  { %19 = vsyncpa [#allocation4], 0  ;;  %s4786_s17 = smov [#allocation7]   ;;  %s26_s21 = sshll.u32 %s5281_s0, 4  ;;  %s27_s21 = int_to_ptr.vmem [resolvable:$true] %s26_s21 }
   0x4   :  { %s57_s18 = sshll.u32 %s4786_s17, 4  ;;  %s4678_s24 = scalar_lea.hbm %s5288_s7, 8192  ;;  %s58_s18 = int_to_ptr.vmem [resolvable:$true] %s57_s18 }
   0x5   :  { %p4679_p0 = scmp.ne.s32.totalorder %s5288_s7, %s4678_s24  ;;  %p4682_p1 = scmp.lt.u32.totalorder %s4678_s24, %s5288_s7 }
   0x7   :  { %p4684_p2 = pnand %p4682_p1, %p4679_p0 }
   0x9   :  { %4687 = shalt.err (!%p4684_p2)
}
   0xa   :  { %s4688_s29 = scalar_lea.vmem %s58_s18, 8192  ;;  %p4693_p4 = scmp.lt.s32.totalorder %s58_s18, %s58_s18 }
   0xb   :  { %p4689_p3 = scmp.ne.s32.totalorder %s58_s18, %s4688_s29  ;;  %p4694_p5 = scmp.lt.s32.totalorder %s4688_s29, %s4688_s29 }
   0xd   :  { %p4695_p6 = por %p4694_p5, %p4693_p4 }
   0xf   :  { %p4696_p7 = pnand %p4695_p6, %p4689_p3 }
  0x11   :  { %4699 = shalt.err (!%p4696_p7)
}
  0x12   :  { %s4787_s0 = smov 64   ;;  %s4788_s30 = smov 4  }
  0x13   :  { %63 = dma.hbm_to_vmem [thread:$0]  %s5288_s7, 8192, %s58_s18, [#allocation8], %s4787_s0, %s4787_s0, %s4788_s30  }
  0x14   :  { %s4700_s14 = scalar_lea.vmem %s27_s21, 16  ;;  %p4705_p9 = scmp.lt.s32.totalorder %s27_s21, %s27_s21 }
  0x15   :  { %p4701_p8 = scmp.ne.s32.totalorder %s27_s21, %s4700_s14  ;;  %p4706_p10 = scmp.lt.s32.totalorder %s4700_s14, %s4700_s14 }
  0x17   :  { %p4707_p11 = por %p4706_p10, %p4705_p9 }
  0x19   :  { %p4708_p12 = pnand %p4707_p11, %p4701_p8 }
  0x1b   :  { %4711 = shalt.err (!%p4708_p12)
}
  0x1c   :  { %s4789_s15 = smov [#allocation2]   ;;  %s4790_s16 = smov [#allocation6]  }
  0x1d   :  { %29 = dma.vmem_to_smem %s27_s21, 16, %s4789_s15, [#allocation5]  }
  0x1e   :  { %s43_s17 = sshll.u32 %s4790_s16, 4  ;;  %s4712_s22 = scalar_lea.hbm %s5286_s5, 8192  ;;  %s44_s17 = int_to_ptr.vmem [resolvable:$true] %s43_s17 }
  0x1f   :  { %p4713_p13 = scmp.ne.s32.totalorder %s5286_s5, %s4712_s22  ;;  %p4716_p0 = scmp.lt.u32.totalorder %s4712_s22, %s5286_s5 }
  0x21   :  { %p4718_p1 = pnand %p4716_p0, %p4713_p13 }
  0x23   :  { %4721 = shalt.err (!%p4718_p1)
}
  0x24   :  { %s4722_s25 = scalar_lea.vmem %s44_s17, 8192  ;;  %p4727_p3 = scmp.lt.s32.totalorder %s44_s17, %s44_s17 }
  0x25   :  { %p4723_p2 = scmp.ne.s32.totalorder %s44_s17, %s4722_s25  ;;  %p4728_p4 = scmp.lt.s32.totalorder %s4722_s25, %s4722_s25 }
  0x27   :  { %p4729_p5 = por %p4728_p4, %p4727_p3 }
  0x29   :  { %p4730_p6 = pnand %p4729_p5, %p4723_p2 }
  0x2b   :  { %4733 = shalt.err (!%p4730_p6)
}
  0x2c   :  { %s4791_s21 = smov 512   ;;  %s4792_s26 = smov 32  }
  0x2d   :  { %49 = dma.hbm_to_vmem [thread:$0]  %s5286_s5, 8192, %s44_s17, [#allocation3], %s4791_s21, %s4791_s21, %s4792_s26  }
  0x2e   :  { %s4793_s29 = smov [#allocation9]   ;;  %s4734_s15 = scalar_lea.hbm %s5290_s9, 8192 }
  0x2f   :  { %s71_s12 = sshll.u32 %s4793_s29, 4  ;;  %p4735_p7 = scmp.ne.s32.totalorder %s5290_s9, %s4734_s15  ;;  %s72_s12 = int_to_ptr.vmem [resolvable:$true] %s71_s12 }
  0x30   :  { %p4738_p8 = scmp.lt.u32.totalorder %s4734_s15, %s5290_s9 }
  0x32   :  { %p4740_p9 = pnand %p4738_p8, %p4735_p7 }
  0x34   :  { %4743 = shalt.err (!%p4740_p9)
}
  0x35   :  { %s4744_s23 = scalar_lea.vmem %s72_s12, 8192  ;;  %p4749_p11 = scmp.lt.s32.totalorder %s72_s12, %s72_s12 }
  0x36   :  { %p4745_p10 = scmp.ne.s32.totalorder %s72_s12, %s4744_s23  ;;  %p4750_p12 = scmp.lt.s32.totalorder %s4744_s23, %s4744_s23 }
  0x38   :  { %p4751_p13 = por %p4750_p12, %p4749_p11 }
  0x3a   :  { %p4752_p0 = pnand %p4751_p13, %p4745_p10 }
  0x3c   :  { %4755 = shalt.err (!%p4752_p0)
}
  0x3d   :  { %77 = dma.hbm_to_vmem [thread:$0]  %s5290_s9, 8192, %s72_s12, [#allocation8], %s4787_s0, %s4787_s0, %s4788_s30  }
  0x3e   :  { %4778 = dma.done.wait [#allocation5], 16  }
  0x3f   :  { %4779 = vsyncadd [#allocation5], 4294967280 }
  0x40   :  { %4780 = dma.done.wait [#allocation3], 8192  }
  0x41   :  { %4781 = vsyncadd [#allocation3], 4294959104 }
  0x42   :  { %4782 = dma.done.wait [#allocation8], 16384  }
  0x43   :  { %4783 = vsyncadd [#allocation8], 4294950912 }
  0x44   :  { %92 = sfence }
  0x45   :  { %v4478_v0 = vld [vmem:[%s5284_s3 + $0x40] sm:$0xff]   ;;  %v4482_v4 = vld [vmem:[%s5284_s3 + $0x48] sm:$0xff]   ;;  %v4486_v8 = vld [vmem:[%s5284_s3 + $0x50] sm:$0xff]   ;;  %s3669_s9 = sld [smem:[#allocation2 + $0x1]]  ;;  %s3670_s0 = sld [smem:[#allocation2 + $0x2]] }
  0x46   :  { %v4479_v1 = vld [vmem:[%s5284_s3 + $0xc0] sm:$0xff]   ;;  %3891 = vmatprep.subr.bf16.mxu0 %v4478_v0  ;;  %v4483_v5 = vld [vmem:[%s5284_s3 + $0xc8] sm:$0xff]   ;;  %v4487_v9 = vld [vmem:[%s5284_s3 + $0xd0] sm:$0xff]   ;;  %s3671_s30 = sld [smem:[#allocation2 + $0x3]]  ;;  %s3672_s27 = sld [smem:[#allocation2 + $0x4]] }
  0x47   :  { %v4480_v2 = vld [vmem:[%s5284_s3] sm:$0xff]   ;;  %3913 = vmatprep.subr.bf16.mxu1 %v4479_v1  ;;  %v4484_v6 = vld [vmem:[%s5284_s3 + $0x8] sm:$0xff]   ;;  %v4488_v10 = vld [vmem:[%s5284_s3 + $0x10] sm:$0xff]   ;;  %s3673_s28 = sld [smem:[#allocation2 + $0x5]]  ;;  %s3674_s29 = sld [smem:[#allocation2 + $0x6]] }
  0x48   :  { %v4481_v3 = vld [vmem:[%s5284_s3 + $0x80] sm:$0xff]   ;;  %3892 = vmatpush3.bf16.msra.mxu0 %v4480_v2  ;;  %v4485_v7 = vld [vmem:[%s5284_s3 + $0x88] sm:$0xff]   ;;  %v4489_v11 = vld [vmem:[%s5284_s3 + $0x90] sm:$0xff]   ;;  %s3675_s12 = sld [smem:[#allocation2 + $0x7]] }
  0x49   :  { %3914 = vmatpush3.bf16.msra.mxu1 %v4481_v3  ;;  %3893 = vmatprep.subr.bf16.mxu0 %v4482_v4  ;;  %v4490_v12 = vld [vmem:[%s5284_s3 + $0x58] sm:$0xff]   ;;  %v4494_v16 = vld [vmem:[%s5284_s3 + $0x60] sm:$0xff]   ;;  %v4498_v20 = vld [vmem:[%s5284_s3 + $0x68] sm:$0xff]  }
  0x4a   :  { %3915 = vmatprep.subr.bf16.mxu1 %v4483_v5  ;;  %v4491_v13 = vld [vmem:[%s5284_s3 + $0xd8] sm:$0xff]   ;;  %v4495_v17 = vld [vmem:[%s5284_s3 + $0xe0] sm:$0xff]   ;;  %v4499_v21 = vld [vmem:[%s5284_s3 + $0xe8] sm:$0xff]  }
  0x4b   :  { %v4492_v14 = vld [vmem:[%s5284_s3 + $0x18] sm:$0xff]   ;;  %v4496_v18 = vld [vmem:[%s5284_s3 + $0x20] sm:$0xff]   ;;  %v4500_v22 = vld [vmem:[%s5284_s3 + $0x28] sm:$0xff]   ;;  %p1394_p2 = scmp.eq.s32.totalorder %s3669_s9, 0  ;;  %p1397_p4 = scmp.eq.s32.totalorder %s3670_s0, 0 }
  0x4c   :  { %3894 = vmatpush3.bf16.msra.mxu0 %v4484_v6  ;;  %v4493_v15 = vld [vmem:[%s5284_s3 + $0x98] sm:$0xff]   ;;  %v4497_v19 = vld [vmem:[%s5284_s3 + $0xa0] sm:$0xff]   ;;  %v4501_v23 = vld [vmem:[%s5284_s3 + $0xa8] sm:$0xff]   ;;  %p1400_p6 = scmp.eq.s32.totalorder %s3671_s30, 0  ;;  %p1403_p8 = scmp.eq.s32.totalorder %s3672_s27, 0 }
  0x4d   :  { %3916 = vmatpush3.bf16.msra.mxu1 %v4485_v7  ;;  %3895 = vmatprep.subr.bf16.mxu0 %v4486_v8  ;;  %v4502_v24 = vld [vmem:[%s5284_s3 + $0x70] sm:$0xff]   ;;  %v4506_v28 = vld [vmem:[%s5284_s3 + $0x78] sm:$0xff]   ;;  %v95_v32 = vld [vmem:[%s5283_s2 + $0x8] sm:$0xff]  ;;  %p1406_p10 = scmp.eq.s32.totalorder %s3673_s28, 0  ;;  %p1409_p12 = scmp.eq.s32.totalorder %s3674_s29, 0 }
  0x4e   :  { %3917 = vmatprep.subr.bf16.mxu1 %v4487_v9  ;;  %v4503_v25 = vld [vmem:[%s5284_s3 + $0xf0] sm:$0xff]   ;;  %v4507_v29 = vld [vmem:[%s5284_s3 + $0xf8] sm:$0xff]   ;;  %v94_v34 = vld [vmem:[%s5283_s2] sm:$0xff]  ;;  %v103_v35 = vpack.c.bf16 %v95_v32, %v95_v32  ;;  %p1412_p13 = scmp.eq.s32.totalorder %s3675_s12, 0 }
  0x4f   :  { %v4504_v26 = vld [vmem:[%s5284_s3 + $0x30] sm:$0xff]   ;;  %v4508_v30 = vld [vmem:[%s5284_s3 + $0x38] sm:$0xff]   ;;  %v102_v37 = vpack.c.bf16 %v94_v34, %v94_v34  ;;  %v4510_v40 = vld [vmem:[%s5284_s3 + $0x140] sm:$0xff]  }
  0x50   :  { %3896 = vmatpush3.bf16.msra.mxu0 %v4488_v10  ;;  %v4505_v27 = vld [vmem:[%s5284_s3 + $0xb0] sm:$0xff]   ;;  %v4509_v31 = vld [vmem:[%s5284_s3 + $0xb8] sm:$0xff]   ;;  %661 = vmatprep.mubr.bf16.mxu0 %v103_v35  ;;  %v4511_v41 = vld [vmem:[%s5284_s3 + $0x1c0] sm:$0xff]  }
  0x51   :  { %3918 = vmatpush3.bf16.msra.mxu1 %v4489_v11  ;;  %3897 = vmatprep.subr.bf16.mxu0 %v4490_v12  ;;  %v97_v33 = vld [vmem:[%s5283_s2 + $0x18] sm:$0xff]  ;;  %v96_v38 = vld [vmem:[%s5283_s2 + $0x10] sm:$0xff]  ;;  %v4512_v42 = vld [vmem:[%s5284_s3 + $0x100] sm:$0xff]  }
  0x52   :  { %3919 = vmatprep.subr.bf16.mxu1 %v4491_v13  ;;  %v105_v36 = vpack.c.bf16 %v97_v33, %v97_v33  ;;  %v104_v39 = vpack.c.bf16 %v96_v38, %v96_v38  ;;  %v4513_v43 = vld [vmem:[%s5284_s3 + $0x180] sm:$0xff]   ;;  %v4514_v44 = vld [vmem:[%s5284_s3 + $0x148] sm:$0xff]   ;;  %v4518_v48 = vld [vmem:[%s5284_s3 + $0x150] sm:$0xff]  }
  0x53   :  { %v4515_v45 = vld [vmem:[%s5284_s3 + $0x1c8] sm:$0xff]   ;;  %v4519_v49 = vld [vmem:[%s5284_s3 + $0x1d0] sm:$0xff]   ;;  %v4522_v52 = vld [vmem:[%s5284_s3 + $0x158] sm:$0xff]  }
  0x54   :  { %3898 = vmatpush3.bf16.msra.mxu0 %v4492_v14  ;;  %701 = vmatprep.mubr.bf16.mxu1 %v105_v36  ;;  %v4516_v46 = vld [vmem:[%s5284_s3 + $0x108] sm:$0xff]   ;;  %v4520_v50 = vld [vmem:[%s5284_s3 + $0x110] sm:$0xff]   ;;  %v4523_v53 = vld [vmem:[%s5284_s3 + $0x1d8] sm:$0xff]  }
  0x55   :  { %3920 = vmatpush3.bf16.msra.mxu1 %v4493_v15  ;;  %3899 = vmatprep.subr.bf16.mxu0 %v4494_v16  ;;  %v4517_v47 = vld [vmem:[%s5284_s3 + $0x188] sm:$0xff]   ;;  %v4521_v51 = vld [vmem:[%s5284_s3 + $0x190] sm:$0xff]   ;;  %v4524_v54 = vld [vmem:[%s5284_s3 + $0x118] sm:$0xff]  }
  0x56   :  { %3921 = vmatprep.subr.bf16.mxu1 %v4495_v17  ;;  %v4525_v55 = vld [vmem:[%s5284_s3 + $0x198] sm:$0xff]   ;;  %v4526_v56 = vld [vmem:[%s5284_s3 + $0x160] sm:$0xff]   ;;  %v4530_v60 = vld [vmem:[%s5284_s3 + $0x168] sm:$0xff]  }
  0x57   :  { %v4527_v57 = vld [vmem:[%s5284_s3 + $0x1e0] sm:$0xff]   ;;  %v4531_v61 = vld [vmem:[%s5284_s3 + $0x1e8] sm:$0xff]   ;;  %v4534_v0 = vld [vmem:[%s5284_s3 + $0x170] sm:$0xff]  }
  0x58   :  { %3900 = vmatpush3.bf16.msra.mxu0 %v4496_v18  ;;  %v4528_v58 = vld [vmem:[%s5284_s3 + $0x120] sm:$0xff]   ;;  %v4532_v62 = vld [vmem:[%s5284_s3 + $0x128] sm:$0xff]   ;;  %v4535_v1 = vld [vmem:[%s5284_s3 + $0x1f0] sm:$0xff]  }
  0x59   :  { %3922 = vmatpush3.bf16.msra.mxu1 %v4497_v19  ;;  %3901 = vmatprep.subr.bf16.mxu0 %v4498_v20  ;;  %v4529_v59 = vld [vmem:[%s5284_s3 + $0x1a0] sm:$0xff]   ;;  %v4533_v63 = vld [vmem:[%s5284_s3 + $0x1a8] sm:$0xff]   ;;  %v4536_v2 = vld [vmem:[%s5284_s3 + $0x130] sm:$0xff]  }
  0x5a   :  { %3923 = vmatprep.subr.bf16.mxu1 %v4499_v21  ;;  %v4537_v3 = vld [vmem:[%s5284_s3 + $0x1b0] sm:$0xff]   ;;  %v4538_v4 = vld [vmem:[%s5284_s3 + $0x178] sm:$0xff]   ;;  %v99_v8 = vld [vmem:[%s5283_s2 + $0x28] sm:$0xff] }
  0x5b   :  { %v4539_v5 = vld [vmem:[%s5284_s3 + $0x1f8] sm:$0xff]   ;;  %v107_v10 = vpack.c.bf16 %v99_v8, %v99_v8  ;;  %v98_v12 = vld [vmem:[%s5283_s2 + $0x20] sm:$0xff]  ;;  %v100_v13 = vld [vmem:[%s5283_s2 + $0x30] sm:$0xff] }
  0x5c   :  { %3902 = vmatpush3.bf16.msra.mxu0 %v4500_v22  ;;  %v4540_v6 = vld [vmem:[%s5284_s3 + $0x138] sm:$0xff]   ;;  %v106_v14 = vpack.c.bf16 %v98_v12, %v98_v12  ;;  %v108_v15 = vpack.c.bf16 %v100_v13, %v100_v13  ;;  %v791_v16 = vld [vmem:[#allocation6] sm:$0xff]  ;;  %v792_v18 = vld [vmem:[#allocation6 + $0x8] sm:$0xff] }
  0x5d   :  { %3924 = vmatpush3.bf16.msra.mxu1 %v4501_v23  ;;  %3903 = vmatprep.subr.bf16.mxu0 %v4502_v24  ;;  %v4541_v7 = vld [vmem:[%s5284_s3 + $0x1b8] sm:$0xff]   ;;  %v795_v17 = vld [vmem:[#allocation6 + $0x20] sm:$0xff]  ;;  %v796_v21 = vld [vmem:[#allocation6 + $0x28] sm:$0xff] }
  0x5e   :  { %3925 = vmatprep.subr.bf16.mxu1 %v4503_v25  ;;  %v101_v9 = vld [vmem:[%s5283_s2 + $0x38] sm:$0xff]  ;;  %v3605_v19 = vcombine.low %v791_v16, %v795_v17  ;;  %v3606_v20 = vcombine.high %v791_v16, %v795_v17  ;;  %v799_v22 = vld [vmem:[#allocation6 + $0x40] sm:$0xff]  ;;  %v3607_v24 = vcombine.low %v792_v18, %v796_v21  ;;  %v3608_v25 = vcombine.high %v792_v18, %v796_v21  ;;  %v808_v32 = vld [vmem:[#allocation6 + $0x88] sm:$0xff] }
  0x5f   :  { %v109_v11 = vpack.c.bf16 %v101_v9, %v101_v9  ;;  %v803_v23 = vld [vmem:[#allocation6 + $0x60] sm:$0xff]  ;;  %v812_v33 = vld [vmem:[#allocation6 + $0xa8] sm:$0xff]  ;;  %v793_v16 = vld [vmem:[#allocation6 + $0x10] sm:$0xff] }
  0x60   :  { %3904 = vmatpush3.bf16.msra.mxu0 %v4504_v26  ;;  %v3614_v26 = vcombine.high %v799_v22, %v803_v23  ;;  %v3613_v34 = vcombine.low %v799_v22, %v803_v23  ;;  %v815_v38 = vld [vmem:[#allocation6 + $0xc0] sm:$0xff]  ;;  %v852_v12 = vld [vmem:[#allocation6 + $0x1e8] sm:$0xff]  ;;  %v797_v17 = vld [vmem:[#allocation6 + $0x30] sm:$0xff]  ;;  %v4794_v22 = vmov 0  }
  0x61   :  { %3926 = vmatpush3.bf16.msra.mxu1 %v4505_v27  ;;  %3905 = vmatprep.subr.bf16.mxu0 %v4506_v28  ;;  %v800_v27 = vld [vmem:[#allocation6 + $0x48] sm:$0xff]  ;;  %v847_v8 = vld [vmem:[#allocation6 + $0x1c0] sm:$0xff]  ;;  %v794_v18 = vld [vmem:[#allocation6 + $0x18] sm:$0xff] }
  0x62   :  { %3927 = vmatprep.subr.bf16.mxu1 %v4507_v29  ;;  %v804_v28 = vld [vmem:[#allocation6 + $0x68] sm:$0xff]  ;;  %v807_v29 = vld [vmem:[#allocation6 + $0x80] sm:$0xff]  ;;  %v798_v21 = vld [vmem:[#allocation6 + $0x38] sm:$0xff] }
  0x63   :  { %v3615_v35 = vcombine.low %v800_v27, %v804_v28  ;;  %v851_v9 = vld [vmem:[#allocation6 + $0x1e0] sm:$0xff]  ;;  %v3611_v23 = vcombine.low %v794_v18, %v798_v21 }
  0x64   :  { %3906 = vmatpush3.bf16.msra.mxu0 %v4508_v30  ;;  %v3616_v30 = vcombine.high %v800_v27, %v804_v28  ;;  %v3661_v13 = vcombine.low %v847_v8, %v851_v9  ;;  %v3540_v27 = vld [vmem:[%s5285_s4] ss:$0 sm:$0xff]  ;;  %s1391_s4 = sld [smem:[#allocation2]] }
  0x65   :  { %3928 = vmatpush3.bf16.msra.mxu1 %v4509_v31  ;;  %3935 = vmatprep.subr.bf16.mxu0 %v4510_v40  ;;  %v811_v31 = vld [vmem:[#allocation6 + $0xa0] sm:$0xff]  ;;  %v816_v40 = vld [vmem:[#allocation6 + $0xc8] sm:$0xff] }
  0x66   :  { %3957 = vmatprep.subr.bf16.mxu1 %v4511_v41  ;;  %v3622_v36 = vcombine.high %v807_v29, %v811_v31  ;;  %v820_v41 = vld [vmem:[#allocation6 + $0xe8] sm:$0xff] }
  0x67   :  { %662 = vmatmul.mubr.bf16.vlgmr.msra.gmra.mrb[0].mxu0 %v102_v37  ;;  %v3624_v37 = vcombine.high %v808_v32, %v812_v33 }
  0x68   :  { %702 = vmatmul.mubr.bf16.vlgmr.msra.gmra.mrb[0].mxu1 %v104_v39  ;;  %3936 = vmatpush3.bf16.msra.mxu0 %v4512_v42  ;;  %v819_v39 = vld [vmem:[#allocation6 + $0xe0] sm:$0xff]  ;;  %v3621_v42 = vcombine.low %v807_v29, %v811_v31 }
  0x69   :  { %3958 = vmatpush3.bf16.msra.mxu1 %v4513_v43  ;;  %3937 = vmatprep.subr.bf16.mxu0 %v4514_v44  ;;  %v3623_v43 = vcombine.low %v808_v32, %v812_v33  ;;  %v3630_v44 = vcombine.high %v815_v38, %v819_v39 }
  0x6a   :  { %3959 = vmatprep.subr.bf16.mxu1 %v4515_v45  ;;  %741 = vmatprep.mubr.bf16.mxu0 %v107_v10  ;;  %v3632_v45 = vcombine.high %v816_v40, %v820_v41  ;;  %v848_v10 = vld [vmem:[#allocation6 + $0x1c8] sm:$0xff]  ;;  %p1392_p1 = scmp.eq.s32.totalorder %s1391_s4, 0 }
  0x6b   :  { %781 = vmatprep.mubr.bf16.mxu1 %v109_v11  ;;  %v3662_v11 = vcombine.high %v847_v8, %v851_v9 }
  0x6c   :  { %3938 = vmatpush3.bf16.msra.mxu0 %v4516_v46  ;;  %v823_v46 = vld [vmem:[#allocation6 + $0x100] sm:$0xff]  ;;  %p1395_p3 = por %p1394_p2, %p1392_p1 }
  0x6d   :  { %3960 = vmatpush3.bf16.msra.mxu1 %v4517_v47  ;;  %3939 = vmatprep.subr.bf16.mxu0 %v4518_v48  ;;  %v827_v47 = vld [vmem:[#allocation6 + $0x120] sm:$0xff]  ;;  %v824_v48 = vld [vmem:[#allocation6 + $0x108] sm:$0xff] }
  0x6e   :  { %3961 = vmatprep.subr.bf16.mxu1 %v4519_v49  ;;  %v828_v49 = vld [vmem:[#allocation6 + $0x128] sm:$0xff]  ;;  %p1398_p5 = por %p1397_p4, %p1395_p3 }
  0x70   :  { %3940 = vmatpush3.bf16.msra.mxu0 %v4520_v50  ;;  %v3629_v50 = vcombine.low %v815_v38, %v819_v39  ;;  %p1401_p7 = por %p1400_p6, %p1398_p5 }
  0x71   :  { %3962 = vmatpush3.bf16.msra.mxu1 %v4521_v51  ;;  %3941 = vmatprep.subr.bf16.mxu0 %v4522_v52  ;;  %v3631_v51 = vcombine.low %v816_v40, %v820_v41  ;;  %v3638_v52 = vcombine.high %v823_v46, %v827_v47 }
  0x72   :  { %3963 = vmatprep.subr.bf16.mxu1 %v4523_v53  ;;  %v3640_v53 = vcombine.high %v824_v48, %v828_v49  ;;  %p1404_p9 = por %p1403_p8, %p1401_p7 }
  0x74   :  { %3942 = vmatpush3.bf16.msra.mxu0 %v4524_v54  ;;  %v831_v54 = vld [vmem:[#allocation6 + $0x140] sm:$0xff]  ;;  %p1407_p11 = por %p1406_p10, %p1404_p9 }
  0x75   :  { %3964 = vmatpush3.bf16.msra.mxu1 %v4525_v55  ;;  %3943 = vmatprep.subr.bf16.mxu0 %v4526_v56  ;;  %v835_v55 = vld [vmem:[#allocation6 + $0x160] sm:$0xff]  ;;  %v832_v56 = vld [vmem:[#allocation6 + $0x148] sm:$0xff] }
  0x76   :  { %3965 = vmatprep.subr.bf16.mxu1 %v4527_v57  ;;  %v836_v57 = vld [vmem:[#allocation6 + $0x168] sm:$0xff]  ;;  %p1410_p0 = por %p1409_p12, %p1407_p11 }
  0x78   :  { %3944 = vmatpush3.bf16.msra.mxu0 %v4528_v58  ;;  %v3637_v58 = vcombine.low %v823_v46, %v827_v47  ;;  %p5156_p1 = por %p1412_p13, %p1410_p0 }
  0x79   :  { %3966 = vmatpush3.bf16.msra.mxu1 %v4529_v59  ;;  %3945 = vmatprep.subr.bf16.mxu0 %v4530_v60  ;;  %v3639_v59 = vcombine.low %v824_v48, %v828_v49  ;;  %v3646_v60 = vcombine.high %v831_v54, %v835_v55  ;;  %vm4797_vm0 = vmmov (%p5156_p1), 0  }
  0x7a   :  { %3967 = vmatprep.subr.bf16.mxu1 %v4531_v61  ;;  %v3648_v61 = vcombine.high %v832_v56, %v836_v57 }
  0x7c   :  { %3946 = vmatpush3.bf16.msra.mxu0 %v4532_v62  ;;  %v3645_v62 = vcombine.low %v831_v54, %v835_v55 }
  0x7d   :  { %3968 = vmatpush3.bf16.msra.mxu1 %v4533_v63  ;;  %3947 = vmatprep.subr.bf16.mxu0 %v4534_v0  ;;  %v3647_v63 = vcombine.low %v832_v56, %v836_v57  ;;  %v839_v0 = vld [vmem:[#allocation6 + $0x180] sm:$0xff] }
  0x7e   :  { %3969 = vmatprep.subr.bf16.mxu1 %v4535_v1  ;;  %v843_v1 = vld [vmem:[#allocation6 + $0x1a0] sm:$0xff] }
  0x80   :  { %3948 = vmatpush3.bf16.msra.mxu0 %v4536_v2  ;;  %v840_v2 = vld [vmem:[#allocation6 + $0x188] sm:$0xff] }
  0x81   :  { %3970 = vmatpush3.bf16.msra.mxu1 %v4537_v3  ;;  %3949 = vmatprep.subr.bf16.mxu0 %v4538_v4  ;;  %v3654_v3 = vcombine.high %v839_v0, %v843_v1  ;;  %v844_v4 = vld [vmem:[#allocation6 + $0x1a8] sm:$0xff] }
  0x82   :  { %3971 = vmatprep.subr.bf16.mxu1 %v4539_v5  ;;  %v3653_v5 = vcombine.low %v839_v0, %v843_v1 }
  0x84   :  { %3950 = vmatpush3.bf16.msra.mxu0 %v4540_v6  ;;  %v3655_v6 = vcombine.low %v840_v2, %v844_v4 }
  0x85   :  { %3972 = vmatpush3.bf16.msra.mxu1 %v4541_v7  ;;  %1217 = vmatprep.subr.bf16.mxu0 %v3606_v20  ;;  %v3656_v7 = vcombine.high %v840_v2, %v844_v4  ;;  %v3610_v20 = vcombine.high %v793_v16, %v797_v17  ;;  %v817_v2 = vld [vmem:[#allocation6 + $0xd0] sm:$0xff]  ;;  %v818_v4 = vld [vmem:[#allocation6 + $0xd8] sm:$0xff] }
  0x86   :  { %1258 = vmatprep.subr.bf16.mxu1 %v3608_v25 }
  0x87   :  { %742 = vmatmul.mubr.bf16.vlgmr.msra.gmra.mrb[4].mxu0 %v106_v14  ;;  %v3663_v14 = vcombine.low %v848_v10, %v852_v12 }
  0x88   :  { %782 = vmatmul.mubr.bf16.vlgmr.msra.gmra.mrb[4].mxu1 %v108_v15  ;;  %1218 = vmatpush1.bf16.msra.mxu0 %v3605_v19  ;;  %v3664_v15 = vcombine.high %v848_v10, %v852_v12  ;;  %v3609_v19 = vcombine.low %v793_v16, %v797_v17  ;;  %v825_v10 = vld [vmem:[#allocation6 + $0x110] sm:$0xff]  ;;  %v826_v12 = vld [vmem:[#allocation6 + $0x118] sm:$0xff] }
  0x89   :  { %1259 = vmatpush1.bf16.msra.mxu1 %v3607_v24  ;;  %1219 = vmatprep.subr.bf16.mxu0 %v3614_v26  ;;  %v3612_v24 = vcombine.high %v794_v18, %v798_v21  ;;  %v833_v18 = vld [vmem:[#allocation6 + $0x150] sm:$0xff]  ;;  %v838_v21 = vld [vmem:[#allocation6 + $0x178] sm:$0xff] }
  0x8a   :  { %1260 = vmatprep.subr.bf16.mxu1 %v3616_v30  ;;  %1249 = vmatprep.mubr.bf16.mxu0 %v4794_v22 }
  0x8b   :  { %1290 = vmatprep.mubr.bf16.mxu1 %v4794_v22 }
  0x8c   :  { %1220 = vmatpush1.bf16.msra.mxu0 %v3613_v34 }
  0x8d   :  { %1261 = vmatpush1.bf16.msra.mxu1 %v3615_v35  ;;  %1221 = vmatprep.subr.bf16.mxu0 %v3622_v36 }
  0x8e   :  { %1262 = vmatprep.subr.bf16.mxu1 %v3624_v37 }
  0x90   :  { %1222 = vmatpush1.bf16.msra.mxu0 %v3621_v42 }
  0x91   :  { %1263 = vmatpush1.bf16.msra.mxu1 %v3623_v43  ;;  %1223 = vmatprep.subr.bf16.mxu0 %v3630_v44 }
  0x92   :  { %1264 = vmatprep.subr.bf16.mxu1 %v3632_v45 }
  0x94   :  { %1224 = vmatpush1.bf16.msra.mxu0 %v3629_v50  ;;  %v801_v50 = vld [vmem:[#allocation6 + $0x50] sm:$0xff] }
  0x95   :  { %1265 = vmatpush1.bf16.msra.mxu1 %v3631_v51  ;;  %1225 = vmatprep.subr.bf16.mxu0 %v3638_v52  ;;  %v805_v51 = vld [vmem:[#allocation6 + $0x70] sm:$0xff]  ;;  %v802_v52 = vld [vmem:[#allocation6 + $0x58] sm:$0xff] }
  0x96   :  { %1266 = vmatprep.subr.bf16.mxu1 %v3640_v53  ;;  %v806_v53 = vld [vmem:[#allocation6 + $0x78] sm:$0xff]  ;;  %v3618_v56 = vcombine.high %v801_v50, %v805_v51 }
  0x97   :  { %v3620_v57 = vcombine.high %v802_v52, %v806_v53 }
  0x98   :  { %1226 = vmatpush1.bf16.msra.mxu0 %v3637_v58  ;;  %v809_v58 = vld [vmem:[#allocation6 + $0x90] sm:$0xff] }
  0x99   :  { %1267 = vmatpush1.bf16.msra.mxu1 %v3639_v59  ;;  %1227 = vmatprep.subr.bf16.mxu0 %v3646_v60  ;;  %v813_v59 = vld [vmem:[#allocation6 + $0xb0] sm:$0xff]  ;;  %v810_v60 = vld [vmem:[#allocation6 + $0x98] sm:$0xff] }
  0x9a   :  { %1268 = vmatprep.subr.bf16.mxu1 %v3648_v61  ;;  %v814_v61 = vld [vmem:[#allocation6 + $0xb8] sm:$0xff]  ;;  %v3626_v0 = vcombine.high %v809_v58, %v813_v59 }
  0x9b   :  { %v3628_v1 = vcombine.high %v810_v60, %v814_v61 }
  0x9c   :  { %1228 = vmatpush1.bf16.msra.mxu0 %v3645_v62  ;;  %v3617_v62 = vcombine.low %v801_v50, %v805_v51  ;;  %v855_v50 = vld [vmem:[%s5287_s6] sm:$0xff] }
  0x9d   :  { %1269 = vmatpush1.bf16.msra.mxu1 %v3647_v63  ;;  %1229 = vmatprep.subr.bf16.mxu0 %v3654_v3  ;;  %v3619_v63 = vcombine.low %v802_v52, %v806_v53  ;;  %v821_v3 = vld [vmem:[#allocation6 + $0xf0] sm:$0xff] }
  0x9e   :  { %1270 = vmatprep.subr.bf16.mxu1 %v3656_v7  ;;  %v3627_v7 = vcombine.low %v810_v60, %v814_v61  ;;  %v3634_v8 = vcombine.high %v817_v2, %v821_v3 }
  0xa0   :  { %1230 = vmatpush1.bf16.msra.mxu0 %v3653_v5  ;;  %v822_v5 = vld [vmem:[#allocation6 + $0xf8] sm:$0xff] }
  0xa1   :  { %1271 = vmatpush1.bf16.msra.mxu1 %v3655_v6  ;;  %1231 = vmatprep.subr.bf16.mxu0 %v3662_v11  ;;  %v3625_v6 = vcombine.low %v809_v58, %v813_v59  ;;  %v3636_v9 = vcombine.high %v818_v4, %v822_v5  ;;  %v829_v11 = vld [vmem:[#allocation6 + $0x130] sm:$0xff] }
  0xa2   :  { %1272 = vmatprep.subr.bf16.mxu1 %v3664_v15  ;;  %v3635_v15 = vcombine.low %v818_v4, %v822_v5  ;;  %v3642_v16 = vcombine.high %v825_v10, %v829_v11 }
  0xa4   :  { %1232 = vmatpush1.bf16.msra.mxu0 %v3661_v13  ;;  %v830_v13 = vld [vmem:[#allocation6 + $0x138] sm:$0xff] }
  0xa5   :  { %1273 = vmatpush1.bf16.msra.mxu1 %v3663_v14  ;;  %1299 = vmatprep.subr.bf16.mxu0 %v3610_v20  ;;  %v3633_v14 = vcombine.low %v817_v2, %v821_v3  ;;  %v3644_v17 = vcombine.high %v826_v12, %v830_v13  ;;  %v834_v20 = vld [vmem:[#allocation6 + $0x158] sm:$0xff] }
  0xa6   :  { %1340 = vmatprep.subr.bf16.mxu1 %v3612_v24 }
 0x13a   :  { %v3907_v25 = vpop.f32.mrb[0].mxu0 }
 0x13b   :  { %v3929_v26 = vpop.f32.mrb[0].mxu1  ;;  %v3908_v28 = vpop.f32.mrb[1].mxu0 }
 0x13c   :  { %v3930_v29 = vpop.f32.mrb[1].mxu1  ;;  %v3909_v30 = vadd.f32 %v3908_v28, %v3907_v25  ;;  %v3910_v32 = vpop.f32.mrb[2].mxu0  ;;  %v3652_v25 = vcombine.high %v834_v20, %v838_v21  ;;  %v842_v28 = vld [vmem:[#allocation6 + $0x198] sm:$0xff] }
 0x13d   :  { %v3931_v31 = vadd.f32 %v3930_v29, %v3929_v26  ;;  %v3932_v33 = vpop.f32.mrb[2].mxu1  ;;  %v3911_v34 = vpop.f32.mrb[3].mxu0  ;;  %v841_v26 = vld [vmem:[#allocation6 + $0x190] sm:$0xff]  ;;  %v846_v29 = vld [vmem:[#allocation6 + $0x1b8] sm:$0xff] }
 0x13e   :  { %v3933_v35 = vpop.f32.mrb[3].mxu1  ;;  %v664_v36 = vadd.f32 %v3909_v30, %v3540_v27  ;;  %v845_v27 = vld [vmem:[#allocation6 + $0x1b0] sm:$0xff]  ;;  %v3660_v33 = vcombine.high %v842_v28, %v846_v29 }
 0x13f   :  { %v3658_v32 = vcombine.high %v841_v26, %v845_v27  ;;  %v849_v34 = vld [vmem:[#allocation6 + $0x1d0] sm:$0xff] }
 0x140   :  { %v704_v37 = vadd.f32 %v3931_v31, %v664_v36  ;;  %v3651_v31 = vcombine.low %v834_v20, %v838_v21  ;;  %v853_v35 = vld [vmem:[#allocation6 + $0x1f0] sm:$0xff]  ;;  %v850_v36 = vld [vmem:[#allocation6 + $0x1d8] sm:$0xff] }
 0x15a   :  { %v3951_v38 = vpop.f32.mrb[4].mxu0 }
 0x15b   :  { %v3973_v39 = vpop.f32.mrb[4].mxu1  ;;  %v3952_v40 = vpop.f32.mrb[5].mxu0 }
 0x15c   :  { %v3953_v41 = vadd.f32 %v3952_v40, %v3951_v38  ;;  %v3974_v42 = vpop.f32.mrb[5].mxu1  ;;  %v3954_v43 = vpop.f32.mrb[6].mxu0  ;;  %v3657_v38 = vcombine.low %v841_v26, %v845_v27  ;;  %v3666_v40 = vcombine.high %v849_v34, %v853_v35 }
 0x15d   :  { %v3975_v44 = vadd.f32 %v3974_v42, %v3973_v39  ;;  %v3976_v45 = vpop.f32.mrb[6].mxu1  ;;  %v3955_v46 = vpop.f32.mrb[7].mxu0  ;;  %v3659_v39 = vcombine.low %v842_v28, %v846_v29  ;;  %v3665_v42 = vcombine.low %v849_v34, %v853_v35  ;;  %v4796_v34 = vmov (%p5156_p1), 0.0   ;;  %v4544_v35 = vld [vmem:[#allocation7 + $0x8] sm:$0xff] (%p5156_p1)  }
 0x15e   :  { %v744_v47 = vadd.f32 %v3953_v41, %v704_v37  ;;  %v3977_v48 = vpop.f32.mrb[7].mxu1  ;;  %v854_v37 = vld [vmem:[#allocation6 + $0x1f8] sm:$0xff]  ;;  %v4795_v45 = vmov 0.0   ;;  %v857_v46 = vlaneseq }
 0x15f   :  { %v3668_v41 = vcombine.high %v850_v36, %v854_v37  ;;  %v3667_v43 = vcombine.low %v850_v36, %v854_v37  ;;  %1390 = vst [vmem:[#allocation10] sm:$0xff] %v4795_v45  ;;  %v4545_v36 = vld [vmem:[#allocation7 + $0x10] sm:$0xff] (%p5156_p1)   ;;  %v4551_v37 = vld [vmem:[#allocation9] sm:$0xff] (%p5156_p1)  }
 0x160   :  { %v784_v49 = vadd.f32 %v3975_v44, %v744_v47  ;;  %v5154_v44 = vld [vmem:[%s5282_s1] sm:$0xff]  ;;  %v858_v47 = vshrl.u32 %v857_v46, 7  ;;  %v4549_v45 = vld [vmem:[#allocation7 + $0x30] sm:$0xff] (%p5156_p1)  }
 0x161   :  { %v4555_v46 = vld [vmem:[#allocation9 + $0x20] sm:$0xff] (%p5156_p1)   ;;  %vm1642_vm1 = vcmp.eq.s32.totalorder (%p5156_p1), %v5154_v44, 0 }
 0x162   :  { %v789_v54 = vmax.f32 %v784_v49, 0.0  ;;  %v859_v48 = vsub.s32 0, %v858_v47  ;;  %v867_v49 = vsub.s32 2, %v858_v47  ;;  %v863_v51 = vsub.s32 1, %v858_v47 }
 0x163   :  { %v871_v52 = vsub.s32 3, %v858_v47 }
 0x164   :  { %v5145_v55 = vpack.c.bf16 %v789_v54, %v789_v54  ;;  %v860_v53 = vrot.slane %v855_v50, %v859_v48  ;;  %v868_v54 = vrot.slane %v855_v50, %v867_v49  ;;  %v4556_v48 = vld [vmem:[#allocation9 + $0x28] sm:$0xff] (%p5156_p1)  }
 0x166   :  { %1250 = vmatmul.mubr.bf16.vlgmr.msra.gmra.mrb[8].mxu0 %v5145_v55  ;;  %1291 = vmatmul.mubr.bf16.vlgmr.msra.gmra.mrb[8].mxu1 %v5145_v55 }
 0x167   :  { %1300 = vmatpush1.bf16.msra.mxu0 %v3609_v19  ;;  %1341 = vmatpush1.bf16.msra.mxu1 %v3611_v23  ;;  %v837_v19 = vld [vmem:[#allocation6 + $0x170] sm:$0xff]  ;;  %v3643_v23 = vcombine.low %v826_v12, %v830_v13  ;;  %v887_v12 = vsub.s32 7, %v858_v47 }
 0x168   :  { %1301 = vmatprep.subr.bf16.mxu0 %v3618_v56  ;;  %1342 = vmatprep.subr.bf16.mxu1 %v3620_v57  ;;  %v3650_v24 = vcombine.high %v833_v18, %v837_v19  ;;  %v3649_v30 = vcombine.low %v833_v18, %v837_v19  ;;  %v872_v56 = vrot.slane %v855_v50, %v871_v52  ;;  %v4798_v52 = vmov (%p5156_p1), 0  }
 0x169   :  { %1331 = vmatprep.mubr.bf16.mxu0 %v4794_v22  ;;  %1372 = vmatprep.mubr.bf16.mxu1 %v4794_v22  ;;  %v3641_v22 = vcombine.low %v825_v10, %v829_v11  ;;  %v883_v10 = vsub.s32 6, %v858_v47  ;;  %v879_v11 = vsub.s32 5, %v858_v47 }
 0x16a   :  { %4542 = vset.pattern.permute.xlu0 (%p5156_p1), %v4798_v52 }
 0x16b   :  { %1302 = vmatpush1.bf16.msra.mxu0 %v3617_v62  ;;  %1343 = vmatpush1.bf16.msra.mxu1 %v3619_v63 }
 0x16c   :  { %1303 = vmatprep.subr.bf16.mxu0 %v3626_v0  ;;  %1344 = vmatprep.subr.bf16.mxu1 %v3628_v1 }
 0x16f   :  { %1304 = vmatpush1.bf16.msra.mxu0 %v3625_v6  ;;  %1345 = vmatpush1.bf16.msra.mxu1 %v3627_v7 }
 0x170   :  { %1305 = vmatprep.subr.bf16.mxu0 %v3634_v8  ;;  %1346 = vmatprep.subr.bf16.mxu1 %v3636_v9  ;;  %v875_v9 = vsub.s32 4, %v858_v47  ;;  %v4550_v47 = vld [vmem:[#allocation7 + $0x38] sm:$0xff] (%p5156_p1)  }
 0x172   :  { %v876_v13 = vrot.slane %v855_v50, %v875_v9  ;;  %v1645_v9 = vld [vmem:[#allocation10] sm:$0xff] (%p5156_p1) }
 0x173   :  { %1306 = vmatpush1.bf16.msra.mxu0 %v3633_v14  ;;  %1347 = vmatpush1.bf16.msra.mxu1 %v3635_v15  ;;  %v884_v14 = vrot.slane %v855_v50, %v883_v10  ;;  %v880_v15 = vrot.slane %v855_v50, %v879_v11 }
 0x174   :  { %1307 = vmatprep.subr.bf16.mxu0 %v3642_v16  ;;  %1348 = vmatprep.subr.bf16.mxu1 %v3644_v17  ;;  %v888_v16 = vrot.slane %v855_v50, %v887_v12 }
 0x177   :  { %1308 = vmatpush1.bf16.msra.mxu0 %v3641_v22  ;;  %1349 = vmatpush1.bf16.msra.mxu1 %v3643_v23 }
 0x178   :  { %1309 = vmatprep.subr.bf16.mxu0 %v3650_v24  ;;  %1350 = vmatprep.subr.bf16.mxu1 %v3652_v25 }
 0x17b   :  { %1310 = vmatpush1.bf16.msra.mxu0 %v3649_v30  ;;  %1351 = vmatpush1.bf16.msra.mxu1 %v3651_v31 }
 0x17c   :  { %1311 = vmatprep.subr.bf16.mxu0 %v3658_v32  ;;  %1352 = vmatprep.subr.bf16.mxu1 %v3660_v33  ;;  %v4543_v33 = vld [vmem:[#allocation7] sm:$0xff] (%p5156_p1)  }
 0x17f   :  { %1312 = vmatpush1.bf16.msra.mxu0 %v3657_v38  ;;  %1353 = vmatpush1.bf16.msra.mxu1 %v3659_v39  ;;  %v4546_v38 = vld [vmem:[#allocation7 + $0x18] sm:$0xff] (%p5156_p1)   ;;  %v4552_v39 = vld [vmem:[#allocation9 + $0x8] sm:$0xff] (%p5156_p1)  }
 0x180   :  { %1313 = vmatprep.subr.bf16.mxu0 %v3666_v40  ;;  %1354 = vmatprep.subr.bf16.mxu1 %v3668_v41  ;;  %v4547_v40 = vld [vmem:[#allocation7 + $0x20] sm:$0xff] (%p5156_p1)   ;;  %v4553_v41 = vld [vmem:[#allocation9 + $0x10] sm:$0xff] (%p5156_p1)  }
 0x183   :  { %1314 = vmatpush1.bf16.msra.mxu0 %v3665_v42  ;;  %1355 = vmatpush1.bf16.msra.mxu1 %v3667_v43  ;;  %v4548_v42 = vld [vmem:[#allocation7 + $0x28] sm:$0xff] (%p5156_p1)   ;;  %v4554_v43 = vld [vmem:[#allocation9 + $0x18] sm:$0xff] (%p5156_p1)  }
 0x184   :  { %4123 = vmatprep.subr.bf16.mxu0 (%p5156_p1), %v4796_v34  ;;  %4143 = vmatprep.subr.bf16.mxu1 (%p5156_p1), %v4796_v34 }
 0x186   :  { %1332 = vmatmul.mubr.bf16.vlgmr.msra.gmra.mrb[12].mxu0 %v5145_v55  ;;  %1373 = vmatmul.mubr.bf16.vlgmr.msra.gmra.mrb[12].mxu1 %v5145_v55  ;;  %v864_v55 = vrot.slane %v855_v50, %v863_v51  ;;  %v4557_v50 = vld [vmem:[#allocation9 + $0x30] sm:$0xff] (%p5156_p1)   ;;  %v4558_v51 = vld [vmem:[#allocation9 + $0x38] sm:$0xff] (%p5156_p1)  }
 0x187   :  { %4124 = vmatpush3.bf16.msra.mxu0 (%p5156_p1), %v4543_v33  ;;  %4139 = vmatprep.mubr.msk.bf16.mxu0 (%p5156_p1), %vm4797_vm0, %v4796_v34 }
 0x188   :  { %4125 = vmatprep.subr.bf16.mxu0 (%p5156_p1), %v4796_v34  ;;  %4159 = vmatprep.mubr.msk.bf16.mxu1 (%p5156_p1), %vm4797_vm0, %v4796_v34 }
 0x189   :  { %4144 = vmatpush3.bf16.msra.mxu1 (%p5156_p1), %v4551_v37 }
 0x18a   :  { %4145 = vmatprep.subr.bf16.mxu1 (%p5156_p1), %v4796_v34 }
 0x18b   :  { %4126 = vmatpush3.bf16.msra.mxu0 (%p5156_p1), %v4544_v35 }
 0x18c   :  { %4127 = vmatprep.subr.bf16.mxu0 (%p5156_p1), %v4796_v34 }
 0x18d   :  { %4146 = vmatpush3.bf16.msra.mxu1 (%p5156_p1), %v4552_v39 }
 0x18e   :  { %4147 = vmatprep.subr.bf16.mxu1 (%p5156_p1), %v4796_v34 }
 0x18f   :  { %4128 = vmatpush3.bf16.msra.mxu0 (%p5156_p1), %v4545_v36 }
 0x190   :  { %4129 = vmatprep.subr.bf16.mxu0 (%p5156_p1), %v4796_v34 }
 0x191   :  { %4148 = vmatpush3.bf16.msra.mxu1 (%p5156_p1), %v4553_v41 }
 0x192   :  { %4149 = vmatprep.subr.bf16.mxu1 (%p5156_p1), %v4796_v34 }
 0x193   :  { %4130 = vmatpush3.bf16.msra.mxu0 (%p5156_p1), %v4546_v38 }
 0x194   :  { %4131 = vmatprep.subr.bf16.mxu0 (%p5156_p1), %v4796_v34 }
 0x195   :  { %4150 = vmatpush3.bf16.msra.mxu1 (%p5156_p1), %v4554_v43 }
 0x196   :  { %4151 = vmatprep.subr.bf16.mxu1 (%p5156_p1), %v4796_v34 }
 0x197   :  { %4132 = vmatpush3.bf16.msra.mxu0 (%p5156_p1), %v4547_v40 }
 0x198   :  { %4133 = vmatprep.subr.bf16.mxu0 (%p5156_p1), %v4796_v34 }
 0x199   :  { %4152 = vmatpush3.bf16.msra.mxu1 (%p5156_p1), %v4555_v46 }
 0x19a   :  { %4153 = vmatprep.subr.bf16.mxu1 (%p5156_p1), %v4796_v34 }
 0x19b   :  { %4134 = vmatpush3.bf16.msra.mxu0 (%p5156_p1), %v4548_v42 }
 0x19c   :  { %4135 = vmatprep.subr.bf16.mxu0 (%p5156_p1), %v4796_v34 }
 0x19d   :  { %4154 = vmatpush3.bf16.msra.mxu1 (%p5156_p1), %v4556_v48 }
 0x19e   :  { %4155 = vmatprep.subr.bf16.mxu1 (%p5156_p1), %v4796_v34 }
 0x19f   :  { %4136 = vmatpush3.bf16.msra.mxu0 (%p5156_p1), %v4549_v45 }
 0x1a0   :  { %4137 = vmatprep.subr.bf16.mxu0 (%p5156_p1), %v4796_v34 }
 0x1a1   :  { %4156 = vmatpush3.bf16.msra.mxu1 (%p5156_p1), %v4557_v50 }
 0x1a2   :  { %4157 = vmatprep.subr.bf16.mxu1 (%p5156_p1), %v4796_v34 }
 0x1a3   :  { %4138 = vmatpush3.bf16.msra.mxu0 (%p5156_p1), %v4550_v47 }
 0x1a5   :  { %4158 = vmatpush3.bf16.msra.mxu1 (%p5156_p1), %v4558_v51 }
 0x239   :  { %v1251_v57 = vpop.f32.mrb[8].mxu0  ;;  %v1292_v58 = vpop.f32.mrb[8].mxu1 }
 0x23a   :  { %v5163_v59 = vadd.f32 %v1251_v57, %v860_v53  ;;  %v5165_v60 = vadd.f32 %v1292_v58, %v868_v54  ;;  %v1253_v61 = vpop.f32.mrb[9].mxu0  ;;  %v1294_v62 = vpop.f32.mrb[9].mxu1  ;;  %v3694_v53 = vsel (%p5156_p1), %vm1642_vm1, 1.0, %v4796_v34  ;;  %v3676_v54 = vld [vmem:[%s5289_s8] ss:$0 sm:$0xff] (%p5156_p1) }
 0x23b   :  { %v5167_v63 = vadd.f32 %v1253_v61, %v864_v55  ;;  %v5169_v0 = vadd.f32 %v1294_v62, %v872_v56  ;;  %v1255_v1 = vpop.f32.mrb[10].mxu0  ;;  %v1296_v2 = vpop.f32.mrb[10].mxu1  ;;  %1648 = vperm.xlu0 (%p5156_p1), %4542, %v3694_v53  }
 0x23c   :  { %v1381_v3 = vmax.f32 %v5163_v59, 0.0  ;;  %v1383_v4 = vmax.f32 %v5165_v60, 0.0  ;;  %v1256_v5 = vpop.f32.mrb[11].mxu0  ;;  %v1297_v6 = vpop.f32.mrb[11].mxu1  ;;  %v3685_v1 = vld [vmem:[%s5291_s10] ss:$0 sm:$0xff] (%p5156_p1) }
 0x23d   :  { %v1382_v7 = vmax.f32 %v5167_v63, 0.0  ;;  %v1384_v8 = vmax.f32 %v5169_v0, 0.0 }
 0x23e   :  { %v1417_v49 = vpack.c.bf16 (%p5156_p1), %v1381_v3, %v1381_v3 }
 0x240   :  { %4140 = vmatmul.mubr.bf16.vlgmr.msra.gmra.mrb[0].mxu0 (%p5156_p1), %v1417_v49 }
 0x257   :  { %1416 = sbr.rel (!%p5156_p1) target bundleno = 1013 (0x3f5), region = 65 }
 0x259   :  { %v1333_v17 = vpop.f32.mrb[12].mxu0  ;;  %v1374_v18 = vpop.f32.mrb[12].mxu1 }
 0x25a   :  { %v5175_v19 = vadd.f32 %v1333_v17, %v876_v13  ;;  %v5177_v20 = vadd.f32 %v1374_v18, %v884_v14  ;;  %v1335_v21 = vpop.f32.mrb[13].mxu0  ;;  %v1376_v22 = vpop.f32.mrb[13].mxu1 }
 0x25b   :  { %v5179_v23 = vadd.f32 %v1335_v21, %v880_v15  ;;  %v5181_v24 = vadd.f32 %v1376_v22, %v888_v16  ;;  %v1337_v25 = vpop.f32.mrb[14].mxu0  ;;  %v1378_v26 = vpop.f32.mrb[14].mxu1 }
 0x25c   :  { %v1385_v27 = vmax.f32 %v5175_v19, 0.0  ;;  %v1387_v28 = vmax.f32 %v5177_v20, 0.0  ;;  %v1338_v29 = vpop.f32.mrb[15].mxu0  ;;  %v1379_v30 = vpop.f32.mrb[15].mxu1 }
 0x25d   :  { %v1386_v31 = vmax.f32 %v5179_v23, 0.0  ;;  %v1388_v32 = vmax.f32 %v5181_v24, 0.0 }
 0x2ba   :  { %v1649_v3 = vpop.permute.xlu0 %1648 }
 0x313   :  { %v1523_v55 = vpop.f32.mrb[0].mxu0 }
 0x314   :  { %v1524_v56 = vadd.f32 %v3676_v54, %v1523_v55  ;;  %v4141_v57 = vpop.f32.mrb[1].mxu0 }
 0x315   :  { %v1526_v58 = vpop.f32.mrb[2].mxu0 }
 0x316   :  { %v1529_v59 = vmax.f32 %v1524_v56, 0.0  ;;  %v4142_v61 = vpop.f32.mrb[3].mxu0 }
 0x318   :  { %v1530_v62 = vpack.c.bf16 %v1529_v59, %v1529_v59 }
 0x31a   :  { %4160 = vmatmul.mubr.bf16.vlgmr.msra.gmra.mrb[0].mxu1 %v1530_v62 }
 0x3ed   :  { %v1636_v2 = vpop.f32.mrb[0].mxu1 }
 0x3ee   :  { %v1637_v5 = vadd.f32 %v3685_v1, %v1636_v2  ;;  %v4161_v6 = vpop.f32.mrb[1].mxu1 }
 0x3ef   :  { %v1639_v10 = vpop.f32.mrb[2].mxu1 }
 0x3f0   :  { %v1651_v11 = vmul.f32 %v1649_v3, %v1637_v5  ;;  %v4162_v12 = vpop.f32.mrb[3].mxu1 }
 0x3f2   :  { %v1652_v13 = vadd.f32 %v1651_v11, %v1645_v9 }
 0x3f4   :  { %1653 = vst [vmem:[#allocation10] sm:$0xff] %v1652_v13 }
 0x3f5 PF:  { %s1654_s23 = sld [smem:[#allocation2]]  ;;  %s3695_s5 = sld [smem:[#allocation2 + $0x1]] }
 0x3f6   :  { %s3696_s17 = sld [smem:[#allocation2 + $0x2]]  ;;  %s3697_s24 = sld [smem:[#allocation2 + $0x3]] }
 0x3f7   :  { %s3698_s7 = sld [smem:[#allocation2 + $0x4]]  ;;  %s3699_s18 = sld [smem:[#allocation2 + $0x5]] }
 0x3f8   :  { %s3700_s25 = sld [smem:[#allocation2 + $0x6]]  ;;  %s3701_s21 = sld [smem:[#allocation2 + $0x7]] }
 0x3fb   :  { %p1655_p2 = scmp.eq.s32.totalorder %s1654_s23, 1  ;;  %p1657_p3 = scmp.eq.s32.totalorder %s3695_s5, 1 }
 0x3fc   :  { %p1660_p4 = scmp.eq.s32.totalorder %s3696_s17, 1  ;;  %p1663_p6 = scmp.eq.s32.totalorder %s3697_s24, 1 }
 0x3fd   :  { %p1658_p5 = por %p1657_p3, %p1655_p2  ;;  %p1666_p8 = scmp.eq.s32.totalorder %s3698_s7, 1 }
 0x3fe   :  { %p1669_p10 = scmp.eq.s32.totalorder %s3699_s18, 1  ;;  %p1672_p12 = scmp.eq.s32.totalorder %s3700_s25, 1 }
 0x3ff   :  { %p1661_p7 = por %p1660_p4, %p1658_p5  ;;  %p1675_p0 = scmp.eq.s32.totalorder %s3701_s21, 1 }
 0x401   :  { %p1664_p9 = por %p1663_p6, %p1661_p7 }
 0x403   :  { %p1667_p11 = por %p1666_p8, %p1664_p9 }
 0x405   :  { %p1670_p13 = por %p1669_p10, %p1667_p11 }
 0x407   :  { %p1673_p1 = por %p1672_p12, %p1670_p13 }
 0x409   :  { %p1676_p2 = por %p1675_p0, %p1673_p1 }
 0x40a   :  { %v4560_v14 = vld [vmem:[#allocation7 + $0x40] sm:$0xff] (%p1676_p2)   ;;  %v4799_v15 = vmov (%p1676_p2), 0.0   ;;  %v4561_v16 = vld [vmem:[#allocation7 + $0x48] sm:$0xff] (%p1676_p2)   ;;  %vm4800_vm2 = vmmov (%p1676_p2), 0   ;;  %v4562_v17 = vld [vmem:[#allocation7 + $0x50] sm:$0xff] (%p1676_p2)   ;;  %v1680_v37 = vpack.c.bf16 (%p1676_p2), %v1382_v7, %v1382_v7  ;;  %vm1909_vm3 = vcmp.eq.s32.totalorder (%p1676_p2), %v5154_v44, 1 }
 0x40b   :  { %1679 = sbr.rel (!%p1676_p2) target bundleno = 1504 (0x5e0), region = 69  ;;  %4163 = vmatprep.subr.bf16.mxu0 (%p1676_p2), %v4799_v15  ;;  %4183 = vmatprep.subr.bf16.mxu1 (%p1676_p2), %v4799_v15  ;;  %v4568_v18 = vld [vmem:[#allocation9 + $0x40] sm:$0xff] (%p1676_p2)   ;;  %v4563_v21 = vld [vmem:[#allocation7 + $0x58] sm:$0xff] (%p1676_p2)   ;;  %v4569_v22 = vld [vmem:[#allocation9 + $0x48] sm:$0xff] (%p1676_p2)   ;;  %v4801_v40 = vmov (%p1676_p2), 0   ;;  %v3722_v41 = vsel (%p1676_p2), %vm1909_vm3, 1.0, %v4799_v15 }
 0x40c   :  { %4164 = vmatpush3.bf16.msra.mxu0 (%p1676_p2), %v4560_v14  ;;  %4179 = vmatprep.mubr.msk.bf16.mxu0 (%p1676_p2), %vm4800_vm2, %v4799_v15  ;;  %v4564_v25 = vld [vmem:[#allocation7 + $0x60] sm:$0xff] (%p1676_p2)   ;;  %v4570_v26 = vld [vmem:[#allocation9 + $0x50] sm:$0xff] (%p1676_p2)   ;;  %v4565_v29 = vld [vmem:[#allocation7 + $0x68] sm:$0xff] (%p1676_p2)  }
 0x40d   :  { %4165 = vmatprep.subr.bf16.mxu0 (%p1676_p2), %v4799_v15  ;;  %4199 = vmatprep.mubr.msk.bf16.mxu1 (%p1676_p2), %vm4800_vm2, %v4799_v15  ;;  %v4571_v30 = vld [vmem:[#allocation9 + $0x58] sm:$0xff] (%p1676_p2)   ;;  %v4566_v33 = vld [vmem:[#allocation7 + $0x70] sm:$0xff] (%p1676_p2)   ;;  %v4572_v34 = vld [vmem:[#allocation9 + $0x60] sm:$0xff] (%p1676_p2)  }
 0x40e   :  { %4184 = vmatpush3.bf16.msra.mxu1 (%p1676_p2), %v4568_v18  ;;  %v4567_v35 = vld [vmem:[#allocation7 + $0x78] sm:$0xff] (%p1676_p2)   ;;  %v4573_v36 = vld [vmem:[#allocation9 + $0x68] sm:$0xff] (%p1676_p2)   ;;  %v4574_v38 = vld [vmem:[#allocation9 + $0x70] sm:$0xff] (%p1676_p2)   ;;  %4559 = vset.pattern.permute.xlu0 (%p1676_p2), %v4801_v40 }
 0x40f   :  { %4185 = vmatprep.subr.bf16.mxu1 (%p1676_p2), %v4799_v15  ;;  %v4575_v39 = vld [vmem:[#allocation9 + $0x78] sm:$0xff] (%p1676_p2)   ;;  %1915 = vperm.xlu0 (%p1676_p2), %4559, %v3722_v41   ;;  %v3703_v63 = vld [vmem:[%s5289_s8 + $0x1] ss:$0 sm:$0xff] (%p1676_p2) }
 0x410   :  { %4166 = vmatpush3.bf16.msra.mxu0 (%p1676_p2), %v4561_v16  ;;  %v3713_v49 = vld [vmem:[%s5291_s10 + $0x1] ss:$0 sm:$0xff] (%p1676_p2) }
 0x411   :  { %4167 = vmatprep.subr.bf16.mxu0 (%p1676_p2), %v4799_v15  ;;  %v1912_v54 = vld [vmem:[#allocation10] sm:$0xff] (%p1676_p2) }
 0x412   :  { %4186 = vmatpush3.bf16.msra.mxu1 %v4569_v22 }
 0x413   :  { %4187 = vmatprep.subr.bf16.mxu1 %v4799_v15 }
 0x414   :  { %4168 = vmatpush3.bf16.msra.mxu0 %v4562_v17 }
 0x415   :  { %4169 = vmatprep.subr.bf16.mxu0 %v4799_v15 }
 0x416   :  { %4188 = vmatpush3.bf16.msra.mxu1 %v4570_v26 }
 0x417   :  { %4189 = vmatprep.subr.bf16.mxu1 %v4799_v15 }
 0x418   :  { %4170 = vmatpush3.bf16.msra.mxu0 %v4563_v21 }
 0x419   :  { %4171 = vmatprep.subr.bf16.mxu0 %v4799_v15 }
 0x41a   :  { %4190 = vmatpush3.bf16.msra.mxu1 %v4571_v30 }
 0x41b   :  { %4191 = vmatprep.subr.bf16.mxu1 %v4799_v15 }
 0x41c   :  { %4172 = vmatpush3.bf16.msra.mxu0 %v4564_v25 }
 0x41d   :  { %4173 = vmatprep.subr.bf16.mxu0 %v4799_v15 }
 0x41e   :  { %4192 = vmatpush3.bf16.msra.mxu1 %v4572_v34 }
 0x41f   :  { %4193 = vmatprep.subr.bf16.mxu1 %v4799_v15 }
 0x420   :  { %4174 = vmatpush3.bf16.msra.mxu0 %v4565_v29 }
 0x421   :  { %4175 = vmatprep.subr.bf16.mxu0 %v4799_v15 }
 0x422   :  { %4194 = vmatpush3.bf16.msra.mxu1 %v4573_v36 }
 0x423   :  { %4195 = vmatprep.subr.bf16.mxu1 %v4799_v15 }
 0x424   :  { %4176 = vmatpush3.bf16.msra.mxu0 %v4566_v33 }
 0x425   :  { %4177 = vmatprep.subr.bf16.mxu0 %v4799_v15 }
 0x426   :  { %4196 = vmatpush3.bf16.msra.mxu1 %v4574_v38 }
 0x427   :  { %4197 = vmatprep.subr.bf16.mxu1 %v4799_v15 }
 0x428   :  { %4178 = vmatpush3.bf16.msra.mxu0 %v4567_v35 }
 0x42a   :  { %4198 = vmatpush3.bf16.msra.mxu1 %v4575_v39 }
 0x42b   :  { %4180 = vmatmul.mubr.bf16.vlgmr.msra.gmra.mrb[0].mxu0 %v1680_v37 }
 0x48e   :  { %v1916_v51 = vpop.permute.xlu0 %1915 }
 0x4fe   :  { %v1788_v7 = vpop.f32.mrb[0].mxu0 }
 0x4ff   :  { %v1789_v42 = vadd.f32 %v3703_v63, %v1788_v7  ;;  %v4181_v43 = vpop.f32.mrb[1].mxu0 }
 0x500   :  { %v1791_v45 = vpop.f32.mrb[2].mxu0 }
 0x501   :  { %v1794_v46 = vmax.f32 %v1789_v42, 0.0  ;;  %v4182_v47 = vpop.f32.mrb[3].mxu0 }
 0x503   :  { %v1795_v48 = vpack.c.bf16 %v1794_v46, %v1794_v46 }
 0x505   :  { %4200 = vmatmul.mubr.bf16.vlgmr.msra.gmra.mrb[0].mxu1 %v1795_v48 }
 0x5d8   :  { %v1903_v50 = vpop.f32.mrb[0].mxu1 }
 0x5d9   :  { %v1904_v52 = vadd.f32 %v3713_v49, %v1903_v50  ;;  %v4201_v53 = vpop.f32.mrb[1].mxu1 }
 0x5da   :  { %v1906_v55 = vpop.f32.mrb[2].mxu1 }
 0x5db   :  { %v1918_v56 = vmul.f32 %v1916_v51, %v1904_v52  ;;  %v4202_v57 = vpop.f32.mrb[3].mxu1 }
 0x5dd   :  { %v1919_v58 = vadd.f32 %v1918_v56, %v1912_v54 }
 0x5df   :  { %1920 = vst [vmem:[#allocation10] sm:$0xff] %v1919_v58 }
 0x5e0 PF:  { %s1921_s9 = sld [smem:[#allocation2]]  ;;  %s3723_s0 = sld [smem:[#allocation2 + $0x1]] }
 0x5e1   :  { %s3724_s30 = sld [smem:[#allocation2 + $0x2]]  ;;  %s3725_s27 = sld [smem:[#allocation2 + $0x3]] }
 0x5e2   :  { %s3726_s28 = sld [smem:[#allocation2 + $0x4]]  ;;  %s3727_s29 = sld [smem:[#allocation2 + $0x5]] }
 0x5e3   :  { %s3728_s12 = sld [smem:[#allocation2 + $0x6]]  ;;  %s3729_s13 = sld [smem:[#allocation2 + $0x7]] }
 0x5e6   :  { %p1922_p3 = scmp.eq.s32.totalorder %s1921_s9, 2  ;;  %p1924_p4 = scmp.eq.s32.totalorder %s3723_s0, 2 }
 0x5e7   :  { %p1927_p5 = scmp.eq.s32.totalorder %s3724_s30, 2  ;;  %p1930_p7 = scmp.eq.s32.totalorder %s3725_s27, 2 }
 0x5e8   :  { %p1925_p6 = por %p1924_p4, %p1922_p3  ;;  %p1933_p9 = scmp.eq.s32.totalorder %s3726_s28, 2 }
 0x5e9   :  { %p1936_p11 = scmp.eq.s32.totalorder %s3727_s29, 2  ;;  %p1939_p13 = scmp.eq.s32.totalorder %s3728_s12, 2 }
 0x5ea   :  { %p1928_p8 = por %p1927_p5, %p1925_p6  ;;  %p1942_p1 = scmp.eq.s32.totalorder %s3729_s13, 2 }
 0x5ec   :  { %p1931_p10 = por %p1930_p7, %p1928_p8 }
 0x5ee   :  { %p1934_p12 = por %p1933_p9, %p1931_p10 }
 0x5f0   :  { %p1937_p0 = por %p1936_p11, %p1934_p12 }
 0x5f2   :  { %p1940_p2 = por %p1939_p13, %p1937_p0 }
 0x5f4   :  { %p1943_p3 = por %p1942_p1, %p1940_p2 }
 0x5f5   :  { %v4577_v59 = vld [vmem:[#allocation7 + $0x80] sm:$0xff] (%p1943_p3)   ;;  %v4802_v61 = vmov (%p1943_p3), 0.0   ;;  %v4578_v62 = vld [vmem:[#allocation7 + $0x88] sm:$0xff] (%p1943_p3)   ;;  %vm4803_vm4 = vmmov (%p1943_p3), 0   ;;  %v4579_v1 = vld [vmem:[#allocation7 + $0x90] sm:$0xff] (%p1943_p3)   ;;  %v1947_v16 = vpack.c.bf16 (%p1943_p3), %v1383_v4, %v1383_v4  ;;  %vm2176_vm5 = vcmp.eq.s32.totalorder (%p1943_p3), %v5154_v44, 2 }
 0x5f6   :  { %1946 = sbr.rel (!%p1943_p3) target bundleno = 1995 (0x7cb), region = 73  ;;  %4203 = vmatprep.subr.bf16.mxu0 (%p1943_p3), %v4802_v61  ;;  %4223 = vmatprep.subr.bf16.mxu1 (%p1943_p3), %v4802_v61  ;;  %v4585_v2 = vld [vmem:[#allocation9 + $0x80] sm:$0xff] (%p1943_p3)   ;;  %v4580_v3 = vld [vmem:[#allocation7 + $0x98] sm:$0xff] (%p1943_p3)   ;;  %v4586_v5 = vld [vmem:[#allocation9 + $0x88] sm:$0xff] (%p1943_p3)   ;;  %v4804_v21 = vmov (%p1943_p3), 0   ;;  %v3750_v22 = vsel (%p1943_p3), %vm2176_vm5, 1.0, %v4802_v61 }
 0x5f7   :  { %4204 = vmatpush3.bf16.msra.mxu0 (%p1943_p3), %v4577_v59  ;;  %4219 = vmatprep.mubr.msk.bf16.mxu0 (%p1943_p3), %vm4803_vm4, %v4802_v61  ;;  %v4581_v6 = vld [vmem:[#allocation7 + $0xa0] sm:$0xff] (%p1943_p3)   ;;  %v4587_v9 = vld [vmem:[#allocation9 + $0x90] sm:$0xff] (%p1943_p3)   ;;  %v4582_v10 = vld [vmem:[#allocation7 + $0xa8] sm:$0xff] (%p1943_p3)  }
 0x5f8   :  { %4205 = vmatprep.subr.bf16.mxu0 (%p1943_p3), %v4802_v61  ;;  %4239 = vmatprep.mubr.msk.bf16.mxu1 (%p1943_p3), %vm4803_vm4, %v4802_v61  ;;  %v4588_v11 = vld [vmem:[#allocation9 + $0x98] sm:$0xff] (%p1943_p3)   ;;  %v4583_v12 = vld [vmem:[#allocation7 + $0xb0] sm:$0xff] (%p1943_p3)   ;;  %v4589_v13 = vld [vmem:[#allocation9 + $0xa0] sm:$0xff] (%p1943_p3)  }
 0x5f9   :  { %4224 = vmatpush3.bf16.msra.mxu1 (%p1943_p3), %v4585_v2  ;;  %v4584_v14 = vld [vmem:[#allocation7 + $0xb8] sm:$0xff] (%p1943_p3)   ;;  %v4590_v15 = vld [vmem:[#allocation9 + $0xa8] sm:$0xff] (%p1943_p3)   ;;  %v4591_v17 = vld [vmem:[#allocation9 + $0xb0] sm:$0xff] (%p1943_p3)   ;;  %4576 = vset.pattern.permute.xlu0 (%p1943_p3), %v4804_v21 }
 0x5fa   :  { %4225 = vmatprep.subr.bf16.mxu1 (%p1943_p3), %v4802_v61  ;;  %v4592_v18 = vld [vmem:[#allocation9 + $0xb8] sm:$0xff] (%p1943_p3)   ;;  %2182 = vperm.xlu0 (%p1943_p3), %4576, %v3750_v22   ;;  %v3731_v60 = vld [vmem:[%s5289_s8 + $0x2] ss:$0 sm:$0xff] (%p1943_p3) }
 0x5fb   :  { %4206 = vmatpush3.bf16.msra.mxu0 (%p1943_p3), %v4578_v62  ;;  %v3741_v35 = vld [vmem:[%s5291_s10 + $0x2] ss:$0 sm:$0xff] (%p1943_p3) }
 0x5fc   :  { %4207 = vmatprep.subr.bf16.mxu0 (%p1943_p3), %v4802_v61  ;;  %v2179_v40 = vld [vmem:[#allocation10] sm:$0xff] (%p1943_p3) }
 0x5fd   :  { %4226 = vmatpush3.bf16.msra.mxu1 %v4586_v5 }
 0x5fe   :  { %4227 = vmatprep.subr.bf16.mxu1 %v4802_v61 }
 0x5ff   :  { %4208 = vmatpush3.bf16.msra.mxu0 %v4579_v1 }
 0x600   :  { %4209 = vmatprep.subr.bf16.mxu0 %v4802_v61 }
 0x601   :  { %4228 = vmatpush3.bf16.msra.mxu1 %v4587_v9 }
 0x602   :  { %4229 = vmatprep.subr.bf16.mxu1 %v4802_v61 }
 0x603   :  { %4210 = vmatpush3.bf16.msra.mxu0 %v4580_v3 }
 0x604   :  { %4211 = vmatprep.subr.bf16.mxu0 %v4802_v61 }
 0x605   :  { %4230 = vmatpush3.bf16.msra.mxu1 %v4588_v11 }
 0x606   :  { %4231 = vmatprep.subr.bf16.mxu1 %v4802_v61 }
 0x607   :  { %4212 = vmatpush3.bf16.msra.mxu0 %v4581_v6 }
 0x608   :  { %4213 = vmatprep.subr.bf16.mxu0 %v4802_v61 }
 0x609   :  { %4232 = vmatpush3.bf16.msra.mxu1 %v4589_v13 }
 0x60a   :  { %4233 = vmatprep.subr.bf16.mxu1 %v4802_v61 }
 0x60b   :  { %4214 = vmatpush3.bf16.msra.mxu0 %v4582_v10 }
 0x60c   :  { %4215 = vmatprep.subr.bf16.mxu0 %v4802_v61 }
 0x60d   :  { %4234 = vmatpush3.bf16.msra.mxu1 %v4590_v15 }
 0x60e   :  { %4235 = vmatprep.subr.bf16.mxu1 %v4802_v61 }
 0x60f   :  { %4216 = vmatpush3.bf16.msra.mxu0 %v4583_v12 }
 0x610   :  { %4217 = vmatprep.subr.bf16.mxu0 %v4802_v61 }
 0x611   :  { %4236 = vmatpush3.bf16.msra.mxu1 %v4591_v17 }
 0x612   :  { %4237 = vmatprep.subr.bf16.mxu1 %v4802_v61 }
 0x613   :  { %4218 = vmatpush3.bf16.msra.mxu0 %v4584_v14 }
 0x615   :  { %4238 = vmatpush3.bf16.msra.mxu1 %v4592_v18 }
 0x616   :  { %4220 = vmatmul.mubr.bf16.vlgmr.msra.gmra.mrb[0].mxu0 %v1947_v16 }
 0x679   :  { %v2183_v37 = vpop.permute.xlu0 %2182 }
 0x6e9   :  { %v2055_v4 = vpop.f32.mrb[0].mxu0 }
 0x6ea   :  { %v2056_v25 = vadd.f32 %v3731_v60, %v2055_v4  ;;  %v4221_v26 = vpop.f32.mrb[1].mxu0 }
 0x6eb   :  { %v2058_v29 = vpop.f32.mrb[2].mxu0 }
 0x6ec   :  { %v2061_v30 = vmax.f32 %v2056_v25, 0.0  ;;  %v4222_v33 = vpop.f32.mrb[3].mxu0 }
 0x6ee   :  { %v2062_v34 = vpack.c.bf16 %v2061_v30, %v2061_v30 }
 0x6f0   :  { %4240 = vmatmul.mubr.bf16.vlgmr.msra.gmra.mrb[0].mxu1 %v2062_v34 }
 0x7c3   :  { %v2170_v36 = vpop.f32.mrb[0].mxu1 }
 0x7c4   :  { %v2171_v38 = vadd.f32 %v3741_v35, %v2170_v36  ;;  %v4241_v39 = vpop.f32.mrb[1].mxu1 }
 0x7c5   :  { %v2173_v41 = vpop.f32.mrb[2].mxu1 }
 0x7c6   :  { %v2185_v63 = vmul.f32 %v2183_v37, %v2171_v38  ;;  %v4242_v7 = vpop.f32.mrb[3].mxu1 }
 0x7c8   :  { %v2186_v42 = vadd.f32 %v2185_v63, %v2179_v40 }
 0x7ca   :  { %2187 = vst [vmem:[#allocation10] sm:$0xff] %v2186_v42 }
 0x7cb PF:  { %s2188_s1 = sld [smem:[#allocation2]]  ;;  %s3751_s6 = sld [smem:[#allocation2 + $0x1]] }
 0x7cc   :  { %s3752_s20 = sld [smem:[#allocation2 + $0x2]]  ;;  %s3753_s22 = sld [smem:[#allocation2 + $0x3]] }
 0x7cd   :  { %s3754_s23 = sld [smem:[#allocation2 + $0x4]]  ;;  %s3755_s5 = sld [smem:[#allocation2 + $0x5]] }
 0x7ce   :  { %s3756_s17 = sld [smem:[#allocation2 + $0x6]]  ;;  %s3757_s24 = sld [smem:[#allocation2 + $0x7]] }
 0x7d1   :  { %p2189_p4 = scmp.eq.s32.totalorder %s2188_s1, 3  ;;  %p2191_p5 = scmp.eq.s32.totalorder %s3751_s6, 3 }
 0x7d2   :  { %p2194_p6 = scmp.eq.s32.totalorder %s3752_s20, 3  ;;  %p2197_p8 = scmp.eq.s32.totalorder %s3753_s22, 3 }
 0x7d3   :  { %p2192_p7 = por %p2191_p5, %p2189_p4  ;;  %p2200_p10 = scmp.eq.s32.totalorder %s3754_s23, 3 }
 0x7d4   :  { %p2203_p12 = scmp.eq.s32.totalorder %s3755_s5, 3  ;;  %p2206_p0 = scmp.eq.s32.totalorder %s3756_s17, 3 }
 0x7d5   :  { %p2195_p9 = por %p2194_p6, %p2192_p7  ;;  %p2209_p2 = scmp.eq.s32.totalorder %s3757_s24, 3 }
 0x7d7   :  { %p2198_p11 = por %p2197_p8, %p2195_p9 }
 0x7d9   :  { %p2201_p13 = por %p2200_p10, %p2198_p11 }
 0x7db   :  { %p2204_p1 = por %p2203_p12, %p2201_p13 }
 0x7dd   :  { %p2207_p3 = por %p2206_p0, %p2204_p1 }
 0x7df   :  { %p2210_p4 = por %p2209_p2, %p2207_p3 }
 0x7e0   :  { %v4594_v43 = vld [vmem:[#allocation7 + $0xc0] sm:$0xff] (%p2210_p4)   ;;  %v4805_v45 = vmov (%p2210_p4), 0.0   ;;  %v4595_v46 = vld [vmem:[#allocation7 + $0xc8] sm:$0xff] (%p2210_p4)   ;;  %vm4806_vm6 = vmmov (%p2210_p4), 0   ;;  %v4596_v47 = vld [vmem:[#allocation7 + $0xd0] sm:$0xff] (%p2210_p4)   ;;  %v2214_v59 = vpack.c.bf16 (%p2210_p4), %v1384_v8, %v1384_v8  ;;  %vm2443_vm7 = vcmp.eq.s32.totalorder (%p2210_p4), %v5154_v44, 3 }
 0x7e1   :  { %2213 = sbr.rel (!%p2210_p4) target bundleno = 2486 (0x9b6), region = 77  ;;  %4243 = vmatprep.subr.bf16.mxu0 (%p2210_p4), %v4805_v45  ;;  %4263 = vmatprep.subr.bf16.mxu1 (%p2210_p4), %v4805_v45  ;;  %v4602_v48 = vld [vmem:[#allocation9 + $0xc0] sm:$0xff] (%p2210_p4)   ;;  %v4597_v49 = vld [vmem:[#allocation7 + $0xd8] sm:$0xff] (%p2210_p4)   ;;  %v4603_v50 = vld [vmem:[#allocation9 + $0xc8] sm:$0xff] (%p2210_p4)   ;;  %v4807_v1 = vmov (%p2210_p4), 0   ;;  %v3778_v2 = vsel (%p2210_p4), %vm2443_vm7, 1.0, %v4805_v45 }
 0x7e2   :  { %4244 = vmatpush3.bf16.msra.mxu0 (%p2210_p4), %v4594_v43  ;;  %4259 = vmatprep.mubr.msk.bf16.mxu0 (%p2210_p4), %vm4806_vm6, %v4805_v45  ;;  %v4598_v51 = vld [vmem:[#allocation7 + $0xe0] sm:$0xff] (%p2210_p4)   ;;  %v4604_v52 = vld [vmem:[#allocation9 + $0xd0] sm:$0xff] (%p2210_p4)   ;;  %v4599_v53 = vld [vmem:[#allocation7 + $0xe8] sm:$0xff] (%p2210_p4)  }
 0x7e3   :  { %4245 = vmatprep.subr.bf16.mxu0 (%p2210_p4), %v4805_v45  ;;  %4279 = vmatprep.mubr.msk.bf16.mxu1 (%p2210_p4), %vm4806_vm6, %v4805_v45  ;;  %v4605_v54 = vld [vmem:[#allocation9 + $0xd8] sm:$0xff] (%p2210_p4)   ;;  %v4600_v55 = vld [vmem:[#allocation7 + $0xf0] sm:$0xff] (%p2210_p4)   ;;  %v4606_v56 = vld [vmem:[#allocation9 + $0xe0] sm:$0xff] (%p2210_p4)  }
 0x7e4   :  { %4264 = vmatpush3.bf16.msra.mxu1 (%p2210_p4), %v4602_v48  ;;  %v4601_v57 = vld [vmem:[#allocation7 + $0xf8] sm:$0xff] (%p2210_p4)   ;;  %v4607_v58 = vld [vmem:[#allocation9 + $0xe8] sm:$0xff] (%p2210_p4)   ;;  %v4608_v61 = vld [vmem:[#allocation9 + $0xf0] sm:$0xff] (%p2210_p4)   ;;  %4593 = vset.pattern.permute.xlu0 (%p2210_p4), %v4807_v1 }
 0x7e5   :  { %4265 = vmatprep.subr.bf16.mxu1 (%p2210_p4), %v4805_v45  ;;  %v4609_v62 = vld [vmem:[#allocation9 + $0xf8] sm:$0xff] (%p2210_p4)   ;;  %2449 = vperm.xlu0 (%p2210_p4), %4593, %v3778_v2   ;;  %v3759_v0 = vld [vmem:[%s5289_s8 + $0x3] ss:$0 sm:$0xff] (%p2210_p4) }
 0x7e6   :  { %4246 = vmatpush3.bf16.msra.mxu0 (%p2210_p4), %v4595_v46  ;;  %v3769_v12 = vld [vmem:[%s5291_s10 + $0x3] ss:$0 sm:$0xff] (%p2210_p4) }
 0x7e7   :  { %4247 = vmatprep.subr.bf16.mxu0 (%p2210_p4), %v4805_v45  ;;  %v2446_v17 = vld [vmem:[#allocation10] sm:$0xff] (%p2210_p4) }
 0x7e8   :  { %4266 = vmatpush3.bf16.msra.mxu1 %v4603_v50 }
 0x7e9   :  { %4267 = vmatprep.subr.bf16.mxu1 %v4805_v45 }
 0x7ea   :  { %4248 = vmatpush3.bf16.msra.mxu0 %v4596_v47 }
 0x7eb   :  { %4249 = vmatprep.subr.bf16.mxu0 %v4805_v45 }
 0x7ec   :  { %4268 = vmatpush3.bf16.msra.mxu1 %v4604_v52 }
 0x7ed   :  { %4269 = vmatprep.subr.bf16.mxu1 %v4805_v45 }
 0x7ee   :  { %4250 = vmatpush3.bf16.msra.mxu0 %v4597_v49 }
 0x7ef   :  { %4251 = vmatprep.subr.bf16.mxu0 %v4805_v45 }
 0x7f0   :  { %4270 = vmatpush3.bf16.msra.mxu1 %v4605_v54 }
 0x7f1   :  { %4271 = vmatprep.subr.bf16.mxu1 %v4805_v45 }
 0x7f2   :  { %4252 = vmatpush3.bf16.msra.mxu0 %v4598_v51 }
 0x7f3   :  { %4253 = vmatprep.subr.bf16.mxu0 %v4805_v45 }
 0x7f4   :  { %4272 = vmatpush3.bf16.msra.mxu1 %v4606_v56 }
 0x7f5   :  { %4273 = vmatprep.subr.bf16.mxu1 %v4805_v45 }
 0x7f6   :  { %4254 = vmatpush3.bf16.msra.mxu0 %v4599_v53 }
 0x7f7   :  { %4255 = vmatprep.subr.bf16.mxu0 %v4805_v45 }
 0x7f8   :  { %4274 = vmatpush3.bf16.msra.mxu1 %v4607_v58 }
 0x7f9   :  { %4275 = vmatprep.subr.bf16.mxu1 %v4805_v45 }
 0x7fa   :  { %4256 = vmatpush3.bf16.msra.mxu0 %v4600_v55 }
 0x7fb   :  { %4257 = vmatprep.subr.bf16.mxu0 %v4805_v45 }
 0x7fc   :  { %4276 = vmatpush3.bf16.msra.mxu1 %v4608_v61 }
 0x7fd   :  { %4277 = vmatprep.subr.bf16.mxu1 %v4805_v45 }
 0x7fe   :  { %4258 = vmatpush3.bf16.msra.mxu0 %v4601_v57 }
 0x800   :  { %4278 = vmatpush3.bf16.msra.mxu1 %v4609_v62 }
 0x801   :  { %4260 = vmatmul.mubr.bf16.vlgmr.msra.gmra.mrb[0].mxu0 %v2214_v59 }
 0x864   :  { %v2450_v14 = vpop.permute.xlu0 %2449 }
 0x8d4   :  { %v2322_v8 = vpop.f32.mrb[0].mxu0 }
 0x8d5   :  { %v2323_v3 = vadd.f32 %v3759_v0, %v2322_v8  ;;  %v4261_v5 = vpop.f32.mrb[1].mxu0 }
 0x8d6   :  { %v2325_v6 = vpop.f32.mrb[2].mxu0 }
 0x8d7   :  { %v2328_v9 = vmax.f32 %v2323_v3, 0.0  ;;  %v4262_v10 = vpop.f32.mrb[3].mxu0 }
 0x8d9   :  { %v2329_v11 = vpack.c.bf16 %v2328_v9, %v2328_v9 }
 0x8db   :  { %4280 = vmatmul.mubr.bf16.vlgmr.msra.gmra.mrb[0].mxu1 %v2329_v11 }
 0x9ae   :  { %v2437_v13 = vpop.f32.mrb[0].mxu1 }
 0x9af   :  { %v2438_v15 = vadd.f32 %v3769_v12, %v2437_v13  ;;  %v4281_v16 = vpop.f32.mrb[1].mxu1 }
 0x9b0   :  { %v2440_v18 = vpop.f32.mrb[2].mxu1 }
 0x9b1   :  { %v2452_v21 = vmul.f32 %v2450_v14, %v2438_v15  ;;  %v4282_v22 = vpop.f32.mrb[3].mxu1 }
 0x9b3   :  { %v2453_v60 = vadd.f32 %v2452_v21, %v2446_v17 }
 0x9b5   :  { %2454 = vst [vmem:[#allocation10] sm:$0xff] %v2453_v60 }
 0x9b6 PF:  { %s2455_s26 = sld [smem:[#allocation2]]  ;;  %s3779_s2 = sld [smem:[#allocation2 + $0x1]] }
 0x9b7   :  { %s3780_s3 = sld [smem:[#allocation2 + $0x2]]  ;;  %s3781_s4 = sld [smem:[#allocation2 + $0x3]] }
 0x9b8   :  { %s3782_s9 = sld [smem:[#allocation2 + $0x4]]  ;;  %s3783_s0 = sld [smem:[#allocation2 + $0x5]] }
 0x9b9   :  { %s3784_s30 = sld [smem:[#allocation2 + $0x6]]  ;;  %s3785_s27 = sld [smem:[#allocation2 + $0x7]] }
 0x9bc   :  { %p2456_p5 = scmp.eq.s32.totalorder %s2455_s26, 4  ;;  %p2458_p6 = scmp.eq.s32.totalorder %s3779_s2, 4 }
 0x9bd   :  { %p2461_p7 = scmp.eq.s32.totalorder %s3780_s3, 4  ;;  %p2464_p9 = scmp.eq.s32.totalorder %s3781_s4, 4 }
 0x9be   :  { %p2459_p8 = por %p2458_p6, %p2456_p5  ;;  %p2467_p11 = scmp.eq.s32.totalorder %s3782_s9, 4 }
 0x9bf   :  { %p2470_p13 = scmp.eq.s32.totalorder %s3783_s0, 4  ;;  %p2473_p1 = scmp.eq.s32.totalorder %s3784_s30, 4 }
 0x9c0   :  { %p2462_p10 = por %p2461_p7, %p2459_p8  ;;  %p2476_p3 = scmp.eq.s32.totalorder %s3785_s27, 4 }
 0x9c2   :  { %p2465_p12 = por %p2464_p9, %p2462_p10 }
 0x9c4   :  { %p2468_p0 = por %p2467_p11, %p2465_p12 }
 0x9c6   :  { %p2471_p2 = por %p2470_p13, %p2468_p0 }
 0x9c8   :  { %p2474_p4 = por %p2473_p1, %p2471_p2 }
 0x9ca   :  { %p2477_p5 = por %p2476_p3, %p2474_p4 }
 0x9cb   :  { %v4611_v4 = vld [vmem:[#allocation7 + $0x100] sm:$0xff] (%p2477_p5)   ;;  %v4808_v25 = vmov (%p2477_p5), 0.0   ;;  %v4612_v26 = vld [vmem:[#allocation7 + $0x108] sm:$0xff] (%p2477_p5)   ;;  %vm4809_vm8 = vmmov (%p2477_p5), 0   ;;  %v4613_v29 = vld [vmem:[#allocation7 + $0x110] sm:$0xff] (%p2477_p5)   ;;  %v2481_v7 = vpack.c.bf16 (%p2477_p5), %v1385_v27, %v1385_v27  ;;  %vm2710_vm9 = vcmp.eq.s32.totalorder (%p2477_p5), %v5154_v44, 4 }
 0x9cc   :  { %2480 = sbr.rel (!%p2477_p5) target bundleno = 2977 (0xba1), region = 81  ;;  %4283 = vmatprep.subr.bf16.mxu0 (%p2477_p5), %v4808_v25  ;;  %4303 = vmatprep.subr.bf16.mxu1 (%p2477_p5), %v4808_v25  ;;  %v4619_v30 = vld [vmem:[#allocation9 + $0x100] sm:$0xff] (%p2477_p5)   ;;  %v4614_v33 = vld [vmem:[#allocation7 + $0x118] sm:$0xff] (%p2477_p5)   ;;  %v4620_v34 = vld [vmem:[#allocation9 + $0x108] sm:$0xff] (%p2477_p5)   ;;  %v4810_v45 = vmov (%p2477_p5), 0   ;;  %v3806_v46 = vsel (%p2477_p5), %vm2710_vm9, 1.0, %v4808_v25 }
 0x9cd   :  { %4284 = vmatpush3.bf16.msra.mxu0 (%p2477_p5), %v4611_v4  ;;  %4299 = vmatprep.mubr.msk.bf16.mxu0 (%p2477_p5), %vm4809_vm8, %v4808_v25  ;;  %v4615_v35 = vld [vmem:[#allocation7 + $0x120] sm:$0xff] (%p2477_p5)   ;;  %v4621_v36 = vld [vmem:[#allocation9 + $0x110] sm:$0xff] (%p2477_p5)   ;;  %v4616_v37 = vld [vmem:[#allocation7 + $0x128] sm:$0xff] (%p2477_p5)  }
 0x9ce   :  { %4285 = vmatprep.subr.bf16.mxu0 (%p2477_p5), %v4808_v25  ;;  %4319 = vmatprep.mubr.msk.bf16.mxu1 (%p2477_p5), %vm4809_vm8, %v4808_v25  ;;  %v4622_v38 = vld [vmem:[#allocation9 + $0x118] sm:$0xff] (%p2477_p5)   ;;  %v4617_v39 = vld [vmem:[#allocation7 + $0x130] sm:$0xff] (%p2477_p5)   ;;  %v4623_v40 = vld [vmem:[#allocation9 + $0x120] sm:$0xff] (%p2477_p5)  }
 0x9cf   :  { %4304 = vmatpush3.bf16.msra.mxu1 (%p2477_p5), %v4619_v30  ;;  %v4618_v41 = vld [vmem:[#allocation7 + $0x138] sm:$0xff] (%p2477_p5)   ;;  %v4624_v63 = vld [vmem:[#allocation9 + $0x128] sm:$0xff] (%p2477_p5)   ;;  %v4625_v42 = vld [vmem:[#allocation9 + $0x130] sm:$0xff] (%p2477_p5)   ;;  %4610 = vset.pattern.permute.xlu0 (%p2477_p5), %v4810_v45 }
 0x9d0   :  { %4305 = vmatprep.subr.bf16.mxu1 (%p2477_p5), %v4808_v25  ;;  %v4626_v43 = vld [vmem:[#allocation9 + $0x138] sm:$0xff] (%p2477_p5)   ;;  %2716 = vperm.xlu0 (%p2477_p5), %4610, %v3806_v46   ;;  %v3787_v19 = vld [vmem:[%s5289_s8 + $0x4] ss:$0 sm:$0xff] (%p2477_p5) }
 0x9d1   :  { %4286 = vmatpush3.bf16.msra.mxu0 (%p2477_p5), %v4612_v26  ;;  %v3797_v53 = vld [vmem:[%s5291_s10 + $0x4] ss:$0 sm:$0xff] (%p2477_p5) }
 0x9d2   :  { %4287 = vmatprep.subr.bf16.mxu0 (%p2477_p5), %v4808_v25  ;;  %v2713_v58 = vld [vmem:[#allocation10] sm:$0xff] (%p2477_p5) }
 0x9d3   :  { %4306 = vmatpush3.bf16.msra.mxu1 %v4620_v34 }
 0x9d4   :  { %4307 = vmatprep.subr.bf16.mxu1 %v4808_v25 }
 0x9d5   :  { %4288 = vmatpush3.bf16.msra.mxu0 %v4613_v29 }
 0x9d6   :  { %4289 = vmatprep.subr.bf16.mxu0 %v4808_v25 }
 0x9d7   :  { %4308 = vmatpush3.bf16.msra.mxu1 %v4621_v36 }
 0x9d8   :  { %4309 = vmatprep.subr.bf16.mxu1 %v4808_v25 }
 0x9d9   :  { %4290 = vmatpush3.bf16.msra.mxu0 %v4614_v33 }
 0x9da   :  { %4291 = vmatprep.subr.bf16.mxu0 %v4808_v25 }
 0x9db   :  { %4310 = vmatpush3.bf16.msra.mxu1 %v4622_v38 }
 0x9dc   :  { %4311 = vmatprep.subr.bf16.mxu1 %v4808_v25 }
 0x9dd   :  { %4292 = vmatpush3.bf16.msra.mxu0 %v4615_v35 }
 0x9de   :  { %4293 = vmatprep.subr.bf16.mxu0 %v4808_v25 }
 0x9df   :  { %4312 = vmatpush3.bf16.msra.mxu1 %v4623_v40 }
 0x9e0   :  { %4313 = vmatprep.subr.bf16.mxu1 %v4808_v25 }
 0x9e1   :  { %4294 = vmatpush3.bf16.msra.mxu0 %v4616_v37 }
 0x9e2   :  { %4295 = vmatprep.subr.bf16.mxu0 %v4808_v25 }
 0x9e3   :  { %4314 = vmatpush3.bf16.msra.mxu1 %v4624_v63 }
 0x9e4   :  { %4315 = vmatprep.subr.bf16.mxu1 %v4808_v25 }
 0x9e5   :  { %4296 = vmatpush3.bf16.msra.mxu0 %v4617_v39 }
 0x9e6   :  { %4297 = vmatprep.subr.bf16.mxu0 %v4808_v25 }
 0x9e7   :  { %4316 = vmatpush3.bf16.msra.mxu1 %v4625_v42 }
 0x9e8   :  { %4317 = vmatprep.subr.bf16.mxu1 %v4808_v25 }
 0x9e9   :  { %4298 = vmatpush3.bf16.msra.mxu0 %v4618_v41 }
 0x9eb   :  { %4318 = vmatpush3.bf16.msra.mxu1 %v4626_v43 }
 0x9ec   :  { %4300 = vmatmul.mubr.bf16.vlgmr.msra.gmra.mrb[0].mxu0 %v2481_v7 }
 0xa4f   :  { %v2717_v55 = vpop.permute.xlu0 %2716 }
 0xabf   :  { %v2589_v27 = vpop.f32.mrb[0].mxu0 }
 0xac0   :  { %v2590_v47 = vadd.f32 %v3787_v19, %v2589_v27  ;;  %v4301_v48 = vpop.f32.mrb[1].mxu0 }
 0xac1   :  { %v2592_v49 = vpop.f32.mrb[2].mxu0 }
 0xac2   :  { %v2595_v50 = vmax.f32 %v2590_v47, 0.0  ;;  %v4302_v51 = vpop.f32.mrb[3].mxu0 }
 0xac4   :  { %v2596_v52 = vpack.c.bf16 %v2595_v50, %v2595_v50 }
 0xac6   :  { %4320 = vmatmul.mubr.bf16.vlgmr.msra.gmra.mrb[0].mxu1 %v2596_v52 }
 0xb99   :  { %v2704_v54 = vpop.f32.mrb[0].mxu1 }
 0xb9a   :  { %v2705_v56 = vadd.f32 %v3797_v53, %v2704_v54  ;;  %v4321_v57 = vpop.f32.mrb[1].mxu1 }
 0xb9b   :  { %v2707_v59 = vpop.f32.mrb[2].mxu1 }
 0xb9c   :  { %v2719_v61 = vmul.f32 %v2717_v55, %v2705_v56  ;;  %v4322_v62 = vpop.f32.mrb[3].mxu1 }
 0xb9e   :  { %v2720_v1 = vadd.f32 %v2719_v61, %v2713_v58 }
 0xba0   :  { %2721 = vst [vmem:[#allocation10] sm:$0xff] %v2720_v1 }
 0xba1 PF:  { %s2722_s14 = sld [smem:[#allocation2]]  ;;  %s3807_s15 = sld [smem:[#allocation2 + $0x1]] }
 0xba2   :  { %s3808_s16 = sld [smem:[#allocation2 + $0x2]]  ;;  %s3809_s19 = sld [smem:[#allocation2 + $0x3]] }
 0xba3   :  { %s3810_s1 = sld [smem:[#allocation2 + $0x4]]  ;;  %s3811_s6 = sld [smem:[#allocation2 + $0x5]] }
 0xba4   :  { %s3812_s20 = sld [smem:[#allocation2 + $0x6]]  ;;  %s3813_s22 = sld [smem:[#allocation2 + $0x7]] }
 0xba7   :  { %p2723_p6 = scmp.eq.s32.totalorder %s2722_s14, 5  ;;  %p2725_p7 = scmp.eq.s32.totalorder %s3807_s15, 5 }
 0xba8   :  { %p2728_p8 = scmp.eq.s32.totalorder %s3808_s16, 5  ;;  %p2731_p10 = scmp.eq.s32.totalorder %s3809_s19, 5 }
 0xba9   :  { %p2726_p9 = por %p2725_p7, %p2723_p6  ;;  %p2734_p12 = scmp.eq.s32.totalorder %s3810_s1, 5 }
 0xbaa   :  { %p2737_p0 = scmp.eq.s32.totalorder %s3811_s6, 5  ;;  %p2740_p2 = scmp.eq.s32.totalorder %s3812_s20, 5 }
 0xbab   :  { %p2729_p11 = por %p2728_p8, %p2726_p9  ;;  %p2743_p4 = scmp.eq.s32.totalorder %s3813_s22, 5 }
 0xbad   :  { %p2732_p13 = por %p2731_p10, %p2729_p11 }
 0xbaf   :  { %p2735_p1 = por %p2734_p12, %p2732_p13 }
 0xbb1   :  { %p2738_p3 = por %p2737_p0, %p2735_p1 }
 0xbb3   :  { %p2741_p5 = por %p2740_p2, %p2738_p3 }
 0xbb5   :  { %p2744_p6 = por %p2743_p4, %p2741_p5 }
 0xbb6   :  { %v4628_v2 = vld [vmem:[#allocation7 + $0x140] sm:$0xff] (%p2744_p6)   ;;  %v4811_v0 = vmov (%p2744_p6), 0.0   ;;  %v4629_v8 = vld [vmem:[#allocation7 + $0x148] sm:$0xff] (%p2744_p6)   ;;  %vm4812_vm10 = vmmov (%p2744_p6), 0   ;;  %v4630_v3 = vld [vmem:[#allocation7 + $0x150] sm:$0xff] (%p2744_p6)   ;;  %v2748_v18 = vpack.c.bf16 (%p2744_p6), %v1386_v31, %v1386_v31  ;;  %vm2977_vm11 = vcmp.eq.s32.totalorder (%p2744_p6), %v5154_v44, 5 }
 0xbb7   :  { %2747 = sbr.rel (!%p2744_p6) target bundleno = 3468 (0xd8c), region = 85  ;;  %4323 = vmatprep.subr.bf16.mxu0 (%p2744_p6), %v4811_v0  ;;  %4343 = vmatprep.subr.bf16.mxu1 (%p2744_p6), %v4811_v0  ;;  %v4636_v5 = vld [vmem:[#allocation9 + $0x140] sm:$0xff] (%p2744_p6)   ;;  %v4631_v6 = vld [vmem:[#allocation7 + $0x158] sm:$0xff] (%p2744_p6)   ;;  %v4637_v9 = vld [vmem:[#allocation9 + $0x148] sm:$0xff] (%p2744_p6)   ;;  %v4813_v60 = vmov (%p2744_p6), 0   ;;  %v3834_v4 = vsel (%p2744_p6), %vm2977_vm11, 1.0, %v4811_v0 }
 0xbb8   :  { %4324 = vmatpush3.bf16.msra.mxu0 (%p2744_p6), %v4628_v2  ;;  %4339 = vmatprep.mubr.msk.bf16.mxu0 (%p2744_p6), %vm4812_vm10, %v4811_v0  ;;  %v4632_v10 = vld [vmem:[#allocation7 + $0x160] sm:$0xff] (%p2744_p6)   ;;  %v4638_v11 = vld [vmem:[#allocation9 + $0x150] sm:$0xff] (%p2744_p6)   ;;  %v4633_v12 = vld [vmem:[#allocation7 + $0x168] sm:$0xff] (%p2744_p6)  }
 0xbb9   :  { %4325 = vmatprep.subr.bf16.mxu0 (%p2744_p6), %v4811_v0  ;;  %4359 = vmatprep.mubr.msk.bf16.mxu1 (%p2744_p6), %vm4812_vm10, %v4811_v0  ;;  %v4639_v13 = vld [vmem:[#allocation9 + $0x158] sm:$0xff] (%p2744_p6)   ;;  %v4634_v14 = vld [vmem:[#allocation7 + $0x170] sm:$0xff] (%p2744_p6)   ;;  %v4640_v15 = vld [vmem:[#allocation9 + $0x160] sm:$0xff] (%p2744_p6)  }
 0xbba   :  { %4344 = vmatpush3.bf16.msra.mxu1 (%p2744_p6), %v4636_v5  ;;  %v4635_v16 = vld [vmem:[#allocation7 + $0x178] sm:$0xff] (%p2744_p6)   ;;  %v4641_v17 = vld [vmem:[#allocation9 + $0x168] sm:$0xff] (%p2744_p6)   ;;  %v4642_v21 = vld [vmem:[#allocation9 + $0x170] sm:$0xff] (%p2744_p6)   ;;  %4627 = vset.pattern.permute.xlu0 (%p2744_p6), %v4813_v60 }
 0xbbb   :  { %4345 = vmatprep.subr.bf16.mxu1 (%p2744_p6), %v4811_v0  ;;  %v4643_v22 = vld [vmem:[#allocation9 + $0x178] sm:$0xff] (%p2744_p6)   ;;  %2983 = vperm.xlu0 (%p2744_p6), %4627, %v3834_v4   ;;  %v3815_v23 = vld [vmem:[%s5289_s8 + $0x5] ss:$0 sm:$0xff] (%p2744_p6) }
 0xbbc   :  { %4326 = vmatpush3.bf16.msra.mxu0 (%p2744_p6), %v4629_v8  ;;  %v3825_v35 = vld [vmem:[%s5291_s10 + $0x5] ss:$0 sm:$0xff] (%p2744_p6) }
 0xbbd   :  { %4327 = vmatprep.subr.bf16.mxu0 (%p2744_p6), %v4811_v0  ;;  %v2980_v40 = vld [vmem:[#allocation10] sm:$0xff] (%p2744_p6) }
 0xbbe   :  { %4346 = vmatpush3.bf16.msra.mxu1 %v4637_v9 }
 0xbbf   :  { %4347 = vmatprep.subr.bf16.mxu1 %v4811_v0 }
 0xbc0   :  { %4328 = vmatpush3.bf16.msra.mxu0 %v4630_v3 }
 0xbc1   :  { %4329 = vmatprep.subr.bf16.mxu0 %v4811_v0 }
 0xbc2   :  { %4348 = vmatpush3.bf16.msra.mxu1 %v4638_v11 }
 0xbc3   :  { %4349 = vmatprep.subr.bf16.mxu1 %v4811_v0 }
 0xbc4   :  { %4330 = vmatpush3.bf16.msra.mxu0 %v4631_v6 }
 0xbc5   :  { %4331 = vmatprep.subr.bf16.mxu0 %v4811_v0 }
 0xbc6   :  { %4350 = vmatpush3.bf16.msra.mxu1 %v4639_v13 }
 0xbc7   :  { %4351 = vmatprep.subr.bf16.mxu1 %v4811_v0 }
 0xbc8   :  { %4332 = vmatpush3.bf16.msra.mxu0 %v4632_v10 }
 0xbc9   :  { %4333 = vmatprep.subr.bf16.mxu0 %v4811_v0 }
 0xbca   :  { %4352 = vmatpush3.bf16.msra.mxu1 %v4640_v15 }
 0xbcb   :  { %4353 = vmatprep.subr.bf16.mxu1 %v4811_v0 }
 0xbcc   :  { %4334 = vmatpush3.bf16.msra.mxu0 %v4633_v12 }
 0xbcd   :  { %4335 = vmatprep.subr.bf16.mxu0 %v4811_v0 }
 0xbce   :  { %4354 = vmatpush3.bf16.msra.mxu1 %v4641_v17 }
 0xbcf   :  { %4355 = vmatprep.subr.bf16.mxu1 %v4811_v0 }
 0xbd0   :  { %4336 = vmatpush3.bf16.msra.mxu0 %v4634_v14 }
 0xbd1   :  { %4337 = vmatprep.subr.bf16.mxu0 %v4811_v0 }
 0xbd2   :  { %4356 = vmatpush3.bf16.msra.mxu1 %v4642_v21 }
 0xbd3   :  { %4357 = vmatprep.subr.bf16.mxu1 %v4811_v0 }
 0xbd4   :  { %4338 = vmatpush3.bf16.msra.mxu0 %v4635_v16 }
 0xbd6   :  { %4358 = vmatpush3.bf16.msra.mxu1 %v4643_v22 }
 0xbd7   :  { %4340 = vmatmul.mubr.bf16.vlgmr.msra.gmra.mrb[0].mxu0 %v2748_v18 }
 0xc3a   :  { %v2984_v37 = vpop.permute.xlu0 %2983 }
 0xcaa   :  { %v2856_v31 = vpop.f32.mrb[0].mxu0 }
 0xcab   :  { %v2857_v25 = vadd.f32 %v3815_v23, %v2856_v31  ;;  %v4341_v26 = vpop.f32.mrb[1].mxu0 }
 0xcac   :  { %v2859_v29 = vpop.f32.mrb[2].mxu0 }
 0xcad   :  { %v2862_v30 = vmax.f32 %v2857_v25, 0.0  ;;  %v4342_v33 = vpop.f32.mrb[3].mxu0 }
 0xcaf   :  { %v2863_v34 = vpack.c.bf16 %v2862_v30, %v2862_v30 }
 0xcb1   :  { %4360 = vmatmul.mubr.bf16.vlgmr.msra.gmra.mrb[0].mxu1 %v2863_v34 }
 0xd84   :  { %v2971_v36 = vpop.f32.mrb[0].mxu1 }
 0xd85   :  { %v2972_v38 = vadd.f32 %v3825_v35, %v2971_v36  ;;  %v4361_v39 = vpop.f32.mrb[1].mxu1 }
 0xd86   :  { %v2974_v41 = vpop.f32.mrb[2].mxu1 }
 0xd87   :  { %v2986_v63 = vmul.f32 %v2984_v37, %v2972_v38  ;;  %v4362_v7 = vpop.f32.mrb[3].mxu1 }
 0xd89   :  { %v2987_v42 = vadd.f32 %v2986_v63, %v2980_v40 }
 0xd8b   :  { %2988 = vst [vmem:[#allocation10] sm:$0xff] %v2987_v42 }
 0xd8c PF:  { %s2989_s7 = sld [smem:[#allocation2]]  ;;  %s3835_s18 = sld [smem:[#allocation2 + $0x1]] }
 0xd8d   :  { %s3836_s25 = sld [smem:[#allocation2 + $0x2]]  ;;  %s3837_s21 = sld [smem:[#allocation2 + $0x3]] }
 0xd8e   :  { %s3838_s26 = sld [smem:[#allocation2 + $0x4]]  ;;  %s3839_s2 = sld [smem:[#allocation2 + $0x5]] }
 0xd8f   :  { %s3840_s3 = sld [smem:[#allocation2 + $0x6]]  ;;  %s3841_s4 = sld [smem:[#allocation2 + $0x7]] }
 0xd92   :  { %p2990_p7 = scmp.eq.s32.totalorder %s2989_s7, 6  ;;  %p2992_p8 = scmp.eq.s32.totalorder %s3835_s18, 6 }
 0xd93   :  { %p2995_p9 = scmp.eq.s32.totalorder %s3836_s25, 6  ;;  %p2998_p11 = scmp.eq.s32.totalorder %s3837_s21, 6 }
 0xd94   :  { %p2993_p10 = por %p2992_p8, %p2990_p7  ;;  %p3001_p13 = scmp.eq.s32.totalorder %s3838_s26, 6 }
 0xd95   :  { %p3004_p1 = scmp.eq.s32.totalorder %s3839_s2, 6  ;;  %p3007_p3 = scmp.eq.s32.totalorder %s3840_s3, 6 }
 0xd96   :  { %p2996_p12 = por %p2995_p9, %p2993_p10  ;;  %p3010_p5 = scmp.eq.s32.totalorder %s3841_s4, 6 }
 0xd98   :  { %p2999_p0 = por %p2998_p11, %p2996_p12 }
 0xd9a   :  { %p3002_p2 = por %p3001_p13, %p2999_p0 }
 0xd9c   :  { %p3005_p4 = por %p3004_p1, %p3002_p2 }
 0xd9e   :  { %p3008_p6 = por %p3007_p3, %p3005_p4 }
 0xda0   :  { %p3011_p7 = por %p3010_p5, %p3008_p6 }
 0xda1   :  { %v4645_v43 = vld [vmem:[#allocation7 + $0x180] sm:$0xff] (%p3011_p7)   ;;  %v4814_v45 = vmov (%p3011_p7), 0.0   ;;  %v4646_v46 = vld [vmem:[#allocation7 + $0x188] sm:$0xff] (%p3011_p7)   ;;  %vm4815_vm12 = vmmov (%p3011_p7), 0   ;;  %v4647_v19 = vld [vmem:[#allocation7 + $0x190] sm:$0xff] (%p3011_p7)   ;;  %v3015_v57 = vpack.c.bf16 (%p3011_p7), %v1387_v28, %v1387_v28  ;;  %vm3244_vm13 = vcmp.eq.s32.totalorder (%p3011_p7), %v5154_v44, 6 }
 0xda2   :  { %3014 = sbr.rel (!%p3011_p7) target bundleno = 3959 (0xf77), region = 89  ;;  %4363 = vmatprep.subr.bf16.mxu0 (%p3011_p7), %v4814_v45  ;;  %4383 = vmatprep.subr.bf16.mxu1 (%p3011_p7), %v4814_v45  ;;  %v4653_v27 = vld [vmem:[#allocation9 + $0x180] sm:$0xff] (%p3011_p7)   ;;  %v4648_v47 = vld [vmem:[#allocation7 + $0x198] sm:$0xff] (%p3011_p7)   ;;  %v4654_v48 = vld [vmem:[#allocation9 + $0x188] sm:$0xff] (%p3011_p7)   ;;  %v4816_v61 = vmov (%p3011_p7), 0   ;;  %v3862_v62 = vsel (%p3011_p7), %vm3244_vm13, 1.0, %v4814_v45 }
 0xda3   :  { %4364 = vmatpush3.bf16.msra.mxu0 (%p3011_p7), %v4645_v43  ;;  %4379 = vmatprep.mubr.msk.bf16.mxu0 (%p3011_p7), %vm4815_vm12, %v4814_v45  ;;  %v4649_v49 = vld [vmem:[#allocation7 + $0x1a0] sm:$0xff] (%p3011_p7)   ;;  %v4655_v50 = vld [vmem:[#allocation9 + $0x190] sm:$0xff] (%p3011_p7)   ;;  %v4650_v51 = vld [vmem:[#allocation7 + $0x1a8] sm:$0xff] (%p3011_p7)  }
 0xda4   :  { %4365 = vmatprep.subr.bf16.mxu0 (%p3011_p7), %v4814_v45  ;;  %4399 = vmatprep.mubr.msk.bf16.mxu1 (%p3011_p7), %vm4815_vm12, %v4814_v45  ;;  %v4656_v52 = vld [vmem:[#allocation9 + $0x198] sm:$0xff] (%p3011_p7)   ;;  %v4651_v53 = vld [vmem:[#allocation7 + $0x1b0] sm:$0xff] (%p3011_p7)   ;;  %v4657_v54 = vld [vmem:[#allocation9 + $0x1a0] sm:$0xff] (%p3011_p7)  }
 0xda5   :  { %4384 = vmatpush3.bf16.msra.mxu1 (%p3011_p7), %v4653_v27  ;;  %v4652_v55 = vld [vmem:[#allocation7 + $0x1b8] sm:$0xff] (%p3011_p7)   ;;  %v4658_v56 = vld [vmem:[#allocation9 + $0x1a8] sm:$0xff] (%p3011_p7)   ;;  %v4659_v58 = vld [vmem:[#allocation9 + $0x1b0] sm:$0xff] (%p3011_p7)   ;;  %4644 = vset.pattern.permute.xlu0 (%p3011_p7), %v4816_v61 }
 0xda6   :  { %4385 = vmatprep.subr.bf16.mxu1 (%p3011_p7), %v4814_v45  ;;  %v4660_v59 = vld [vmem:[#allocation9 + $0x1b8] sm:$0xff] (%p3011_p7)   ;;  %3250 = vperm.xlu0 (%p3011_p7), %4644, %v3862_v62   ;;  %v3843_v20 = vld [vmem:[%s5289_s8 + $0x6] ss:$0 sm:$0xff] (%p3011_p7) }
 0xda7   :  { %4366 = vmatpush3.bf16.msra.mxu0 (%p3011_p7), %v4646_v46  ;;  %v3853_v6 = vld [vmem:[%s5291_s10 + $0x6] ss:$0 sm:$0xff] (%p3011_p7) }
 0xda8   :  { %4367 = vmatprep.subr.bf16.mxu0 (%p3011_p7), %v4814_v45  ;;  %v3247_v13 = vld [vmem:[#allocation10] sm:$0xff] (%p3011_p7) }
 0xda9   :  { %4386 = vmatpush3.bf16.msra.mxu1 %v4654_v48 }
 0xdaa   :  { %4387 = vmatprep.subr.bf16.mxu1 %v4814_v45 }
 0xdab   :  { %4368 = vmatpush3.bf16.msra.mxu0 %v4647_v19 }
 0xdac   :  { %4369 = vmatprep.subr.bf16.mxu0 %v4814_v45 }
 0xdad   :  { %4388 = vmatpush3.bf16.msra.mxu1 %v4655_v50 }
 0xdae   :  { %4389 = vmatprep.subr.bf16.mxu1 %v4814_v45 }
 0xdaf   :  { %4370 = vmatpush3.bf16.msra.mxu0 %v4648_v47 }
 0xdb0   :  { %4371 = vmatprep.subr.bf16.mxu0 %v4814_v45 }
 0xdb1   :  { %4390 = vmatpush3.bf16.msra.mxu1 %v4656_v52 }
 0xdb2   :  { %4391 = vmatprep.subr.bf16.mxu1 %v4814_v45 }
 0xdb3   :  { %4372 = vmatpush3.bf16.msra.mxu0 %v4649_v49 }
 0xdb4   :  { %4373 = vmatprep.subr.bf16.mxu0 %v4814_v45 }
 0xdb5   :  { %4392 = vmatpush3.bf16.msra.mxu1 %v4657_v54 }
 0xdb6   :  { %4393 = vmatprep.subr.bf16.mxu1 %v4814_v45 }
 0xdb7   :  { %4374 = vmatpush3.bf16.msra.mxu0 %v4650_v51 }
 0xdb8   :  { %4375 = vmatprep.subr.bf16.mxu0 %v4814_v45 }
 0xdb9   :  { %4394 = vmatpush3.bf16.msra.mxu1 %v4658_v56 }
 0xdba   :  { %4395 = vmatprep.subr.bf16.mxu1 %v4814_v45 }
 0xdbb   :  { %4376 = vmatpush3.bf16.msra.mxu0 %v4651_v53 }
 0xdbc   :  { %4377 = vmatprep.subr.bf16.mxu0 %v4814_v45 }
 0xdbd   :  { %4396 = vmatpush3.bf16.msra.mxu1 %v4659_v58 }
 0xdbe   :  { %4397 = vmatprep.subr.bf16.mxu1 %v4814_v45 }
 0xdbf   :  { %4378 = vmatpush3.bf16.msra.mxu0 %v4652_v55 }
 0xdc1   :  { %4398 = vmatpush3.bf16.msra.mxu1 %v4660_v59 }
 0xdc2   :  { %4380 = vmatmul.mubr.bf16.vlgmr.msra.gmra.mrb[0].mxu0 %v3015_v57 }
 0xe25   :  { %v3251_v10 = vpop.permute.xlu0 %3250 }
 0xe95   :  { %v3123_v28 = vpop.f32.mrb[0].mxu0 }
 0xe96   :  { %v3124_v1 = vadd.f32 %v3843_v20, %v3123_v28  ;;  %v4381_v2 = vpop.f32.mrb[1].mxu0 }
 0xe97   :  { %v3126_v0 = vpop.f32.mrb[2].mxu0 }
 0xe98   :  { %v3129_v8 = vmax.f32 %v3124_v1, 0.0  ;;  %v4382_v3 = vpop.f32.mrb[3].mxu0 }
 0xe9a   :  { %v3130_v5 = vpack.c.bf16 %v3129_v8, %v3129_v8 }
 0xe9c   :  { %4400 = vmatmul.mubr.bf16.vlgmr.msra.gmra.mrb[0].mxu1 %v3130_v5 }
 0xf6f   :  { %v3238_v9 = vpop.f32.mrb[0].mxu1 }
 0xf70   :  { %v3239_v11 = vadd.f32 %v3853_v6, %v3238_v9  ;;  %v4401_v12 = vpop.f32.mrb[1].mxu1 }
 0xf71   :  { %v3241_v14 = vpop.f32.mrb[2].mxu1 }
 0xf72   :  { %v3253_v15 = vmul.f32 %v3251_v10, %v3239_v11  ;;  %v4402_v16 = vpop.f32.mrb[3].mxu1 }
 0xf74   :  { %v3254_v17 = vadd.f32 %v3253_v15, %v3247_v13 }
 0xf76   :  { %3255 = vst [vmem:[#allocation10] sm:$0xff] %v3254_v17 }
 0xf77 PF:  { %s3256_s28 = sld [smem:[#allocation2]]  ;;  %s3863_s29 = sld [smem:[#allocation2 + $0x1]] }
 0xf78   :  { %s3864_s12 = sld [smem:[#allocation2 + $0x2]]  ;;  %s3865_s13 = sld [smem:[#allocation2 + $0x3]] }
 0xf79   :  { %s3866_s14 = sld [smem:[#allocation2 + $0x4]]  ;;  %s3867_s15 = sld [smem:[#allocation2 + $0x5]] }
 0xf7a   :  { %s3868_s16 = sld [smem:[#allocation2 + $0x6]]  ;;  %s3869_s19 = sld [smem:[#allocation2 + $0x7]] }
 0xf7d   :  { %p3257_p8 = scmp.eq.s32.totalorder %s3256_s28, 7  ;;  %p3259_p9 = scmp.eq.s32.totalorder %s3863_s29, 7 }
 0xf7e   :  { %p3262_p10 = scmp.eq.s32.totalorder %s3864_s12, 7  ;;  %p3265_p12 = scmp.eq.s32.totalorder %s3865_s13, 7 }
 0xf7f   :  { %p3260_p11 = por %p3259_p9, %p3257_p8  ;;  %p3268_p0 = scmp.eq.s32.totalorder %s3866_s14, 7 }
 0xf80   :  { %p3271_p2 = scmp.eq.s32.totalorder %s3867_s15, 7  ;;  %p3274_p4 = scmp.eq.s32.totalorder %s3868_s16, 7 }
 0xf81   :  { %p3263_p13 = por %p3262_p10, %p3260_p11  ;;  %p3277_p6 = scmp.eq.s32.totalorder %s3869_s19, 7 }
 0xf83   :  { %p3266_p1 = por %p3265_p12, %p3263_p13 }
 0xf85   :  { %p3269_p3 = por %p3268_p0, %p3266_p1 }
 0xf87   :  { %p3272_p5 = por %p3271_p2, %p3269_p3 }
 0xf89   :  { %p3275_p7 = por %p3274_p4, %p3272_p5 }
 0xf8b   :  { %p3278_p8 = por %p3277_p6, %p3275_p7 }
 0xf8c   :  { %v4662_v18 = vld [vmem:[#allocation7 + $0x1c0] sm:$0xff] (%p3278_p8)   ;;  %v4817_v21 = vmov (%p3278_p8), 0.0   ;;  %v4663_v22 = vld [vmem:[#allocation7 + $0x1c8] sm:$0xff] (%p3278_p8)   ;;  %vm4818_vm14 = vmmov (%p3278_p8), 0   ;;  %v4664_v60 = vld [vmem:[#allocation7 + $0x1d0] sm:$0xff] (%p3278_p8)   ;;  %v3282_v37 = vpack.c.bf16 (%p3278_p8), %v1388_v32, %v1388_v32  ;;  %vm3511_vm15 = vcmp.eq.s32.totalorder (%p3278_p8), %v5154_v44, 7 }
 0xf8d   :  { %3281 = sbr.rel (!%p3278_p8) target bundleno = 4450 (0x1162), region = 93  ;;  %4403 = vmatprep.subr.bf16.mxu0 (%p3278_p8), %v4817_v21  ;;  %4423 = vmatprep.subr.bf16.mxu1 (%p3278_p8), %v4817_v21  ;;  %v4670_v4 = vld [vmem:[#allocation9 + $0x1c0] sm:$0xff] (%p3278_p8)   ;;  %v4665_v23 = vld [vmem:[#allocation7 + $0x1d8] sm:$0xff] (%p3278_p8)   ;;  %v4671_v31 = vld [vmem:[#allocation9 + $0x1c8] sm:$0xff] (%p3278_p8)   ;;  %v4819_v40 = vmov (%p3278_p8), 0   ;;  %v3890_v41 = vsel (%p3278_p8), %vm3511_vm15, 1.0, %v4817_v21 }
 0xf8e   :  { %4404 = vmatpush3.bf16.msra.mxu0 (%p3278_p8), %v4662_v18  ;;  %4419 = vmatprep.mubr.msk.bf16.mxu0 (%p3278_p8), %vm4818_vm14, %v4817_v21  ;;  %v4666_v25 = vld [vmem:[#allocation7 + $0x1e0] sm:$0xff] (%p3278_p8)   ;;  %v4672_v26 = vld [vmem:[#allocation9 + $0x1d0] sm:$0xff] (%p3278_p8)   ;;  %v4667_v29 = vld [vmem:[#allocation7 + $0x1e8] sm:$0xff] (%p3278_p8)  }
 0xf8f   :  { %4405 = vmatprep.subr.bf16.mxu0 (%p3278_p8), %v4817_v21  ;;  %4439 = vmatprep.mubr.msk.bf16.mxu1 (%p3278_p8), %vm4818_vm14, %v4817_v21  ;;  %v4673_v30 = vld [vmem:[#allocation9 + $0x1d8] sm:$0xff] (%p3278_p8)   ;;  %v4668_v33 = vld [vmem:[#allocation7 + $0x1f0] sm:$0xff] (%p3278_p8)   ;;  %v4674_v34 = vld [vmem:[#allocation9 + $0x1e0] sm:$0xff] (%p3278_p8)  }
 0xf90   :  { %4424 = vmatpush3.bf16.msra.mxu1 (%p3278_p8), %v4670_v4  ;;  %v4669_v35 = vld [vmem:[#allocation7 + $0x1f8] sm:$0xff] (%p3278_p8)   ;;  %v4675_v36 = vld [vmem:[#allocation9 + $0x1e8] sm:$0xff] (%p3278_p8)   ;;  %v4676_v38 = vld [vmem:[#allocation9 + $0x1f0] sm:$0xff] (%p3278_p8)   ;;  %4661 = vset.pattern.permute.xlu0 (%p3278_p8), %v4819_v40 }
 0xf91   :  { %4425 = vmatprep.subr.bf16.mxu1 (%p3278_p8), %v4817_v21  ;;  %v4677_v39 = vld [vmem:[#allocation9 + $0x1f8] sm:$0xff] (%p3278_p8)   ;;  %3517 = vperm.xlu0 (%p3278_p8), %4661, %v3890_v41   ;;  %v3871_v24 = vld [vmem:[%s5289_s8 + $0x7] ss:$0 sm:$0xff] (%p3278_p8) }
 0xf92   :  { %4406 = vmatpush3.bf16.msra.mxu0 (%p3278_p8), %v4663_v22  ;;  %v3881_v44 = vld [vmem:[%s5291_s10 + $0x7] ss:$0 sm:$0xff] (%p3278_p8) }
 0xf93   :  { %4407 = vmatprep.subr.bf16.mxu0 (%p3278_p8), %v4817_v21  ;;  %v3514_v49 = vld [vmem:[#allocation10] sm:$0xff] (%p3278_p8) }
 0xf94   :  { %4426 = vmatpush3.bf16.msra.mxu1 %v4671_v31 }
 0xf95   :  { %4427 = vmatprep.subr.bf16.mxu1 %v4817_v21 }
 0xf96   :  { %4408 = vmatpush3.bf16.msra.mxu0 %v4664_v60 }
 0xf97   :  { %4409 = vmatprep.subr.bf16.mxu0 %v4817_v21 }
 0xf98   :  { %4428 = vmatpush3.bf16.msra.mxu1 %v4672_v26 }
 0xf99   :  { %4429 = vmatprep.subr.bf16.mxu1 %v4817_v21 }
 0xf9a   :  { %4410 = vmatpush3.bf16.msra.mxu0 %v4665_v23 }
 0xf9b   :  { %4411 = vmatprep.subr.bf16.mxu0 %v4817_v21 }
 0xf9c   :  { %4430 = vmatpush3.bf16.msra.mxu1 %v4673_v30 }
 0xf9d   :  { %4431 = vmatprep.subr.bf16.mxu1 %v4817_v21 }
 0xf9e   :  { %4412 = vmatpush3.bf16.msra.mxu0 %v4666_v25 }
 0xf9f   :  { %4413 = vmatprep.subr.bf16.mxu0 %v4817_v21 }
 0xfa0   :  { %4432 = vmatpush3.bf16.msra.mxu1 %v4674_v34 }
 0xfa1   :  { %4433 = vmatprep.subr.bf16.mxu1 %v4817_v21 }
 0xfa2   :  { %4414 = vmatpush3.bf16.msra.mxu0 %v4667_v29 }
 0xfa3   :  { %4415 = vmatprep.subr.bf16.mxu0 %v4817_v21 }
 0xfa4   :  { %4434 = vmatpush3.bf16.msra.mxu1 %v4675_v36 }
 0xfa5   :  { %4435 = vmatprep.subr.bf16.mxu1 %v4817_v21 }
 0xfa6   :  { %4416 = vmatpush3.bf16.msra.mxu0 %v4668_v33 }
 0xfa7   :  { %4417 = vmatprep.subr.bf16.mxu0 %v4817_v21 }
 0xfa8   :  { %4436 = vmatpush3.bf16.msra.mxu1 %v4676_v38 }
 0xfa9   :  { %4437 = vmatprep.subr.bf16.mxu1 %v4817_v21 }
 0xfaa   :  { %4418 = vmatpush3.bf16.msra.mxu0 %v4669_v35 }
 0xfac   :  { %4438 = vmatpush3.bf16.msra.mxu1 %v4677_v39 }
 0xfad   :  { %4420 = vmatmul.mubr.bf16.vlgmr.msra.gmra.mrb[0].mxu0 %v3282_v37 }
0x1010   :  { %v3518_v27 = vpop.permute.xlu0 %3517 }
0x1080   :  { %v3390_v32 = vpop.f32.mrb[0].mxu0 }
0x1081   :  { %v3391_v63 = vadd.f32 %v3871_v24, %v3390_v32  ;;  %v4421_v7 = vpop.f32.mrb[1].mxu0 }
0x1082   :  { %v3393_v42 = vpop.f32.mrb[2].mxu0 }
0x1083   :  { %v3396_v43 = vmax.f32 %v3391_v63, 0.0  ;;  %v4422_v45 = vpop.f32.mrb[3].mxu0 }
0x1085   :  { %v3397_v46 = vpack.c.bf16 %v3396_v43, %v3396_v43 }
0x1087   :  { %4440 = vmatmul.mubr.bf16.vlgmr.msra.gmra.mrb[0].mxu1 %v3397_v46 }
0x115a   :  { %v3505_v19 = vpop.f32.mrb[0].mxu1 }
0x115b   :  { %v3506_v47 = vadd.f32 %v3881_v44, %v3505_v19  ;;  %v4441_v48 = vpop.f32.mrb[1].mxu1 }
0x115c   :  { %v3508_v50 = vpop.f32.mrb[2].mxu1 }
0x115d   :  { %v3520_v51 = vmul.f32 %v3518_v27, %v3506_v47  ;;  %v4442_v52 = vpop.f32.mrb[3].mxu1 }
0x115f   :  { %v3521_v53 = vadd.f32 %v3520_v51, %v3514_v49 }
0x1161   :  { %3522 = vst [vmem:[#allocation10] sm:$0xff] %v3521_v53 }
0x1162 PF:  { %s4820_s8 = smov [#allocation10]  }
0x1163   :  { %s3529_s23 = sshll.u32 %s4820_s8, 4  ;;  %s3530_s23 = int_to_ptr.vmem [resolvable:$true] %s3529_s23 }
0x1164   :  { %s4756_s5 = scalar_lea.vmem %s3530_s23, 128  ;;  %p4761_p10 = scmp.lt.s32.totalorder %s3530_s23, %s3530_s23 }
0x1165   :  { %p4757_p9 = scmp.ne.s32.totalorder %s3530_s23, %s4756_s5  ;;  %p4762_p11 = scmp.lt.s32.totalorder %s4756_s5, %s4756_s5 }
0x1167   :  { %p4763_p12 = por %p4762_p11, %p4761_p10 }
0x1169   :  { %p4764_p13 = pnand %p4763_p12, %p4757_p9 }
0x116b   :  { %4767 = shalt.err (!%p4764_p13)
}
0x116c   :  { %s4768_s24 = scalar_lea.hbm %s5292_s11, 128 }
0x116d   :  { %p4769_p0 = scmp.ne.s32.totalorder %s5292_s11, %s4768_s24  ;;  %p4772_p1 = scmp.lt.u32.totalorder %s4768_s24, %s5292_s11 }
0x116f   :  { %p4774_p2 = pnand %p4772_p1, %p4769_p0 }
0x1171   :  { %4777 = shalt.err (!%p4774_p2)
}
0x1172   :  { %3532 = dma.vmem_to_hbm [thread:$0]  %s3530_s23, 128, %s5292_s11, [#allocation4]  }
0x1173   :  { %4784 = dma.done.wait [#allocation4], 128  }
0x1174   :  { %4785 = vsyncadd [#allocation4], 4294967168 }
0x1175   :  { %3536 = vsyncpa [#allocation3], 1 }
0x1176   :  { %3537 = vsyncpa [#allocation8], 1 }
0x1177   :  { %3538 = vsyncpa [#allocation4], 1 }
0x1178   :  { %3539 = vsyncpa [#allocation5], 1 }

</bundles_post_ra>
